<compile_context>
chip_gen: v7x
topology: tpu7x:2x2x1
jax: 0.10.0
libtpu: 0.0.40
codegen_flags: <defaults>
</compile_context>

<pallas_src>
import functools

import jax
import jax.numpy as jnp
import numpy as np
from jax import lax
from jax.experimental import pallas as pl
from jax.experimental.pallas import tpu as pltpu

EPS = 1e-5   # PyTorch LayerNorm default eps
HALO = 128   # flat-HW zero halo per side; must be >= W+1 so row-OOB taps read zeros


def _convbnrelu_ln_kernel(x_ref, w_ref, b_ref, g_ref, bt_ref, o_ref, stage_ref,
                          *, h, w, cin, cout):
    # x_ref   : (Cin, HALO + H*W + HALO) bf16   flattened input with zero halo
    # w_ref   : (Cout, 9*Cin)            bf16   conv weights, tap-major K
    # b_ref   : (Cout, 1)                f32    conv bias
    # g_ref   : (Cout, H*W)              bf16   LayerNorm gamma (flattened)
    # bt_ref  : (Cout, H*W)              bf16   LayerNorm beta
    # o_ref   : (Cout, H*W)              f32    output block (holds y between passes)
    # stage_ref: (9*Cin, H*W)            bf16   im2col staging slab (VMEM scratch)
    hw = h * w

    # Column masks, hoisted out of the tap loop.  Row-out-of-range taps already
    # read zeros from the halo, so no row masks are needed.
    col = lax.rem(lax.broadcasted_iota(jnp.int32, (1, hw), 1), w)
    mask_l = (col >= 1).astype(x_ref.dtype)       # tap dx = -1: needs col-1 >= 0
    mask_r = (col <= w - 2).astype(x_ref.dtype)   # tap dx = +1: needs col+1 <  w

    # Build the (9*Cin, HW) staging slab: one shifted (and column-masked) copy
    # per tap from the resident haloed input.  All slice starts are static.
    for dy in (-1, 0, 1):
        for dx in (-1, 0, 1):
            t = (dy + 1) * 3 + (dx + 1)
            shift = dy * w + dx
            x_tap = x_ref[:, pl.ds(HALO + shift, hw)]        # (Cin, HW) bf16
            if dx == -1:
                x_tap = x_tap * mask_l
            elif dx == 1:
                x_tap = x_tap * mask_r
            stage_ref[t * cin:(t + 1) * cin, :] = x_tap

    # Single fused MXU matmul over K = 9*Cin (bf16 operands, f32 accumulate),
    # conv bias folded into the same write of the output block.
    o_ref[...] = jnp.dot(w_ref[...], stage_ref[...],
                         preferred_element_type=jnp.float32) + b_ref[...]

    # Two-pass LayerNorm over the whole (Cout, H, W) slab (biased variance,
    # matching PyTorch), then affine (f32 math) + ReLU fused into the store.
    inv_cnt = 1.0 / float(cout * hw)
    mu = jnp.sum(o_ref[...]) * inv_cnt
    d = o_ref[...] - mu
    var = jnp.sum(d * d) * inv_cnt
    inv = lax.rsqrt(var + EPS)
    o_ref[...] = jnp.maximum(
        (o_ref[...] - mu) * inv * g_ref[...].astype(jnp.float32)
        + bt_ref[...].astype(jnp.float32),
        0.0)


def conv_bn_relu_ln(x, w, b, gamma, beta):
    """ConvBNRelu_LN forward (stride=1). x: (N, Cin, 64, 64) NCHW float32."""
    n, cin, h, wd = x.shape
    cout = w.shape[0]
    hw = h * wd
    assert HALO >= wd + 1, "halo must cover a full row shift (+/- W +/- 1)"
    hwp = hw + 2 * HALO

    # Flatten spatial to the lane axis, cast to bf16, add the zero halo.
    xf = x.reshape(n, cin, hw).astype(jnp.bfloat16)
    x_pad = jnp.pad(xf, ((0, 0), (0, 0), (HALO, HALO)))
    # (Cout, Cin, 3, 3) -> (Cout, 3, 3, Cin) -> (Cout, 9*Cin): tap-major K order
    # matching the staging slab layout (k-index = (ky*3+kx)*Cin + cin).
    w2 = jnp.transpose(w, (0, 2, 3, 1)).reshape(cout, 9 * cin).astype(jnp.bfloat16)
    b2 = b.reshape(cout, 1).astype(jnp.float32)
    g2 = gamma.reshape(cout, hw).astype(jnp.bfloat16)
    bt2 = beta.reshape(cout, hw).astype(jnp.bfloat16)

    kernel = functools.partial(_convbnrelu_ln_kernel,
                               h=h, w=wd, cin=cin, cout=cout)

    flops = 2 * n * cout * 9 * cin * hw
    bytes_accessed = (2 * n * cin * hwp          # bf16 input (haloed)
                      + 2 * cout * 9 * cin       # bf16 weights
                      + 4 * cout                 # f32 bias
                      + 2 * 2 * cout * hw        # bf16 gamma + beta
                      + 4 * n * cout * hw)       # f32 output

    out = pl.pallas_call(
        kernel,
        out_shape=jax.ShapeDtypeStruct((n, cout, hw), jnp.float32),
        grid_spec=pltpu.PrefetchScalarGridSpec(
            num_scalar_prefetch=0,
            grid=(n,),                                   # one sample per grid step
            in_specs=[
                pl.BlockSpec((None, cin, hwp), lambda i: (i, 0, 0)),
                pl.BlockSpec((cout, 9 * cin), lambda i: (0, 0)),
                pl.BlockSpec((cout, 1), lambda i: (0, 0)),
                pl.BlockSpec((cout, hw), lambda i: (0, 0)),
                pl.BlockSpec((cout, hw), lambda i: (0, 0)),
            ],
            out_specs=pl.BlockSpec((None, cout, hw), lambda i: (i, 0, 0)),
            scratch_shapes=[pltpu.VMEM((9 * cin, hw), jnp.bfloat16)],
        ),
        compiler_params=pltpu.CompilerParams(
            dimension_semantics=("parallel",)),          # batch splits across v7x cores
        cost_estimate=pl.CostEstimate(
            flops=flops, transcendentals=0, bytes_accessed=bytes_accessed),
    )(x_pad, w2, b2, g2, bt2)
    return out.reshape(n, cout, h, wd)                   # back to NCHW


def _reference(x, w, b, gamma, beta):
    # pure-JAX reference for correctness check (full-f32 HIGHEST-precision conv)
    y = jax.lax.conv_general_dilated(
        x, w, window_strides=(1, 1), padding=((1, 1), (1, 1)),
        dimension_numbers=("NCHW", "OIHW", "NCHW"),
        precision=jax.lax.Precision.HIGHEST)
    y = y + b[None, :, None, None]
    mu = y.mean(axis=(1, 2, 3), keepdims=True)
    var = ((y - mu) ** 2).mean(axis=(1, 2, 3), keepdims=True)
    yn = (y - mu) / jnp.sqrt(var + EPS)
    return jnp.maximum(yn * gamma[None] + beta[None], 0.0)


if __name__ == "__main__":
    # LayerNorm((COUT, 64, 64)) in the module forces spatial 64x64.
    N, CIN, COUT, H, W = 2, 4, 8, 64, 64

    key = jax.random.PRNGKey(0)
    kx, kw, kb, kg, kbt = jax.random.split(key, 5)
    x = jax.random.normal(kx, (N, CIN, H, W), jnp.float32)
    w = jax.random.normal(kw, (COUT, CIN, 3, 3), jnp.float32) * 0.1   # Conv2d weight
    b = jax.random.normal(kb, (COUT,), jnp.float32) * 0.1             # Conv2d bias
    gamma = 1.0 + 0.1 * jax.random.normal(kg, (COUT, H, W), jnp.float32)  # LN weight
    beta = 0.1 * jax.random.normal(kbt, (COUT, H, W), jnp.float32)        # LN bias

    out = jax.block_until_ready(conv_bn_relu_ln(x, w, b, gamma, beta))
    ref = jax.block_until_ready(_reference(x, w, b, gamma, beta))

    assert out.shape == (N, COUT, H, W)
    # bf16 matmul operands + bf16 gamma/beta give ~1e-2 worst-case deviation
    # from the full-f32 HIGHEST-precision reference; 2e-2 keeps margin.
    np.testing.assert_allclose(np.asarray(out), np.asarray(ref), rtol=2e-2, atol=2e-2)
    print("KERNEL_OK")
</pallas_src>

<mosaic_0001>
module attributes {stable_mosaic.version = 11 : i64} {
  func.func @_convbnrelu_ln_kernel(%arg0: i32, %arg1: memref<1x4x4352xbf16, #tpu.memory_space<vmem>>, %arg2: memref<8x36xbf16, #tpu.memory_space<vmem>>, %arg3: memref<8x1xf32, #tpu.memory_space<vmem>>, %arg4: memref<8x4096xbf16, #tpu.memory_space<vmem>>, %arg5: memref<8x4096xbf16, #tpu.memory_space<vmem>>, %arg6: memref<1x8x4096xf32, #tpu.memory_space<vmem>>, %arg7: memref<36x4096xbf16, #tpu.memory_space<vmem>>) attributes {dimension_semantics = [#tpu.dimension_semantics<parallel>], iteration_bounds = array<i64: 2>, scalar_prefetch = 0 : i64, scratch_operands = 1 : i64, tpu.core_type = #tpu.core_type<tc>, window_params = [{transform_indices = @transform_0, window_bounds = array<i64: 1, 4, 4352>}, {pipeline_mode = #tpu.pipeline_mode<synchronous>, transform_indices = @transform_1, window_bounds = array<i64: 8, 36>}, {pipeline_mode = #tpu.pipeline_mode<synchronous>, transform_indices = @transform_2, window_bounds = array<i64: 8, 1>}, {pipeline_mode = #tpu.pipeline_mode<synchronous>, transform_indices = @transform_3, window_bounds = array<i64: 8, 4096>}, {pipeline_mode = #tpu.pipeline_mode<synchronous>, transform_indices = @transform_4, window_bounds = array<i64: 8, 4096>}, {transform_indices = @transform_5, window_bounds = array<i64: 1, 8, 4096>}]} {
    %0 = tpu.iota {dimensions = array<i32: 1>} : vector<1x4096xi32>
    %c64_i32 = arith.constant 64 : i32
    %1 = vector.broadcast %c64_i32 : i32 to vector<1x4096xi32>
    %2 = arith.remsi %0, %1 : vector<1x4096xi32>
    %c1_i32 = arith.constant 1 : i32
    %3 = vector.broadcast %c1_i32 : i32 to vector<1x4096xi32>
    %4 = arith.cmpi sge, %2, %3 : vector<1x4096xi32>
    %5 = arith.extui %4 : vector<1x4096xi1> to vector<1x4096xi32>
    %6 = arith.sitofp %5 : vector<1x4096xi32> to vector<1x4096xf32>
    %7 = arith.truncf %6 : vector<1x4096xf32> to vector<1x4096xbf16>
    %c62_i32 = arith.constant 62 : i32
    %8 = vector.broadcast %c62_i32 : i32 to vector<1x4096xi32>
    %9 = arith.cmpi sle, %2, %8 : vector<1x4096xi32>
    %10 = arith.extui %9 : vector<1x4096xi1> to vector<1x4096xi32>
    %11 = arith.sitofp %10 : vector<1x4096xi32> to vector<1x4096xf32>
    %12 = arith.truncf %11 : vector<1x4096xf32> to vector<1x4096xbf16>
    %c0 = arith.constant 0 : index
    %c0_0 = arith.constant 0 : index
    %c63 = arith.constant 63 : index
    %13 = vector.load %arg1[%c0, %c0_0, %c63] : memref<1x4x4352xbf16, #tpu.memory_space<vmem>>, vector<1x4x4096xbf16>
    %14 = vector.shape_cast %13 : vector<1x4x4096xbf16> to vector<4x4096xbf16>
    %15 = vector.broadcast %7 : vector<1x4096xbf16> to vector<4x4096xbf16>
    %16 = arith.mulf %14, %15 : vector<4x4096xbf16>
    %c0_1 = arith.constant 0 : index
    %c0_2 = arith.constant 0 : index
    %17 = vector.load %arg7[%c0_1, %c0_2] : memref<36x4096xbf16, #tpu.memory_space<vmem>>, vector<4x4096xbf16>
    tpu.vector_store %arg7[%c0_1, %c0_2], %16 {strides = array<i32>} : memref<36x4096xbf16, #tpu.memory_space<vmem>>, vector<4x4096xbf16>,
    %c0_3 = arith.constant 0 : index
    %c0_4 = arith.constant 0 : index
    %c64 = arith.constant 64 : index
    %18 = vector.load %arg1[%c0_3, %c0_4, %c64] : memref<1x4x4352xbf16, #tpu.memory_space<vmem>>, vector<1x4x4096xbf16>
    %19 = vector.shape_cast %18 : vector<1x4x4096xbf16> to vector<4x4096xbf16>
    %c4 = arith.constant 4 : index
    %c0_5 = arith.constant 0 : index
    %20 = vector.load %arg7[%c4, %c0_5] : memref<36x4096xbf16, #tpu.memory_space<vmem>>, vector<4x4096xbf16>
    tpu.vector_store %arg7[%c4, %c0_5], %19 {strides = array<i32>} : memref<36x4096xbf16, #tpu.memory_space<vmem>>, vector<4x4096xbf16>,
    %c0_6 = arith.constant 0 : index
    %c0_7 = arith.constant 0 : index
    %c65 = arith.constant 65 : index
    %21 = vector.load %arg1[%c0_6, %c0_7, %c65] : memref<1x4x4352xbf16, #tpu.memory_space<vmem>>, vector<1x4x4096xbf16>
    %22 = vector.shape_cast %21 : vector<1x4x4096xbf16> to vector<4x4096xbf16>
    %23 = vector.broadcast %12 : vector<1x4096xbf16> to vector<4x4096xbf16>
    %24 = arith.mulf %22, %23 : vector<4x4096xbf16>
    %c8 = arith.constant 8 : index
    %c0_8 = arith.constant 0 : index
    %25 = vector.load %arg7[%c8, %c0_8] : memref<36x4096xbf16, #tpu.memory_space<vmem>>, vector<4x4096xbf16>
    tpu.vector_store %arg7[%c8, %c0_8], %24 {strides = array<i32>} : memref<36x4096xbf16, #tpu.memory_space<vmem>>, vector<4x4096xbf16>,
    %c0_9 = arith.constant 0 : index
    %c0_10 = arith.constant 0 : index
    %c127 = arith.constant 127 : index
    %26 = vector.load %arg1[%c0_9, %c0_10, %c127] : memref<1x4x4352xbf16, #tpu.memory_space<vmem>>, vector<1x4x4096xbf16>
    %27 = vector.shape_cast %26 : vector<1x4x4096xbf16> to vector<4x4096xbf16>
    %28 = vector.broadcast %7 : vector<1x4096xbf16> to vector<4x4096xbf16>
    %29 = arith.mulf %27, %28 : vector<4x4096xbf16>
    %c12 = arith.constant 12 : index
    %c0_11 = arith.constant 0 : index
    %30 = vector.load %arg7[%c12, %c0_11] : memref<36x4096xbf16, #tpu.memory_space<vmem>>, vector<4x4096xbf16>
    tpu.vector_store %arg7[%c12, %c0_11], %29 {strides = array<i32>} : memref<36x4096xbf16, #tpu.memory_space<vmem>>, vector<4x4096xbf16>,
    %c0_12 = arith.constant 0 : index
    %c0_13 = arith.constant 0 : index
    %c128 = arith.constant 128 : index
    %31 = vector.load %arg1[%c0_12, %c0_13, %c128] : memref<1x4x4352xbf16, #tpu.memory_space<vmem>>, vector<1x4x4096xbf16>
    %32 = vector.shape_cast %31 : vector<1x4x4096xbf16> to vector<4x4096xbf16>
    %c16 = arith.constant 16 : index
    %c0_14 = arith.constant 0 : index
    %33 = vector.load %arg7[%c16, %c0_14] : memref<36x4096xbf16, #tpu.memory_space<vmem>>, vector<4x4096xbf16>
    tpu.vector_store %arg7[%c16, %c0_14], %32 {strides = array<i32>} : memref<36x4096xbf16, #tpu.memory_space<vmem>>, vector<4x4096xbf16>,
    %c0_15 = arith.constant 0 : index
    %c0_16 = arith.constant 0 : index
    %c129 = arith.constant 129 : index
    %34 = vector.load %arg1[%c0_15, %c0_16, %c129] : memref<1x4x4352xbf16, #tpu.memory_space<vmem>>, vector<1x4x4096xbf16>
    %35 = vector.shape_cast %34 : vector<1x4x4096xbf16> to vector<4x4096xbf16>
    %36 = vector.broadcast %12 : vector<1x4096xbf16> to vector<4x4096xbf16>
    %37 = arith.mulf %35, %36 : vector<4x4096xbf16>
    %c20 = arith.constant 20 : index
    %c0_17 = arith.constant 0 : index
    %38 = vector.load %arg7[%c20, %c0_17] : memref<36x4096xbf16, #tpu.memory_space<vmem>>, vector<4x4096xbf16>
    tpu.vector_store %arg7[%c20, %c0_17], %37 {strides = array<i32>} : memref<36x4096xbf16, #tpu.memory_space<vmem>>, vector<4x4096xbf16>,
    %c0_18 = arith.constant 0 : index
    %c0_19 = arith.constant 0 : index
    %c191 = arith.constant 191 : index
    %39 = vector.load %arg1[%c0_18, %c0_19, %c191] : memref<1x4x4352xbf16, #tpu.memory_space<vmem>>, vector<1x4x4096xbf16>
    %40 = vector.shape_cast %39 : vector<1x4x4096xbf16> to vector<4x4096xbf16>
    %41 = vector.broadcast %7 : vector<1x4096xbf16> to vector<4x4096xbf16>
    %42 = arith.mulf %40, %41 : vector<4x4096xbf16>
    %c24 = arith.constant 24 : index
    %c0_20 = arith.constant 0 : index
    %43 = vector.load %arg7[%c24, %c0_20] : memref<36x4096xbf16, #tpu.memory_space<vmem>>, vector<4x4096xbf16>
    tpu.vector_store %arg7[%c24, %c0_20], %42 {strides = array<i32>} : memref<36x4096xbf16, #tpu.memory_space<vmem>>, vector<4x4096xbf16>,
    %c0_21 = arith.constant 0 : index
    %c0_22 = arith.constant 0 : index
    %c192 = arith.constant 192 : index
    %44 = vector.load %arg1[%c0_21, %c0_22, %c192] : memref<1x4x4352xbf16, #tpu.memory_space<vmem>>, vector<1x4x4096xbf16>
    %45 = vector.shape_cast %44 : vector<1x4x4096xbf16> to vector<4x4096xbf16>
    %c28 = arith.constant 28 : index
    %c0_23 = arith.constant 0 : index
    %46 = vector.load %arg7[%c28, %c0_23] : memref<36x4096xbf16, #tpu.memory_space<vmem>>, vector<4x4096xbf16>
    tpu.vector_store %arg7[%c28, %c0_23], %45 {strides = array<i32>} : memref<36x4096xbf16, #tpu.memory_space<vmem>>, vector<4x4096xbf16>,
    %c0_24 = arith.constant 0 : index
    %c0_25 = arith.constant 0 : index
    %c193 = arith.constant 193 : index
    %47 = vector.load %arg1[%c0_24, %c0_25, %c193] : memref<1x4x4352xbf16, #tpu.memory_space<vmem>>, vector<1x4x4096xbf16>
    %48 = vector.shape_cast %47 : vector<1x4x4096xbf16> to vector<4x4096xbf16>
    %49 = vector.broadcast %12 : vector<1x4096xbf16> to vector<4x4096xbf16>
    %50 = arith.mulf %48, %49 : vector<4x4096xbf16>
    %c32 = arith.constant 32 : index
    %c0_26 = arith.constant 0 : index
    %51 = vector.load %arg7[%c32, %c0_26] : memref<36x4096xbf16, #tpu.memory_space<vmem>>, vector<4x4096xbf16>
    tpu.vector_store %arg7[%c32, %c0_26], %50 {strides = array<i32>} : memref<36x4096xbf16, #tpu.memory_space<vmem>>, vector<4x4096xbf16>,
    %c0_27 = arith.constant 0 : index
    %c0_28 = arith.constant 0 : index
    %52 = vector.load %arg2[%c0_27, %c0_28] : memref<8x36xbf16, #tpu.memory_space<vmem>>, vector<8x36xbf16>
    %c0_29 = arith.constant 0 : index
    %c0_30 = arith.constant 0 : index
    %53 = vector.load %arg7[%c0_29, %c0_30] : memref<36x4096xbf16, #tpu.memory_space<vmem>>, vector<36x4096xbf16>
    %cst = arith.constant dense<0.000000e+00> : vector<8x4096xf32>
    %54 = tpu.matmul %52, %53, %cst {dimension_numbers = #tpu.dot_dimension_numbers<[1], [0], [0], [1], [0, 0, 1, 1], [], []>} : vector<8x36xbf16>, vector<36x4096xbf16>, vector<8x4096xf32> -> vector<8x4096xf32>
    %c0_31 = arith.constant 0 : index
    %c0_32 = arith.constant 0 : index
    %55 = vector.load %arg3[%c0_31, %c0_32] : memref<8x1xf32, #tpu.memory_space<vmem>>, vector<8x1xf32>
    %56 = vector.broadcast %55 : vector<8x1xf32> to vector<8x4096xf32>
    %57 = arith.addf %54, %56 : vector<8x4096xf32>
    %c0_33 = arith.constant 0 : index
    %c0_34 = arith.constant 0 : index
    %c0_35 = arith.constant 0 : index
    %58 = vector.load %arg6[%c0_33, %c0_34, %c0_35] : memref<1x8x4096xf32, #tpu.memory_space<vmem>>, vector<1x8x4096xf32>
    %59 = vector.shape_cast %58 : vector<1x8x4096xf32> to vector<8x4096xf32>
    %60 = vector.shape_cast %57 : vector<8x4096xf32> to vector<1x8x4096xf32>
    tpu.vector_store %arg6[%c0_33, %c0_34, %c0_35], %60 {strides = array<i32>} : memref<1x8x4096xf32, #tpu.memory_space<vmem>>, vector<1x8x4096xf32>,
    %c0_36 = arith.constant 0 : index
    %c0_37 = arith.constant 0 : index
    %c0_38 = arith.constant 0 : index
    %61 = vector.load %arg6[%c0_36, %c0_37, %c0_38] : memref<1x8x4096xf32, #tpu.memory_space<vmem>>, vector<1x8x4096xf32>
    %62 = vector.shape_cast %61 : vector<1x8x4096xf32> to vector<8x4096xf32>
    %63 = vector.shape_cast %62 : vector<8x4096xf32> to vector<1x8x4096xf32>
    %cst_39 = arith.constant dense<0.000000e+00> : vector<1xf32>
    %64 = vector.multi_reduction <add>, %63, %cst_39 [1, 2] : vector<1x8x4096xf32> to vector<1xf32>
    %65 = vector.shape_cast %64 : vector<1xf32> to vector<1x1x1xf32>
    %66 = vector.extract %65[0, 0, 0] : f32 from vector<1x1x1xf32>
    %cst_40 = arith.constant 3.05175781E-5 : f32
    %67 = arith.mulf %66, %cst_40 : f32
    %c0_41 = arith.constant 0 : index
    %c0_42 = arith.constant 0 : index
    %c0_43 = arith.constant 0 : index
    %68 = vector.load %arg6[%c0_41, %c0_42, %c0_43] : memref<1x8x4096xf32, #tpu.memory_space<vmem>>, vector<1x8x4096xf32>
    %69 = vector.shape_cast %68 : vector<1x8x4096xf32> to vector<8x4096xf32>
    %70 = vector.broadcast %67 : f32 to vector<8x4096xf32>
    %71 = arith.subf %69, %70 : vector<8x4096xf32>
    %72 = arith.mulf %71, %71 : vector<8x4096xf32>
    %73 = vector.shape_cast %72 : vector<8x4096xf32> to vector<1x8x4096xf32>
    %cst_44 = arith.constant dense<0.000000e+00> : vector<1xf32>
    %74 = vector.multi_reduction <add>, %73, %cst_44 [1, 2] : vector<1x8x4096xf32> to vector<1xf32>
    %75 = vector.shape_cast %74 : vector<1xf32> to vector<1x1x1xf32>
    %76 = vector.extract %75[0, 0, 0] : f32 from vector<1x1x1xf32>
    %cst_45 = arith.constant 3.05175781E-5 : f32
    %77 = arith.mulf %76, %cst_45 : f32
    %cst_46 = arith.constant 9.99999974E-6 : f32
    %78 = arith.addf %77, %cst_46 : f32
    %79 = math.rsqrt %78 : f32
    %c0_47 = arith.constant 0 : index
    %c0_48 = arith.constant 0 : index
    %c0_49 = arith.constant 0 : index
    %80 = vector.load %arg6[%c0_47, %c0_48, %c0_49] : memref<1x8x4096xf32, #tpu.memory_space<vmem>>, vector<1x8x4096xf32>
    %81 = vector.shape_cast %80 : vector<1x8x4096xf32> to vector<8x4096xf32>
    %82 = vector.broadcast %67 : f32 to vector<8x4096xf32>
    %83 = arith.subf %81, %82 : vector<8x4096xf32>
    %84 = vector.broadcast %79 : f32 to vector<8x4096xf32>
    %85 = arith.mulf %83, %84 : vector<8x4096xf32>
    %c0_50 = arith.constant 0 : index
    %c0_51 = arith.constant 0 : index
    %86 = vector.load %arg4[%c0_50, %c0_51] : memref<8x4096xbf16, #tpu.memory_space<vmem>>, vector<8x4096xbf16>
    %87 = arith.extf %86 : vector<8x4096xbf16> to vector<8x4096xf32>
    %88 = arith.mulf %85, %87 : vector<8x4096xf32>
    %c0_52 = arith.constant 0 : index
    %c0_53 = arith.constant 0 : index
    %89 = vector.load %arg5[%c0_52, %c0_53] : memref<8x4096xbf16, #tpu.memory_space<vmem>>, vector<8x4096xbf16>
    %90 = arith.extf %89 : vector<8x4096xbf16> to vector<8x4096xf32>
    %91 = arith.addf %88, %90 : vector<8x4096xf32>
    %cst_54 = arith.constant 0.000000e+00 : f32
    %92 = vector.broadcast %cst_54 : f32 to vector<8x4096xf32>
    %93 = arith.maximumf %91, %92 : vector<8x4096xf32>
    %c0_55 = arith.constant 0 : index
    %c0_56 = arith.constant 0 : index
    %c0_57 = arith.constant 0 : index
    %94 = vector.load %arg6[%c0_55, %c0_56, %c0_57] : memref<1x8x4096xf32, #tpu.memory_space<vmem>>, vector<1x8x4096xf32>
    %95 = vector.shape_cast %94 : vector<1x8x4096xf32> to vector<8x4096xf32>
    %96 = vector.shape_cast %93 : vector<8x4096xf32> to vector<1x8x4096xf32>
    tpu.vector_store %arg6[%c0_55, %c0_56, %c0_57], %96 {strides = array<i32>} : memref<1x8x4096xf32, #tpu.memory_space<vmem>>, vector<1x8x4096xf32>,
    return
  }
  func.func @transform_0(%arg0: i32) -> (i32, i32, i32) {
    %c0_i32 = arith.constant 0 : i32
    %c0_i32_0 = arith.constant 0 : i32
    %c0_i32_1 = arith.constant 0 : i32
    return %arg0, %c0_i32, %c0_i32_0 : i32, i32, i32
  }
  func.func @transform_1(%arg0: i32) -> (i32, i32) {
    %c0_i32 = arith.constant 0 : i32
    %c0_i32_0 = arith.constant 0 : i32
    %c0_i32_1 = arith.constant 0 : i32
    return %c0_i32, %c0_i32_0 : i32, i32
  }
  func.func @transform_2(%arg0: i32) -> (i32, i32) {
    %c0_i32 = arith.constant 0 : i32
    %c0_i32_0 = arith.constant 0 : i32
    %c0_i32_1 = arith.constant 0 : i32
    return %c0_i32, %c0_i32_0 : i32, i32
  }
  func.func @transform_3(%arg0: i32) -> (i32, i32) {
    %c0_i32 = arith.constant 0 : i32
    %c0_i32_0 = arith.constant 0 : i32
    %c0_i32_1 = arith.constant 0 : i32
    return %c0_i32, %c0_i32_0 : i32, i32
  }
  func.func @transform_4(%arg0: i32) -> (i32, i32) {
    %c0_i32 = arith.constant 0 : i32
    %c0_i32_0 = arith.constant 0 : i32
    %c0_i32_1 = arith.constant 0 : i32
    return %c0_i32, %c0_i32_0 : i32, i32
  }
  func.func @transform_5(%arg0: i32) -> (i32, i32, i32) {
    %c0_i32 = arith.constant 0 : i32
    %c0_i32_0 = arith.constant 0 : i32
    %c0_i32_1 = arith.constant 0 : i32
    return %arg0, %c0_i32, %c0_i32_0 : i32, i32, i32
  }
}

</mosaic_0001>

<bundles_post_ra>
// kernel: tpu_custom_call.1
= control target key start
LH: loop header
LB: loop body
LE: loop exit
PB: predicated region body
PF: predicated region fallthrough
CT: control target
= control target key end

     0   :  { %10 = vsyncpa [#allocation4], 0  ;;  %s9033_s0 = inlined_call_operand.hbm [shape: bf16[2,4,4352], index: 0, kind: input, shape index: {}]   ;;  %s9034_s1 = inlined_call_operand.vmem [shape: bf16[8,36], index: 1, kind: input, shape index: {}]   ;;  %s9035_s2 = inlined_call_operand.vmem [shape: f32[8,1], index: 2, kind: input, shape index: {}]   ;;  %s9036_s3 = inlined_call_operand.hbm [shape: bf16[8,4096], index: 3, kind: input, shape index: {}]   ;;  %s9037_s4 = inlined_call_operand.hbm [shape: bf16[8,4096], index: 4, kind: input, shape index: {}]   ;;  %s9038_s5 = inlined_call_operand.hbm [shape: f32[2,8,4096], index: 5, kind: output, shape index: {}]  }
   0x1   :  { %12 = vsyncpa [#allocation4 + $0x1], 0 }
   0x2   :  { %13 = vsyncpa [#allocation7], 0 }
   0x3   :  { %14 = vsyncpa [#allocation5], 0 }
   0x4   :  { %16 = vsyncpa [#allocation5 + $0x1], 0  ;;  %s6033_s18 = smov 0   ;;  %s6035_s19 = smov 0  }
   0x5   :  { %s6037_s20 = smov 0   ;;  %s6039_s21 = smov 0  }
   0x6 LB: > { %s6054_s22 = sadd.s32 4294967295, %s5989_s21   ;;  %s5441_s23 = sadd.s32 4294967294, %s5989_s21   ;;  %s5989_s21 = sphi %s6039_s21, %s9195_s21   ;;  %s5985_s20 = sphi %s6037_s20, %s9194_s20   ;;  %s5981_s19 = sphi %s6035_s19, %s9193_s19   ;;  %s5977_s18 = sphi %s6033_s18, %s9192_s18  }
   0x7   : > { %p42_p0 = scmp.ne.s32.totalorder %s5981_s19, %s5977_s18  ;;  %p9039_p1 = scmp.eq.s32.totalorder %s6054_s22, 0 }
   0x8   : > { %p156_p3 = scmp.eq.s32.totalorder %s5441_s23, 1  ;;  %p5442_p5 = scmp.ge.s32.totalorder %s5989_s21, 1 }
   0x9   : > { %p6063_p4 = por %p9039_p1, %p42_p0  ;;  %p163_p7 = scmp.lt.s32.totalorder %s5989_s21, 3 }
   0xa   : > { %p6068_p6 = por %p156_p3, %p42_p0  ;;  %s5991_s27 = smov [#allocation6]  }
   0xb   : > { %s9077_s24 = scalar_select %p6063_p4, 1, 0 }
   0xc   : > { %s9078_s25 = scalar_select %p6068_p6, 1, 0 }
   0xd   : > { %p6073_p8 = pnand %p5442_p5, %p163_p7  ;;  %s182_s28 = sshll.u32 %s5991_s27, 4  ;;  %s183_s28 = int_to_ptr.vmem [resolvable:$true] %s182_s28 }
   0xe   : > { %s5992_s29 = smov [#allocation8]   ;;  %s6089_s7 = sadd.s32 1, %s5989_s21  }
   0xf   : > { %s9079_s26 = scalar_select %p6073_p8, 1, 0 }
  0x10   : > { %p5718_p10 = pneg %p6073_p8  ;;  %s193_s30 = sshll.u32 %s5992_s29, 4  ;;  %s6086_s30 = int_to_ptr.vmem [resolvable:$true] %s193_s30 }
  0x11   : > { %s26_s8 = ssub.s32 %s5989_s21, %s6089_s7  ;;  %s5833_s11 = scalar_lea.hbm %s9036_s3, 2048 }
  0x12   : > { %p6082_p11 = pnand %p5718_p10, %p9039_p1  ;;  %p5834_p12 = scmp.ne.s32.totalorder %s9036_s3, %s5833_s11 }
  0x13   : > { %p5840_p5 = scmp.lt.u32.totalorder %s5833_s11, %s9036_s3 }
  0x14   : > { %p5835_p13 = pneg %p6082_p11 }
  0x16   : > { %p5836_p0 = pnand %p5835_p13, %p5834_p12 }
  0x18   : > { %p5837_p3 = pneg %p5836_p0 }
  0x1a   : > { %p5842_p7 = pnand %p5840_p5, %p5837_p3 }
  0x1c   : > { %5845 = shalt.err (!%p5842_p7)
}
  0x1d   : > { %s5846_s16 = scalar_lea.vmem %s183_s28, 2048  ;;  %p5854_p2 = scmp.lt.s32.totalorder %s183_s28, %s183_s28 }
  0x1e   : > { %p5847_p10 = scmp.ne.s32.totalorder %s183_s28, %s5846_s16  ;;  %p5855_p6 = scmp.lt.s32.totalorder %s5846_s16, %s5846_s16 }
  0x20   : > { %p5849_p9 = pnand %p5847_p10, %p5835_p13  ;;  %p5856_p4 = por %p5855_p6, %p5854_p2 }
  0x22   : > { %p5850_p1 = pneg %p5849_p9 }
  0x24   : > { %p5857_p8 = pnand %p5856_p4, %p5850_p1 }
  0x26   : > { %5860 = shalt.err (!%p5857_p8)
}
  0x27   : > { %5721 = dma.hbm_to_vmem [thread:$0]  (!%p6082_p11), %s9036_s3, 2048, %s183_s28, [#allocation7]  }
  0x28   : > { %s5861_s9 = scalar_lea.hbm %s9037_s4, 2048 }
  0x29   : > { %p5862_p9 = scmp.ne.s32.totalorder %s9037_s4, %s5861_s9  ;;  %p5868_p4 = scmp.lt.u32.totalorder %s5861_s9, %s9037_s4 }
  0x2b   : > { %p5864_p2 = pnand %p5862_p9, %p5835_p13 }
  0x2d   : > { %p5865_p1 = pneg %p5864_p2 }
  0x2f   : > { %p5870_p6 = pnand %p5868_p4, %p5865_p1 }
  0x31   : > { %5873 = shalt.err (!%p5870_p6)
}
  0x32   : > { %s5874_s28 = scalar_lea.vmem %s6086_s30, 2048  ;;  %p5882_p3 = scmp.lt.s32.totalorder %s6086_s30, %s6086_s30 }
  0x33   : > { %p5875_p8 = scmp.ne.s32.totalorder %s6086_s30, %s5874_s28  ;;  %p5883_p5 = scmp.lt.s32.totalorder %s5874_s28, %s5874_s28 }
  0x35   : > { %p5877_p12 = pnand %p5875_p8, %p5835_p13  ;;  %p5884_p7 = por %p5883_p5, %p5882_p3 }
  0x37   : > { %p5878_p0 = pneg %p5877_p12 }
  0x39   : > { %p5885_p10 = pnand %p5884_p7, %p5878_p0 }
  0x3b   : > { %5888 = shalt.err (!%p5885_p10)
}
  0x3c   : > { %5724 = dma.hbm_to_vmem [thread:$0]  (!%p6082_p11), %s9037_s4, 2048, %s6086_s30, [#allocation7]  }
  0x3d   : > { %p27_p13 = scmp.eq.s32.totalorder %s26_s8, 0  ;;  %s29_s16 = sadd.s32 1, %s5985_s20 }
  0x3e   : > { %p36_p9 = scmp.ne.s32.totalorder %s5985_s20, %s5981_s19  ;;  %p37_p2 = scmp.eq.s32.totalorder %s5989_s21, 0 }
  0x3f   : > { %s6148_s6 = scalar_select %p27_p13, %s5985_s20, %s29_s16  }
  0x40   : > { %p38_p1 = por %p37_p2, %p36_p9  ;;  %p9081_p4 = scmp.eq.s32.totalorder %s6054_s22, 1 }
  0x41   : > { %p5735_p8 = scmp.lt.s32.totalorder %s5989_s21, 2  ;;  %s204_s23 = sand.u32 1, %s5985_s20  }
  0x42   : > { %p6152_p6 = por %p9081_p4, %p36_p9  ;;  %s5697_s27 = smul.u32 68, %s204_s23 }
  0x43   : > { %s5698_s29 = smul.u32 1088, %s5989_s21  ;;  %p6159_p12 = pnand %p5735_p8, %p38_p1 }
  0x44   : > { %s208_s11 = scalar_lea.vmem [#allocation3], %s5697_s27  ;;  %s205_s13 = scalar_lea.sflag [#allocation4], %s204_s23 }
  0x45   : > { %s6166_s10 = scalar_lea.hbm %s9033_s0, %s5698_s29  ;;  %s216_s12 = sshll.u32 %s208_s11, 4  ;;  %s6168_s12 = int_to_ptr.vmem [resolvable:$true] %s216_s12 }
  0x46   : > { %s5889_s28 = scalar_lea.hbm %s6166_s10, 1088  ;;  %p5891_p0 = pneg %p6159_p12 }
  0x47   : > { %p5890_p11 = scmp.ne.s32.totalorder %s6166_s10, %s5889_s28  ;;  %s5894_s16 = scalar_lea.hbm %s9033_s0, 2176 }
  0x48   : > { %p5895_p7 = scmp.lt.u32.totalorder %s6166_s10, %s9033_s0  ;;  %p5896_p10 = scmp.lt.u32.totalorder %s5894_s16, %s5889_s28 }
  0x49   : > { %p5892_p3 = pnand %p5891_p0, %p5890_p11  ;;  %p5898_p9 = scmp.lt.u32.totalorder %s5889_s28, %s6166_s10 }
  0x4a   : > { %p5897_p13 = por %p5896_p10, %p5895_p7 }
  0x4b   : > { %p5893_p5 = pneg %p5892_p3 }
  0x4c   : > { %p5899_p2 = por %p5898_p9, %p5897_p13 }
  0x4e   : > { %p5900_p1 = pnand %p5899_p2, %p5893_p5 }
  0x50   : > { %5903 = shalt.err (!%p5900_p1)
}
  0x51   : > { %s5904_s23 = scalar_lea.vmem %s6168_s12, 1088  ;;  %s5993_s27 = smov [#allocation3]  }
  0x52   : > { %p5905_p4 = scmp.ne.s32.totalorder %s6168_s12, %s5904_s23  ;;  %s5909_s8 = sshll.u32 %s5993_s27, 4  ;;  %s5910_s8 = int_to_ptr.vmem [resolvable:$false] %s5909_s8 }
  0x53   : > { %s5911_s11 = scalar_lea.vmem %s5910_s8, 2176  ;;  %p5912_p3 = scmp.lt.s32.totalorder %s6168_s12, %s5910_s8 }
  0x54   : > { %p5907_p8 = pnand %p5905_p4, %p5891_p0  ;;  %p5913_p7 = scmp.lt.s32.totalorder %s5911_s11, %s5904_s23 }
  0x56   : > { %p5908_p11 = pneg %p5907_p8  ;;  %p5914_p10 = por %p5913_p7, %p5912_p3 }
  0x58   : > { %p5915_p13 = pnand %p5914_p10, %p5908_p11 }
  0x5a   : > { %5918 = shalt.err (!%p5915_p13)
}
  0x5b   : > { %5728 = dma.hbm_to_vmem [thread:$0]  (!%p6159_p12), %s6166_s10, 1088, %s6168_s12, %s205_s13  }
  0x5c   : > { %p9084_p5 = scmp.ne.s32.totalorder %s9079_s26, 0 }
  0x5e   : > { %225 = sbr.rel (%p9084_p5) target bundleno = 1474 (0x5c2), region = 40 }
  0x65   : > { %s6198_s28 = sand.u32 1, %s5981_s19   ;;  %p9085_p0 = scmp.ne.s32.totalorder %s9077_s24, 0 }
  0x66   : > { %s5699_s14 = smul.u32 68, %s6198_s28  ;;  %s228_s15 = scalar_lea.sflag [#allocation4], %s6198_s28 }
  0x68   : > { %s6202_s16 = scalar_lea.vmem [#allocation3], %s5699_s14 }
  0x69   : > { %5964 = dma.done.wait (%p9085_p0), %s228_s15, 1088  }
  0x6a   : > { %5966 = vsyncadd (%p9085_p0), %s228_s15, 4294966208  ;;  %p9086_p12 = scmp.eq.s32.totalorder %s6054_s22, 0 }
  0x6c   : > { %5968 = dma.done.wait (%p9086_p12), [#allocation7], 4096   ;;  %p9087_p9 = pmov %p9086_p12 }
  0x6d   : > { %v267_v0 = vlaneseq  ;;  %v5994_v1 = vmov 1983009808   ;;  %v5995_v17 = vmov 0.0   ;;  %s5996_s24 = smov 127   ;;  %s5997_s26 = smov 63  }
  0x6e   : > { %5970 = vsyncadd (%p9087_p9), [#allocation7], 4294963200  ;;  %v824_v2 = vunpack.c.l.s4 %v5994_v1  ;;  %s5998_s9 = smov 65   ;;  %s5999_s10 = smov 1  }
  0x6f   : > { %v6212_v3 = vand.u32 127, %v267_v0  ;;  %v827_v4 = vshrl.u32 %v267_v0, 7  ;;  %s6000_s12 = smov 64   ;;  %s5338_s23 = scalar_lea.sflag [#allocation5], %s6198_s28 }
  0x70   : > { %v825_v5 = vunpack.c.0.s8 %v824_v2  ;;  %s6002_s8 = smov [#allocation9]  }
  0x71   : > { %v269_v6 = vadd.s32 128, %v6212_v3  ;;  %v270_v7 = vadd.s32 256, %v6212_v3  ;;  %v271_v8 = vadd.s32 384, %v6212_v3  ;;  %v304_v9 = vand.u32 63, %v6212_v3 }
  0x72   : > { %v6218_v10 = vsub.s32 %v825_v5, %v827_v4  ;;  %v272_v11 = vadd.s32 512, %v6212_v3  ;;  %v273_v12 = vadd.s32 640, %v6212_v3  ;;  %v274_v13 = vadd.s32 768, %v6212_v3 }
  0x73   : > { %v311_v14 = vand.u32 63, %v269_v6  ;;  %v318_v15 = vand.u32 63, %v270_v7  ;;  %v325_v16 = vand.u32 63, %v271_v8  ;;  %vm524_vm0 = vcmp.ge.s32.totalorder %v304_v9, 1 }
  0x74   : > { %v5451_v18 = vsel %vm524_vm0, 1.0, %v5995_v17  ;;  %v275_v19 = vadd.s32 896, %v6212_v3  ;;  %v332_v20 = vand.u32 63, %v272_v11  ;;  %v339_v21 = vand.u32 63, %v273_v12 }
  0x75   : > { %vm525_vm1 = vcmp.ge.s32.totalorder %v311_v14, 1  ;;  %vm526_vm2 = vcmp.ge.s32.totalorder %v318_v15, 1  ;;  %vm527_vm3 = vcmp.ge.s32.totalorder %v325_v16, 1  ;;  %v346_v22 = vand.u32 63, %v274_v13 }
  0x76   : > { %v5452_v23 = vsel %vm525_vm1, 1.0, %v5995_v17  ;;  %v5453_v24 = vsel %vm526_vm2, 1.0, %v5995_v17  ;;  %v5454_v25 = vsel %vm527_vm3, 1.0, %v5995_v17  ;;  %v353_v26 = vand.u32 63, %v275_v19 }
  0x77   : > { %v5515_v27 = vpack.c.bf16 %v5452_v23, %v5451_v18  ;;  %v5516_v28 = vpack.c.bf16 %v5454_v25, %v5453_v24  ;;  %vm528_vm4 = vcmp.ge.s32.totalorder %v332_v20, 1  ;;  %vm529_vm5 = vcmp.ge.s32.totalorder %v339_v21, 1 }
  0x78   : > { %vm530_vm6 = vcmp.ge.s32.totalorder %v346_v22, 1  ;;  %vm531_vm7 = vcmp.ge.s32.totalorder %v353_v26, 1  ;;  %v5455_v29 = vsel %vm528_vm4, 1.0, %v5995_v17  ;;  %v5456_v30 = vsel %vm529_vm5, 1.0, %v5995_v17 }
  0x79   : > { %v829_v31 = vrot.slane %v5515_v27, %v6218_v10  ;;  %v836_v32 = vrot.slane %v5516_v28, %v6218_v10  ;;  %v5457_v33 = vsel %vm530_vm6, 1.0, %v5995_v17  ;;  %v5458_v34 = vsel %vm531_vm7, 1.0, %v5995_v17 }
  0x7a   : > { %v5517_v35 = vpack.c.bf16 %v5456_v30, %v5455_v29  ;;  %v5518_v36 = vpack.c.bf16 %v5458_v34, %v5457_v33  ;;  %vm652_vm8 = vcmp.le.s32.totalorder %v304_v9, 62  ;;  %vm653_vm9 = vcmp.le.s32.totalorder %v311_v14, 62 }
  0x7b   : > { %v837_v37 = vcombine.low %v829_v31, %v836_v32  ;;  %vm654_vm10 = vcmp.le.s32.totalorder %v318_v15, 62  ;;  %vm655_vm11 = vcmp.le.s32.totalorder %v325_v16, 62  ;;  %v5483_v38 = vsel %vm652_vm8, 1.0, %v5995_v17 }
  0x7c   : > { %v846_v39 = vrot.slane %v5517_v35, %v6218_v10  ;;  %v853_v40 = vrot.slane %v5518_v36, %v6218_v10  ;;  %v5484_v41 = vsel %vm653_vm9, 1.0, %v5995_v17  ;;  %v5485_v42 = vsel %vm654_vm10, 1.0, %v5995_v17 }
  0x7d   : > { %2025 = vrot.lane.b32.xlu1 %v837_v37, %s5996_s24  ;;  %957 = vrot.lane.b32.xlu0 %v837_v37, %s5997_s26  ;;  %v5486_v43 = vsel %vm655_vm11, 1.0, %v5995_v17  ;;  %v5531_v44 = vpack.c.bf16 %v5484_v41, %v5483_v38  ;;  %vm656_vm12 = vcmp.le.s32.totalorder %v332_v20, 62  ;;  %vm657_vm13 = vcmp.le.s32.totalorder %v339_v21, 62 }
  0x7e   : > { %v854_v45 = vcombine.low %v846_v39, %v853_v40  ;;  %v5532_v46 = vpack.c.bf16 %v5486_v43, %v5485_v42  ;;  %vm658_vm14 = vcmp.le.s32.totalorder %v346_v22, 62  ;;  %vm659_vm15 = vcmp.le.s32.totalorder %v353_v26, 62 }
  0x7f   : > { %v1580_v47 = vrot.slane %v5531_v44, %v6218_v10  ;;  %v5487_v48 = vsel %vm656_vm12, 1.0, %v5995_v17  ;;  %v5488_v49 = vsel %vm657_vm13, 1.0, %v5995_v17  ;;  %v5489_v50 = vsel %vm658_vm14, 1.0, %v5995_v17 }
  0x80   : > { %v1587_v51 = vrot.slane %v5532_v46, %v6218_v10  ;;  %v5490_v52 = vsel %vm659_vm15, 1.0, %v5995_v17  ;;  %v5533_v53 = vpack.c.bf16 %v5488_v49, %v5487_v48  ;;  %v276_v54 = vadd.s32 1024, %v6212_v3 }
  0x81   : > { %2027 = vrot.lane.b32.xlu1 %v854_v45, %s5996_s24  ;;  %v5534_v55 = vpack.c.bf16 %v5490_v52, %v5489_v50  ;;  %v277_v56 = vadd.s32 1152, %v6212_v3  ;;  %v278_v57 = vadd.s32 1280, %v6212_v3  ;;  %v279_v58 = vadd.s32 1408, %v6212_v3 }
  0x82   : > { %v1588_v59 = vcombine.low %v1580_v47, %v1587_v51  ;;  %v1597_v60 = vrot.slane %v5533_v53, %v6218_v10  ;;  %v360_v61 = vand.u32 63, %v276_v54  ;;  %v280_v62 = vadd.s32 1536, %v6212_v3 }
  0x83   : > { %v1604_v63 = vrot.slane %v5534_v55, %v6218_v10  ;;  %v367_v0 = vand.u32 63, %v277_v56  ;;  %v374_v1 = vand.u32 63, %v278_v57  ;;  %v381_v2 = vand.u32 63, %v279_v58 }
  0x84   : > { %1708 = vrot.lane.b32.xlu0 %v1588_v59, %s5998_s9  ;;  %vm532_vm0 = vcmp.ge.s32.totalorder %v360_v61, 1  ;;  %vm6257_vm1 = vcmp.le.s32.totalorder %v360_v61, 62  ;;  %v281_v5 = vadd.s32 1664, %v6212_v3  ;;  %v282_v6 = vadd.s32 1792, %v6212_v3 }
  0x85   : > { %959 = vrot.lane.b32.xlu1 %v854_v45, %s5997_s26  ;;  %v1605_v7 = vcombine.low %v1597_v60, %v1604_v63  ;;  %vm533_vm2 = vcmp.ge.s32.totalorder %v367_v0, 1  ;;  %vm534_vm3 = vcmp.ge.s32.totalorder %v374_v1, 1  ;;  %vm535_vm4 = vcmp.ge.s32.totalorder %v381_v2, 1 }
  0x86   : > { %v5459_v8 = vsel %vm532_vm0, 1.0, %v5995_v17  ;;  %v5460_v9 = vsel %vm533_vm2, 1.0, %v5995_v17  ;;  %v5461_v11 = vsel %vm534_vm3, 1.0, %v5995_v17  ;;  %v5462_v12 = vsel %vm535_vm4, 1.0, %v5995_v17 }
  0x87   : > { %v5519_v13 = vpack.c.bf16 %v5460_v9, %v5459_v8  ;;  %v5520_v14 = vpack.c.bf16 %v5462_v12, %v5461_v11  ;;  %vm661_vm5 = vcmp.le.s32.totalorder %v367_v0, 62  ;;  %vm662_vm6 = vcmp.le.s32.totalorder %v374_v1, 62 }
  0x88   : > { %2513 = vrot.lane.b32.xlu0 %v1588_v59, %s5999_s10  ;;  %vm663_vm7 = vcmp.le.s32.totalorder %v381_v2, 62  ;;  %v5491_v15 = vsel %vm6257_vm1, 1.0, %v5995_v17  ;;  %v5492_v16 = vsel %vm661_vm5, 1.0, %v5995_v17  ;;  %v5493_v18 = vsel %vm662_vm6, 1.0, %v5995_v17 }
  0x89   : > { %2515 = vrot.lane.b32.xlu1 %v1605_v7, %s5999_s10  ;;  %v863_v19 = vrot.slane %v5519_v13, %v6218_v10  ;;  %v870_v20 = vrot.slane %v5520_v14, %v6218_v10  ;;  %v5494_v21 = vsel %vm663_vm7, 1.0, %v5995_v17  ;;  %v5535_v22 = vpack.c.bf16 %v5492_v16, %v5491_v15 }
  0x8a   : > { %v5536_v23 = vpack.c.bf16 %v5494_v21, %v5493_v18  ;;  %v283_v24 = vadd.s32 1920, %v6212_v3  ;;  %v388_v25 = vand.u32 63, %v280_v62  ;;  %v395_v26 = vand.u32 63, %v281_v5 }
  0x8b   : > { %v871_v27 = vcombine.low %v863_v19, %v870_v20  ;;  %v1614_v28 = vrot.slane %v5535_v22, %v6218_v10  ;;  %v402_v29 = vand.u32 63, %v282_v6  ;;  %v284_v30 = vadd.s32 2048, %v6212_v3 }
  0x8c   : > { %1710 = vrot.lane.b32.xlu0 %v1605_v7, %s5998_s9  ;;  %v1621_v31 = vrot.slane %v5536_v23, %v6218_v10  ;;  %v409_v32 = vand.u32 63, %v283_v24  ;;  %vm536_vm8 = vcmp.ge.s32.totalorder %v388_v25, 1  ;;  %vm537_vm9 = vcmp.ge.s32.totalorder %v395_v26, 1 }
  0x8d   : > { %961 = vrot.lane.b32.xlu1 %v871_v27, %s5997_s26  ;;  %vm538_vm10 = vcmp.ge.s32.totalorder %v402_v29, 1  ;;  %v5463_v33 = vsel %vm536_vm8, 1.0, %v5995_v17  ;;  %v5464_v34 = vsel %vm537_vm9, 1.0, %v5995_v17  ;;  %vm664_vm11 = vcmp.le.s32.totalorder %v388_v25, 62 }
  0x8e   : > { %v1622_v35 = vcombine.low %v1614_v28, %v1621_v31  ;;  %vm539_vm12 = vcmp.ge.s32.totalorder %v409_v32, 1  ;;  %v5465_v36 = vsel %vm538_vm10, 1.0, %v5995_v17  ;;  %v5521_v37 = vpack.c.bf16 %v5464_v34, %v5463_v33 }
  0x8f   : > { %v5466_v38 = vsel %vm539_vm12, 1.0, %v5995_v17  ;;  %vm665_vm13 = vcmp.le.s32.totalorder %v395_v26, 62  ;;  %vm666_vm14 = vcmp.le.s32.totalorder %v402_v29, 62  ;;  %vm667_vm15 = vcmp.le.s32.totalorder %v409_v32, 62 }
  0x90   : > { %2029 = vrot.lane.b32.xlu0 %v871_v27, %s5996_s24  ;;  %v5522_v39 = vpack.c.bf16 %v5466_v38, %v5465_v36  ;;  %v880_v40 = vrot.slane %v5521_v37, %v6218_v10  ;;  %v5495_v41 = vsel %vm664_vm11, 1.0, %v5995_v17  ;;  %v5496_v42 = vsel %vm665_vm13, 1.0, %v5995_v17 }
  0x91   : > { %2517 = vrot.lane.b32.xlu1 %v1622_v35, %s5999_s10  ;;  %v5497_v43 = vsel %vm666_vm14, 1.0, %v5995_v17  ;;  %v5498_v44 = vsel %vm667_vm15, 1.0, %v5995_v17  ;;  %v5537_v45 = vpack.c.bf16 %v5496_v42, %v5495_v41  ;;  %v285_v46 = vadd.s32 2176, %v6212_v3  ;;  %v6340_v42 = vld [vmem:[%s6202_s16] sm:$0xff] }
  0x92   : > { %v887_v47 = vrot.slane %v5522_v39, %v6218_v10  ;;  %v5538_v48 = vpack.c.bf16 %v5498_v44, %v5497_v43  ;;  %v286_v49 = vadd.s32 2304, %v6212_v3  ;;  %v287_v50 = vadd.s32 2432, %v6212_v3 }
  0x93   : > { %v1631_v51 = vrot.slane %v5537_v45, %v6218_v10  ;;  %v416_v52 = vand.u32 63, %v284_v30  ;;  %v423_v53 = vand.u32 63, %v285_v46  ;;  %v288_v54 = vadd.s32 2560, %v6212_v3 }
  0x94   : > { %1712 = vrot.lane.b32.xlu0 %v1622_v35, %s5998_s9  ;;  %v888_v55 = vcombine.low %v880_v40, %v887_v47  ;;  %v1638_v56 = vrot.slane %v5538_v48, %v6218_v10  ;;  %v430_v57 = vand.u32 63, %v286_v49  ;;  %v437_v58 = vand.u32 63, %v287_v50 }
  0x95   : > { %vm540_vm0 = vcmp.ge.s32.totalorder %v416_v52, 1  ;;  %vm541_vm1 = vcmp.ge.s32.totalorder %v423_v53, 1  ;;  %vm668_vm2 = vcmp.le.s32.totalorder %v416_v52, 62  ;;  %vm669_vm3 = vcmp.le.s32.totalorder %v423_v53, 62 }
  0x96   : > { %963 = vrot.lane.b32.xlu1 %v888_v55, %s5997_s26  ;;  %v1639_v59 = vcombine.low %v1631_v51, %v1638_v56  ;;  %vm542_vm4 = vcmp.ge.s32.totalorder %v430_v57, 1  ;;  %vm543_vm5 = vcmp.ge.s32.totalorder %v437_v58, 1  ;;  %v5467_v60 = vsel %vm540_vm0, 1.0, %v5995_v17 }
  0x97   : > { %v5468_v61 = vsel %vm541_vm1, 1.0, %v5995_v17  ;;  %v5469_v62 = vsel %vm542_vm4, 1.0, %v5995_v17  ;;  %v5470_v63 = vsel %vm543_vm5, 1.0, %v5995_v17  ;;  %vm670_vm6 = vcmp.le.s32.totalorder %v430_v57, 62 }
  0x98   : > { %2031 = vrot.lane.b32.xlu0 %v888_v55, %s5996_s24  ;;  %v5523_v0 = vpack.c.bf16 %v5468_v61, %v5467_v60  ;;  %v5524_v1 = vpack.c.bf16 %v5470_v63, %v5469_v62  ;;  %vm671_vm7 = vcmp.le.s32.totalorder %v437_v58, 62  ;;  %v5499_v2 = vsel %vm668_vm2, 1.0, %v5995_v17 }
  0x99   : > { %v5500_v4 = vsel %vm669_vm3, 1.0, %v5995_v17  ;;  %v5501_v5 = vsel %vm670_vm6, 1.0, %v5995_v17  ;;  %v5502_v6 = vsel %vm671_vm7, 1.0, %v5995_v17  ;;  %v289_v7 = vadd.s32 2688, %v6212_v3 }
  0x9a   : > { %2519 = vrot.lane.b32.xlu1 %v1639_v59, %s5999_s10  ;;  %v897_v8 = vrot.slane %v5523_v0, %v6218_v10  ;;  %v904_v9 = vrot.slane %v5524_v1, %v6218_v10  ;;  %v5539_v11 = vpack.c.bf16 %v5500_v4, %v5499_v2  ;;  %v5540_v12 = vpack.c.bf16 %v5502_v6, %v5501_v5 }
  0x9b   : > { %v290_v13 = vadd.s32 2816, %v6212_v3  ;;  %v291_v14 = vadd.s32 2944, %v6212_v3  ;;  %v444_v15 = vand.u32 63, %v288_v54  ;;  %v451_v16 = vand.u32 63, %v289_v7 }
  0x9c   : > { %1714 = vrot.lane.b32.xlu0 %v1639_v59, %s5998_s9  ;;  %v905_v18 = vcombine.low %v897_v8, %v904_v9  ;;  %v1648_v19 = vrot.slane %v5539_v11, %v6218_v10  ;;  %v1655_v20 = vrot.slane %v5540_v12, %v6218_v10  ;;  %v292_v21 = vadd.s32 3072, %v6212_v3  ;;  %v6369_v11 = vld [vmem:[%s6202_s16 + $0x8] sm:$0xff] }
  0x9d   : > { %v458_v22 = vand.u32 63, %v290_v13  ;;  %v465_v23 = vand.u32 63, %v291_v14  ;;  %vm544_vm8 = vcmp.ge.s32.totalorder %v444_v15, 1  ;;  %vm545_vm9 = vcmp.ge.s32.totalorder %v451_v16, 1 }
  0x9e   : > { %965 = vrot.lane.b32.xlu1 %v905_v18, %s5997_s26  ;;  %v1656_v24 = vcombine.low %v1648_v19, %v1655_v20  ;;  %v5471_v25 = vsel %vm544_vm8, 1.0, %v5995_v17  ;;  %v5472_v26 = vsel %vm545_vm9, 1.0, %v5995_v17  ;;  %vm672_vm10 = vcmp.le.s32.totalorder %v444_v15, 62  ;;  %v6374_v15 = vld [vmem:[%s6202_s16 + $0x2] sm:$0xff] }
  0x9f   : > { %vm546_vm11 = vcmp.ge.s32.totalorder %v458_v22, 1  ;;  %vm547_vm12 = vcmp.ge.s32.totalorder %v465_v23, 1  ;;  %v5525_v27 = vpack.c.bf16 %v5472_v26, %v5471_v25  ;;  %vm673_vm13 = vcmp.le.s32.totalorder %v451_v16, 62 }
  0xa0   : > { %2033 = vrot.lane.b32.xlu0 %v905_v18, %s5996_s24  ;;  %v5473_v28 = vsel %vm546_vm11, 1.0, %v5995_v17  ;;  %v5474_v29 = vsel %vm547_vm12, 1.0, %v5995_v17  ;;  %vm674_vm14 = vcmp.le.s32.totalorder %v458_v22, 62  ;;  %vm675_vm15 = vcmp.le.s32.totalorder %v465_v23, 62 }
  0xa1   : > { %v5526_v30 = vpack.c.bf16 %v5474_v29, %v5473_v28  ;;  %v914_v31 = vrot.slane %v5525_v27, %v6218_v10  ;;  %v5503_v32 = vsel %vm672_vm10, 1.0, %v5995_v17  ;;  %v5504_v33 = vsel %vm673_vm13, 1.0, %v5995_v17 }
  0xa2   : > { %2521 = vrot.lane.b32.xlu1 %v1656_v24, %s5999_s10  ;;  %v5505_v34 = vsel %vm674_vm14, 1.0, %v5995_v17  ;;  %v5506_v35 = vsel %vm675_vm15, 1.0, %v5995_v17  ;;  %v5541_v36 = vpack.c.bf16 %v5504_v33, %v5503_v32  ;;  %v293_v37 = vadd.s32 3200, %v6212_v3 }
  0xa3   : > { %v921_v38 = vrot.slane %v5526_v30, %v6218_v10  ;;  %v5542_v39 = vpack.c.bf16 %v5506_v35, %v5505_v34  ;;  %v294_v40 = vadd.s32 3328, %v6212_v3  ;;  %v295_v41 = vadd.s32 3456, %v6212_v3  ;;  %v6397_v34 = vld [vmem:[%s6202_s16 + $0xa] sm:$0xff] }
  0xa4   : > { %1716 = vrot.lane.b32.xlu0 %v1656_v24, %s5998_s9  ;;  %v1665_v43 = vrot.slane %v5541_v36, %v6218_v10  ;;  %v472_v44 = vand.u32 63, %v292_v21  ;;  %v479_v45 = vand.u32 63, %v293_v37  ;;  %v1287_v50 = vcombine.low %v6340_v42, %v6340_v42 }
  0xa5   : > { %v922_v46 = vcombine.low %v914_v31, %v921_v38  ;;  %v1672_v47 = vrot.slane %v5542_v39, %v6218_v10  ;;  %v486_v48 = vand.u32 63, %v294_v40  ;;  %v493_v49 = vand.u32 63, %v295_v41 }
  0xa6   : > { %vm548_vm0 = vcmp.ge.s32.totalorder %v472_v44, 1  ;;  %vm549_vm1 = vcmp.ge.s32.totalorder %v479_v45, 1  ;;  %vm676_vm2 = vcmp.le.s32.totalorder %v472_v44, 62  ;;  %vm677_vm5 = vcmp.le.s32.totalorder %v479_v45, 62 }
  0xa7   : > { %967 = vrot.lane.b32.xlu1 %v922_v46, %s5997_s26  ;;  %v1673_v51 = vcombine.low %v1665_v43, %v1672_v47  ;;  %vm550_vm3 = vcmp.ge.s32.totalorder %v486_v48, 1  ;;  %vm551_vm4 = vcmp.ge.s32.totalorder %v493_v49, 1  ;;  %v5475_v52 = vsel %vm548_vm0, 1.0, %v5995_v17 }
  0xa8   : > { %2035 = vrot.lane.b32.xlu0 %v922_v46, %s5996_s24  ;;  %v5476_v53 = vsel %vm549_vm1, 1.0, %v5995_v17  ;;  %v5477_v54 = vsel %vm550_vm3, 1.0, %v5995_v17  ;;  %v5478_v55 = vsel %vm551_vm4, 1.0, %v5995_v17  ;;  %vm678_vm6 = vcmp.le.s32.totalorder %v486_v48, 62  ;;  %v6415_v46 = vld [vmem:[%s6202_s16 + $0x10] sm:$0xff] }
  0xa9   : > { %v5527_v56 = vpack.c.bf16 %v5476_v53, %v5475_v52  ;;  %v5528_v57 = vpack.c.bf16 %v5478_v55, %v5477_v54  ;;  %vm679_vm7 = vcmp.le.s32.totalorder %v493_v49, 62  ;;  %v5507_v58 = vsel %vm676_vm2, 1.0, %v5995_v17 }
  0xaa   : > { %v5508_v59 = vsel %vm677_vm5, 1.0, %v5995_v17  ;;  %v5509_v60 = vsel %vm678_vm6, 1.0, %v5995_v17  ;;  %v5510_v61 = vsel %vm679_vm7, 1.0, %v5995_v17  ;;  %v296_v6 = vadd.s32 3584, %v6212_v3 }
  0xab   : > { %2523 = vrot.lane.b32.xlu1 %v1673_v51, %s5999_s10  ;;  %v931_v62 = vrot.slane %v5527_v56, %v6218_v10  ;;  %v938_v63 = vrot.slane %v5528_v57, %v6218_v10  ;;  %v5543_v0 = vpack.c.bf16 %v5508_v59, %v5507_v58  ;;  %v5544_v1 = vpack.c.bf16 %v5510_v61, %v5509_v60 }
  0xac   : > { %1718 = vrot.lane.b32.xlu0 %v1673_v51, %s5998_s9  ;;  %v297_v7 = vadd.s32 3712, %v6212_v3  ;;  %v298_v8 = vadd.s32 3840, %v6212_v3  ;;  %v1294_v9 = vrot.slane %v1287_v50, %v6218_v10  ;;  %v299_v12 = vadd.s32 3968, %v6212_v3  ;;  %v6426_v50 = vld [vmem:[%s6202_s16 + $0x12] sm:$0xff] }
  0xad   : > { %v939_v2 = vcombine.low %v931_v62, %v938_v63  ;;  %v1682_v4 = vrot.slane %v5543_v0, %v6218_v10  ;;  %v1689_v5 = vrot.slane %v5544_v1, %v6218_v10  ;;  %v500_v13 = vand.u32 63, %v296_v6 }
  0xae   : > { %v507_v16 = vand.u32 63, %v297_v7  ;;  %v514_v18 = vand.u32 63, %v298_v8  ;;  %v1301_v19 = vrot.slane %v6340_v42, %v6218_v10  ;;  %v521_v20 = vand.u32 63, %v299_v12 }
  0xaf   : > { %969 = vrot.lane.b32.xlu1 %v939_v2, %s5997_s26  ;;  %v1690_v14 = vcombine.low %v1682_v4, %v1689_v5  ;;  %vm552_vm8 = vcmp.ge.s32.totalorder %v500_v13, 1  ;;  %v1302_v21 = vcombine.low %v6369_v11, %v6369_v11  ;;  %v3109_v22 = vcombine.low %v6374_v15, %v6374_v15 }
  0xb0   : > { %2037 = vrot.lane.b32.xlu0 %v939_v2, %s5996_s24  ;;  %vm553_vm9 = vcmp.ge.s32.totalorder %v507_v16, 1  ;;  %vm554_vm10 = vcmp.ge.s32.totalorder %v514_v18, 1  ;;  %v5479_v3 = vsel %vm552_vm8, 1.0, %v5995_v17  ;;  %vm555_vm11 = vcmp.ge.s32.totalorder %v521_v20, 1 }
  0xb1   : > { %v5480_v23 = vsel %vm553_vm9, 1.0, %v5995_v17  ;;  %v5481_v24 = vsel %vm554_vm10, 1.0, %v5995_v17  ;;  %v5482_v25 = vsel %vm555_vm11, 1.0, %v5995_v17  ;;  %vm680_vm12 = vcmp.le.s32.totalorder %v500_v13, 62 }
  0xb2   : > { %v5529_v26 = vpack.c.bf16 %v5480_v23, %v5479_v3  ;;  %vm681_vm13 = vcmp.le.s32.totalorder %v507_v16, 62  ;;  %v5530_v27 = vpack.c.bf16 %v5482_v25, %v5481_v24  ;;  %vm682_vm14 = vcmp.le.s32.totalorder %v514_v18, 62 }
  0xb3   : > { %1415 = vrot.lane.b32.xlu1 %v1294_v9, %s6000_s12  ;;  %vm683_vm15 = vcmp.le.s32.totalorder %v521_v20, 62  ;;  %v1309_v28 = vrot.slane %v1302_v21, %v6218_v10  ;;  %v3116_v29 = vrot.slane %v3109_v22, %v6218_v10  ;;  %v5511_v30 = vsel %vm680_vm12, 1.0, %v5995_v17 }
  0xb4   : > { %1720 = vrot.lane.b32.xlu0 %v1690_v14, %s5998_s9  ;;  %v5512_v31 = vsel %vm681_vm13, 1.0, %v5995_v17  ;;  %v948_v32 = vrot.slane %v5529_v26, %v6218_v10  ;;  %v955_v33 = vrot.slane %v5530_v27, %v6218_v10  ;;  %v5513_v35 = vsel %vm682_vm14, 1.0, %v5995_v17 }
  0xb5   : > { %v5514_v36 = vsel %vm683_vm15, 1.0, %v5995_v17  ;;  %v3123_v37 = vrot.slane %v6374_v15, %v6218_v10  ;;  %v3124_v38 = vcombine.low %v6397_v34, %v6397_v34  ;;  %v5545_v39 = vpack.c.bf16 %v5512_v31, %v5511_v30 }
  0xb6   : > { %v5546_v40 = vpack.c.bf16 %v5514_v36, %v5513_v35  ;;  %v956_v41 = vcombine.low %v948_v32, %v955_v33  ;;  %v1316_v47 = vrot.slane %v6369_v11, %v6218_v10  ;;  %v1317_v48 = vcombine.low %v6415_v46, %v6415_v46 }
  0xb7   : > { %2525 = vrot.lane.b32.xlu1 %v1690_v14, %s5999_s10  ;;  %v3131_v43 = vrot.slane %v3124_v38, %v6218_v10  ;;  %v1699_v17 = vrot.slane %v5545_v39, %v6218_v10  ;;  %v3138_v49 = vrot.slane %v6397_v34, %v6218_v10  ;;  %v3139_v52 = vcombine.low %v6426_v50, %v6426_v50 }
  0xb8   : > { %1417 = vrot.lane.b32.xlu0 %v1301_v19, %s6000_s12  ;;  %v1706_v44 = vrot.slane %v5546_v40, %v6218_v10  ;;  %v1324_v51 = vrot.slane %v1317_v48, %v6218_v10  ;;  %vm2049_vm0 = vcmask 1039360   ;;  %vm981_vm1 = vcmask 515072  }
  0xb9   : > { %v3146_v53 = vrot.slane %v3139_v52, %v6218_v10  ;;  %vm1205_vm2 = vcmask 531456   ;;  %vm983_vm3 = vcmask 1041408   ;;  %vm2272_vm4 = vcmask 7168  }
  0xba   : > { %v1707_v45 = vcombine.low %v1699_v17, %v1706_v44  ;;  %vm1203_vm5 = vcmask 1043456   ;;  %vm1467_vm6 = vcmask 523264   ;;  %vm4108_vm7 = vcmask 293888  }
  0xbb   : > { %1419 = vrot.lane.b32.xlu1 %v1309_v28, %s6000_s12 }
  0xbc   : > { %3237 = vrot.lane.b32.xlu0 %v3116_v29, %s6000_s12 }
  0xbf   : > { %3239 = vrot.lane.b32.xlu1 %v3123_v37, %s6000_s12 }
  0xc0   : > { %2039 = vrot.lane.b32.xlu0 %v956_v41, %s5996_s24 }
  0xc3   : > { %3241 = vrot.lane.b32.xlu1 %v3131_v43, %s6000_s12 }
  0xc4   : > { %971 = vrot.lane.b32.xlu0 %v956_v41, %s5997_s26 }
  0xc7   : > { %1722 = vrot.lane.b32.xlu1 %v1707_v45, %s5998_s9 }
  0xc8   : > { %2527 = vrot.lane.b32.xlu0 %v1707_v45, %s5999_s10 }
  0xcb   : > { %1421 = vrot.lane.b32.xlu1 %v1316_v47, %s6000_s12 }
  0xcc   : > { %3243 = vrot.lane.b32.xlu0 %v3138_v49, %s6000_s12 }
  0xcf   : > { %1423 = vrot.lane.b32.xlu1 %v1324_v51, %s6000_s12 }
  0xd3   : > { %3245 = vrot.lane.b32.xlu1 %v3146_v53, %s6000_s12 }
  0xef   : > { %v2026_v54 = vpop.permute.xlu1 %2025  ;;  %v958_v55 = vpop.permute.xlu0 %957 }
  0xf0   : > { %v2041_v56 = vrot.slane %v2026_v54, 6  ;;  %v973_v57 = vrot.slane %v958_v55, 6 }
  0xf2   : > { %v2050_v58 = vsel %vm2049_vm0, %v2041_v56, %v2026_v54  ;;  %v982_v59 = vsel %vm981_vm1, %v973_v57, %v958_v55 }
  0xf3   : > { %v6439_v60 = vmul.bf16 %v2050_v58, %v6340_v42  ;;  %v6442_v61 = vmul.bf16 %v6340_v42, %v982_v59  ;;  %v6444_v62 = vpop.permute.xlu1 %2027  ;;  %v6447_v63 = vmul.bf16 %v6374_v15, %v982_v59 }
  0xf4   : > { %v2042_v2 = vrot.slane %v6444_v62, 6 }
  0xf5   : > { %v2106_v0 = vrot.slane %v6439_v60, %v6218_v10  ;;  %v1032_v1 = vrot.slane %v6442_v61, %v6218_v10  ;;  %v2856_v9 = vrot.slane %v6447_v63, %v6218_v10  ;;  %v2092_v49 = vcombine.low %v6439_v60, %v6439_v60 }
  0xf6   : > { %v1709_v4 = vpop.permute.xlu0 %1708  ;;  %v2051_v12 = vsel %vm983_vm3, %v2041_v56, %v2042_v2  ;;  %v2849_v58 = vcombine.high %v6447_v63, %v6447_v63 }
  0xf7   : > { %v1724_v5 = vrot.slane %v1709_v4, 6  ;;  %v960_v6 = vpop.permute.xlu1 %959  ;;  %2222 = vrot.lane.b32.xlu0 %v2106_v0, %s5999_s10  ;;  %1152 = vrot.lane.b32.xlu1 %v1032_v1, %s5998_s9 }
  0xf8   : > { %v974_v7 = vrot.slane %v960_v6, 6  ;;  %v2863_v63 = vrot.slane %v2849_v58, %v6218_v10 }
  0xf9   : > { %v1732_v8 = vsel %vm1205_vm2, %v1724_v5, %v1709_v4 }
  0xfa   : > { %v6463_v13 = vmul.bf16 %v1732_v8, %v6340_v42  ;;  %v6466_v14 = vmul.bf16 %v6374_v15, %v1732_v8  ;;  %v984_v16 = vsel %vm983_vm3, %v973_v57, %v974_v7  ;;  %v2514_v18 = vpop.permute.xlu0 %2513  ;;  %v2052_v42 = vsel %vm2049_vm0, %v2051_v12, %v6444_v62 }
  0xfb   : > { %v985_v19 = vsel %vm981_vm1, %v984_v16, %v960_v6  ;;  %v2529_v20 = vrot.slane %v2514_v18, 6  ;;  %v6470_v21 = vpop.permute.xlu1 %2515  ;;  %2976 = vrot.lane.b32.xlu0 %v2856_v9, %s5998_s9  ;;  %v6491_v29 = vmul.bf16 %v2052_v42, %v6369_v11  ;;  %v2099_v57 = vrot.slane %v2092_v49, %v6218_v10 }
  0xfc   : > { %v1781_v3 = vrot.slane %v6463_v13, %v6218_v10  ;;  %v6478_v22 = vmul.bf16 %v6369_v11, %v985_v19  ;;  %v3386_v24 = vrot.slane %v6466_v14, %v6218_v10  ;;  %v6518_v41 = vmul.bf16 %v6397_v34, %v985_v19 }
  0xfd   : > { %v2537_v23 = vsel %vm2272_vm4, %v2529_v20, %v2514_v18  ;;  %v2121_v40 = vrot.slane %v6491_v29, %v6218_v10  ;;  %v2530_v44 = vrot.slane %v6470_v21, 6  ;;  %v3379_v6 = vcombine.high %v6466_v14, %v6466_v14 }
  0xfe   : > { %v6484_v25 = vmul.bf16 %v6374_v15, %v2537_v23  ;;  %v1711_v26 = vpop.permute.xlu0 %1710  ;;  %1901 = vrot.lane.b32.xlu1 %v1781_v3, %s5997_s26  ;;  %v1047_v15 = vrot.slane %v6478_v22, %v6218_v10  ;;  %v2871_v53 = vrot.slane %v6518_v41, %v6218_v10  ;;  %v1040_v58 = vcombine.high %v6478_v22, %v6478_v22 }
  0xff   : > { %v1725_v27 = vrot.slane %v1711_v26, 6  ;;  %v6487_v28 = vpop.permute.xlu1 %961  ;;  %3506 = vrot.lane.b32.xlu0 %v3386_v24, %s5997_s26  ;;  %v2538_v56 = vsel %vm983_vm3, %v2529_v20, %v2530_v44  ;;  %v3393_v14 = vrot.slane %v3379_v6, %v6218_v10 }
 0x100   : > { %v975_v30 = vrot.slane %v6487_v28, 6  ;;  %v2593_v31 = vrot.slane %v6484_v25, %v6218_v10  ;;  %v2539_v1 = vsel %vm2272_vm4, %v2538_v56, %v6470_v21  ;;  %v1054_v6 = vrot.slane %v1040_v58, %v6218_v10 }
 0x101   : > { %v1733_v32 = vsel %vm983_vm3, %v1724_v5, %v1725_v27  ;;  %v2562_v8 = vmul.bf16 %v6397_v34, %v2539_v1 }
 0x102   : > { %v1734_v33 = vsel %vm1205_vm2, %v1733_v32, %v1711_v26  ;;  %v6500_v35 = vpop.permute.xlu0 %2029  ;;  %2709 = vrot.lane.b32.xlu1 %v2593_v31, %s5996_s24  ;;  %v986_v37 = vsel %vm983_vm3, %v974_v7, %v975_v30  ;;  %v1025_v26 = vcombine.high %v6442_v61, %v6442_v61 }
 0x103   : > { %v6504_v36 = vmul.bf16 %v1734_v33, %v6369_v11  ;;  %v6509_v38 = vpop.permute.xlu1 %2517  ;;  %1156 = vrot.lane.b32.xlu0 %v1047_v15, %s5998_s9  ;;  %v6513_v39 = vmul.bf16 %v6397_v34, %v1734_v33  ;;  %v987_v43 = vsel %vm981_vm1, %v986_v37, %v6487_v28  ;;  %v2043_v4 = vrot.slane %v6500_v35, 6 }
 0x104   : > { %v6537_v51 = vmul.bf16 %v6415_v46, %v987_v43  ;;  %v2107_v34 = vcombine.low %v6491_v29, %v6491_v29  ;;  %v6594_v19 = vmul.bf16 %v6426_v50, %v987_v43  ;;  %v2531_v20 = vrot.slane %v6509_v38, 6 }
 0x105   : > { %v1796_v11 = vrot.slane %v6504_v36, %v6218_v10  ;;  %v3401_v48 = vrot.slane %v6513_v39, %v6218_v10  ;;  %v2053_v12 = vsel %vm983_vm3, %v2042_v2, %v2043_v4  ;;  %v2608_v2 = vrot.slane %v2562_v8, %v6218_v10 }
 0x106   : > { %v6524_v17 = vpop.permute.xlu0 %1712  ;;  %2226 = vrot.lane.b32.xlu1 %v2121_v40, %s5999_s10  ;;  %v1062_v0 = vrot.slane %v6537_v51, %v6218_v10  ;;  %v2054_v62 = vsel %vm2049_vm0, %v2053_v12, %v6500_v35  ;;  %v2114_v42 = vrot.slane %v2107_v34, %v6218_v10  ;;  %v2594_v23 = vcombine.low %v2562_v8, %v2562_v8  ;;  %v6671_v34 = vld [vmem:[%s6202_s16 + $0x2] sm:$0xff] }
 0x107   : > { %v1726_v45 = vrot.slane %v6524_v17, 6  ;;  %1905 = vrot.lane.b32.xlu0 %v1796_v11, %s5997_s26  ;;  %v6605_v3 = vmul.bf16 %v2054_v62, %v6415_v46  ;;  %v2886_v24 = vrot.slane %v6594_v19, %v6218_v10  ;;  %v2540_v29 = vsel %vm983_vm3, %v2530_v44, %v2531_v20  ;;  %5547 = vst.sshfl [vmem:[#allocation2 + $0x100] sm:$0xf pattern:$0x76325410] %v6671_v34 }
 0x108   : > { %v6530_v47 = vpop.permute.xlu1 %963  ;;  %v2601_v32 = vrot.slane %v2594_v23, %v6218_v10  ;;  %v2541_v61 = vsel %vm2272_vm4, %v2540_v29, %v6509_v38  ;;  %v1039_v33 = vrot.slane %v1025_v26, %v6218_v10  ;;  %v1774_v37 = vcombine.high %v6463_v13, %v6463_v13 }
 0x109   : > { %v1735_v52 = vsel %vm983_vm3, %v1725_v27, %v1726_v45  ;;  %v2122_v15 = vcombine.low %v6605_v3, %v6605_v3  ;;  %v6636_v43 = vmul.bf16 %v6426_v50, %v2541_v61  ;;  %v2579_v13 = vcombine.low %v6484_v25, %v6484_v25 }
 0x10a   : > { %v6546_v54 = vsel %vm1205_vm2, %v1735_v52, %v6524_v17  ;;  %v6548_v55 = vpop.permute.xlu0 %2031  ;;  %3510 = vrot.lane.b32.xlu1 %v3401_v48, %s5997_s26  ;;  %v2864_v48 = vcombine.high %v6518_v41, %v6518_v41  ;;  %v1788_v49 = vrot.slane %v1774_v37, %v6218_v10  ;;  %v1789_v8 = vcombine.high %v6504_v36, %v6504_v36  ;;  %v6707_v37 = vld [vmem:[%s6202_s16 + $0x18] sm:$0xff] }
 0x10b   : > { %2980 = vrot.lane.b32.xlu0 %v2871_v53, %s5998_s9  ;;  %v6560_v60 = vmul.bf16 %v6546_v54, %v6415_v46  ;;  %v2129_v44 = vrot.slane %v2122_v15, %v6218_v10  ;;  %v2586_v41 = vrot.slane %v2579_v13, %v6218_v10  ;;  %v2044_v22 = vrot.slane %v6548_v55, 6 }
 0x10c   : > { %v6556_v59 = vpop.permute.xlu1 %2519  ;;  %v2878_v56 = vrot.slane %v2864_v48, %v6218_v10  ;;  %v3394_v23 = vcombine.high %v6513_v39, %v6513_v39  ;;  %v976_v39 = vrot.slane %v6530_v47, 6  ;;  %v6700_v61 = vmul.bf16 %v6426_v50, %v6546_v54 }
 0x10d   : > { %v1811_v9 = vrot.slane %v6560_v60, %v6218_v10  ;;  %v1804_v36 = vcombine.high %v6560_v60, %v6560_v60  ;;  %v2055_v26 = vsel %vm983_vm3, %v2043_v4, %v2044_v22  ;;  %v2532_v54 = vrot.slane %v6556_v59, 6 }
 0x10e   : > { %v6567_v5 = vpop.permute.xlu0 %1714  ;;  %2220 = vrot.lane.b32.xlu1 %v2099_v57, %s5999_s10  ;;  %v2609_v57 = vcombine.low %v6636_v43, %v6636_v43  ;;  %v3408_v48 = vrot.slane %v3394_v23, %v6218_v10  ;;  %v988_v58 = vsel %vm983_vm3, %v975_v30, %v976_v39  ;;  %v2352_v38 = vcombine.high %v6671_v34, %v6671_v34 }
 0x10f   : > { %1160 = vrot.lane.b32.xlu0 %v1062_v0, %s5998_s9  ;;  %v1818_v35 = vrot.slane %v1804_v36, %v6218_v10  ;;  %v6737_v30 = vsel %vm981_vm1, %v988_v58, %v6530_v47 }
 0x110   : > { %v6574_v7 = vpop.permute.xlu1 %965  ;;  %v2616_v1 = vrot.slane %v2609_v57, %v6218_v10  ;;  %v6761_v23 = vmul.bf16 %v6737_v30, %v6707_v37  ;;  %5548 = vst.sshfl [vmem:[#allocation2 + $0x108] sm:$0xf pattern:$0x76325410] %v2352_v38 }
 0x112   : > { %2978 = vrot.lane.b32.xlu1 %v2863_v63, %s5998_s9  ;;  %v6585_v16 = vpop.permute.xlu0 %2033  ;;  %v1055_v63 = vcombine.high %v6537_v51, %v6537_v51 }
 0x113   : > { %1909 = vrot.lane.b32.xlu0 %v1811_v9, %s5997_s26 }
 0x114   : > { %v6591_v18 = vpop.permute.xlu1 %2521  ;;  %v1069_v62 = vrot.slane %v1055_v63, %v6218_v10 }
 0x116   : > { %3508 = vrot.lane.b32.xlu1 %v3393_v14, %s5997_s26  ;;  %v6601_v21 = vpop.permute.xlu0 %1716 }
 0x117   : > { %2713 = vrot.lane.b32.xlu0 %v2608_v2, %s5996_s24  ;;  %v6679_v2 = vld [vmem:[%s6202_s16 + $0xa] sm:$0xff] }
 0x118   : > { %5549 = vst.sshfl [vmem:[#allocation2 + $0x110] sm:$0xf pattern:$0x76325410] %v6679_v2  ;;  %v2367_v38 = vcombine.high %v6679_v2, %v6679_v2 }
 0x119   : > { %v6612_v27 = vpop.permute.xlu1 %967 }
 0x11a   : > { %2224 = vrot.lane.b32.xlu1 %v2114_v42, %s5999_s10  ;;  %v6618_v31 = vpop.permute.xlu0 %2035  ;;  %v1803_v42 = vrot.slane %v1789_v8, %v6218_v10  ;;  %5550 = vst.sshfl [vmem:[#allocation2 + $0x118] sm:$0xf pattern:$0x76325410] %v2367_v38 }
 0x11b   : > { %2984 = vrot.lane.b32.xlu0 %v2886_v24, %s5998_s9 }
 0x11d   : > { %v6629_v40 = vpop.permute.xlu1 %2523 }
 0x11e   : > { %2711 = vrot.lane.b32.xlu1 %v2601_v32, %s5996_s24  ;;  %v6632_v11 = vpop.permute.xlu0 %1718 }
 0x11f   : > { %1154 = vrot.lane.b32.xlu0 %v1039_v33, %s5998_s9 }
 0x121   : > { %v6644_v52 = vpop.permute.xlu1 %969 }
 0x122   : > { %2228 = vrot.lane.b32.xlu1 %v2129_v44, %s5999_s10  ;;  %v6647_v53 = vpop.permute.xlu0 %2037  ;;  %v2056_v44 = vsel %vm2049_vm0, %v2055_v26, %v6548_v55 }
 0x123   : > { %1903 = vrot.lane.b32.xlu0 %v1788_v49, %s5997_s26  ;;  %v6729_v63 = vmul.bf16 %v2056_v44, %v6707_v37  ;;  %v1077_v44 = vrot.slane %v6761_v23, %v6218_v10 }
 0x125   : > { %v1416_v25 = vpop.permute.xlu1 %1415 }
 0x126   : > { %2982 = vrot.lane.b32.xlu1 %v2878_v56, %s5998_s9  ;;  %v6657_v0 = vpop.permute.xlu0 %1720  ;;  %v1449_v12 = vrot.slane %v1416_v25, 4  ;;  %v1332_v56 = vcombine.low %v6707_v37, %v6707_v37 }
 0x127   : > { %2707 = vrot.lane.b32.xlu0 %v2586_v41, %s5996_s24 }
 0x129   : > { %v6666_v9 = vpop.permute.xlu1 %2525 }
 0x12a   : > { %2715 = vrot.lane.b32.xlu1 %v2616_v1, %s5996_s24  ;;  %v1418_v14 = vpop.permute.xlu0 %1417  ;;  %v1331_v1 = vrot.slane %v6415_v46, %v6218_v10  ;;  %v2542_v46 = vsel %vm983_vm3, %v2531_v20, %v2532_v54  ;;  %v2137_v20 = vcombine.low %v6729_v63, %v6729_v63 }
 0x12b   : > { %1158 = vrot.lane.b32.xlu0 %v1054_v6, %s5998_s9  ;;  %v1450_v51 = vrot.slane %v1418_v14, 4  ;;  %v3416_v6 = vrot.slane %v6700_v61, %v6218_v10  ;;  %v2543_v17 = vsel %vm2272_vm4, %v2542_v46, %v6556_v59 }
 0x12d   : > { %v6684_v24 = vpop.permute.xlu1 %1419  ;;  %v1466_v60 = vsel %vm1203_vm5, %v1449_v12, %v1450_v51 }
 0x12e   : > { %1162 = vrot.lane.b32.xlu1 %v1069_v62, %s5998_s9  ;;  %v1451_v29 = vrot.slane %v6684_v24, 4  ;;  %v3238_v32 = vpop.permute.xlu0 %3237  ;;  %v1468_v15 = vsel %vm1467_vm6, %v1416_v25, %v1466_v60  ;;  %v1727_v25 = vrot.slane %v6567_v5, 6 }
 0x12f   : > { %1907 = vrot.lane.b32.xlu0 %v1803_v42, %s5997_s26  ;;  %1515 = vst [vmem:[#allocation2] sm:$0xcc] %v1468_v15  ;;  %v3271_v33 = vrot.slane %v3238_v32, 4  ;;  %v6778_v15 = vld [vmem:[%s6202_s16 + $0x1a] sm:$0xff] }
 0x130   : > { %v1469_v4 = vsel %vm1203_vm5, %v1450_v51, %v1451_v29  ;;  %v1737_v36 = vsel %vm983_vm3, %v1726_v45, %v1727_v25  ;;  %v2136_v45 = vrot.slane %v6605_v3, %v6218_v10  ;;  %v6782_v3 = vmul.bf16 %v6778_v15, %v2543_v17 }
 0x131   : > { %v1470_v49 = vsel %vm1467_vm6, %v1418_v14, %v1469_v4  ;;  %v3240_v13 = vpop.permute.xlu1 %3239  ;;  %v1339_v14 = vrot.slane %v1332_v56, %v6218_v10  ;;  %v6772_v34 = vsel %vm1205_vm2, %v1737_v36, %v6567_v5  ;;  %v2879_v4 = vcombine.high %v6594_v19, %v6594_v19  ;;  %v6910_v5 = vld [vmem:[%s6202_s16 + $0x22] sm:$0xff] }
 0x132   : > { %1911 = vrot.lane.b32.xlu1 %v1818_v35, %s5997_s26  ;;  %1516 = vst [vmem:[#allocation2 + $0x8] sm:$0xcc] %v1470_v49  ;;  %v3272_v57 = vrot.slane %v3240_v13, 4  ;;  %v6717_v41 = vpop.permute.xlu0 %2039  ;;  %v2144_v35 = vrot.slane %v2137_v20, %v6218_v10  ;;  %v2624_v58 = vcombine.low %v6782_v3, %v6782_v3 }
 0x133   : > { %3512 = vrot.lane.b32.xlu0 %v3408_v48, %s5997_s26 }
 0x134   : > { %v3288_v8 = vsel %vm1203_vm5, %v3271_v33, %v3272_v57  ;;  %v1759_v33 = vmul.bf16 %v6772_v34, %v6707_v37  ;;  %v2631_v20 = vrot.slane %v2624_v58, %v6218_v10  ;;  %v2533_v58 = vrot.slane %v6591_v18, 6 }
 0x135   : > { %v3289_v12 = vsel %vm1467_vm6, %v3238_v32, %v3288_v8  ;;  %v3242_v28 = vpop.permute.xlu1 %3241  ;;  %v9043_v8 = vmov 0  }
 0x136   : > { %3514 = vrot.lane.b32.xlu1 %v3416_v6, %s5997_s26  ;;  %3336 = vst [vmem:[#allocation2 + $0x180] sm:$0xcc] %v3289_v12  ;;  %v3273_v51 = vrot.slane %v3242_v28, 4  ;;  %v6746_v62 = vpop.permute.xlu0 %971  ;;  %4241 = vmatprep.mubr.bf16.mxu0 %v9043_v8  ;;  %v3154_v12 = vcombine.low %v6778_v15, %v6778_v15 }
 0x137   : > { %1425 = vrot.lane.b32.xlu0 %v1331_v1, %s6000_s12  ;;  %v1826_v1 = vrot.slane %v1759_v33, %v6218_v10  ;;  %4282 = vmatprep.mubr.bf16.mxu1 %v9043_v8 }
 0x138   : > { %v3290_v42 = vsel %vm1203_vm5, %v3272_v57, %v3273_v51  ;;  %v2893_v57 = vrot.slane %v2879_v4, %v6218_v10  ;;  %5781 = vset.pattern.permute.xlu0 %v9043_v8 }
 0x139   : > { %v3291_v26 = vsel %vm1467_vm6, %v3240_v13, %v3290_v42  ;;  %v6768_v60 = vpop.permute.xlu1 %1722  ;;  %v3161_v42 = vrot.slane %v3154_v12, %v6218_v10  ;;  %v1346_v12 = vrot.slane %v6707_v37, %v6218_v10 }
 0x13a   : > { %1427 = vrot.lane.b32.xlu1 %v1339_v14, %s6000_s12  ;;  %3337 = vst [vmem:[#allocation2 + $0x188] sm:$0xcc] %v3291_v26  ;;  %v6775_v32 = vpop.permute.xlu0 %2527 }
 0x13b   : > { %2230 = vrot.lane.b32.xlu0 %v2136_v45, %s5999_s10  ;;  %v1070_v45 = vcombine.high %v6761_v23, %v6761_v23  ;;  %v1819_v23 = vcombine.high %v1759_v33, %v1759_v33  ;;  %v6856_v33 = vmul.bf16 %v6778_v15, %v6772_v34 }
 0x13d   : > { %v1422_v48 = vpop.permute.xlu1 %1421 }
 0x13e   : > { %2232 = vrot.lane.b32.xlu1 %v2144_v35, %s5999_s10  ;;  %v1452_v49 = vrot.slane %v1422_v48, 4  ;;  %v3244_v13 = vpop.permute.xlu0 %3243  ;;  %v2834_v35 = vmul.bf16 %v6778_v15, %v6737_v30 }
 0x13f   : > { %1164 = vrot.lane.b32.xlu0 %v1077_v44, %s5998_s9  ;;  %v3274_v56 = vrot.slane %v3244_v13, 4  ;;  %v2045_v44 = vrot.slane %v6585_v16, 6 }
 0x140   : > { %v1471_v19 = vsel %vm1203_vm5, %v1451_v29, %v1452_v49 }
 0x141   : > { %v6800_v6 = vpop.permute.xlu1 %1423  ;;  %v1472_v46 = vsel %vm1467_vm6, %v6684_v24, %v1471_v19  ;;  %v3292_v14 = vsel %vm1203_vm5, %v3273_v51, %v3274_v56  ;;  %v2623_v24 = vrot.slane %v6636_v43, %v6218_v10  ;;  %v3153_v43 = vrot.slane %v6426_v50, %v6218_v10 }
 0x142   : > { %2986 = vrot.lane.b32.xlu1 %v2893_v57, %s5998_s9  ;;  %1517 = vst [vmem:[#allocation2 + $0x10] sm:$0xcc] %v1472_v46  ;;  %v3293_v29 = vsel %vm1467_vm6, %v3242_v28, %v3292_v14  ;;  %v9046_v36 = vrot.slane %v6800_v6, 4  ;;  %v1084_v50 = vrot.slane %v1070_v45, %v6218_v10  ;;  %v2057_v30 = vsel %vm983_vm3, %v2044_v22, %v2045_v44  ;;  %v6860_v57 = vld [vmem:[%s6202_s16 + $0x20] sm:$0xff]  ;;  %v2338_v22 = vld [vmem:[%s6202_s16 + $0x12] sm:$0xff] }
 0x143   : > { %1913 = vrot.lane.b32.xlu0 %v1826_v1, %s5997_s26  ;;  %3338 = vst [vmem:[#allocation2 + $0x190] sm:$0xcc] %v3293_v29  ;;  %v1347_v19 = vcombine.low %v6860_v57, %v6860_v57  ;;  %5551 = vst.sshfl [vmem:[#allocation2 + $0x120] sm:$0xf pattern:$0x76325410] %v2338_v22  ;;  %v3431_v14 = vrot.slane %v6856_v33, %v6218_v10  ;;  %v2382_v29 = vcombine.high %v2338_v22, %v2338_v22 }
 0x144   : > { %v1473_v51 = vsel %vm1203_vm5, %v1452_v49, %v9046_v36  ;;  %v3409_v49 = vcombine.high %v6700_v61, %v6700_v61  ;;  %v2058_v61 = vsel %vm2049_vm0, %v2057_v30, %v6585_v16  ;;  %v1728_v1 = vrot.slane %v6601_v21, 6 }
 0x145   : > { %v6822_v28 = vpop.permute.xlu1 %3245  ;;  %v1474_v2 = vsel %vm1467_vm6, %v1422_v48, %v1473_v51  ;;  %v2901_v48 = vrot.slane %v2834_v35, %v6218_v10  ;;  %v6880_v46 = vmul.bf16 %v2058_v61, %v6860_v57  ;;  %v1354_v37 = vrot.slane %v1347_v19, %v6218_v10  ;;  %5552 = vst.sshfl [vmem:[#allocation2 + $0x128] sm:$0xf pattern:$0x76325410] %v2382_v29 }
 0x146   : > { %2719 = vrot.lane.b32.xlu1 %v2631_v20, %s5996_s24  ;;  %v9042_v17 = vrot.slane %v6822_v28, 4  ;;  %1518 = vst [vmem:[#allocation2 + $0x18] sm:$0xcc] %v1474_v2  ;;  %v3423_v55 = vrot.slane %v3409_v49, %v6218_v10  ;;  %v1739_v38 = vsel %vm983_vm3, %v1727_v25, %v1728_v1  ;;  %v2894_v2 = vcombine.high %v2834_v35, %v2834_v35 }
 0x147   : > { %2717 = vrot.lane.b32.xlu0 %v2623_v24, %s5996_s24  ;;  %v2152_v20 = vcombine.low %v6880_v46, %v6880_v46  ;;  %v2151_v24 = vrot.slane %v6729_v63, %v6218_v10  ;;  %v1740_v51 = vsel %vm1205_vm2, %v1739_v38, %v6601_v21  ;;  %v3169_v35 = vcombine.low %v6910_v5, %v6910_v5 }
 0x148   : > { %v3294_v26 = vsel %vm1203_vm5, %v3274_v56, %v9042_v17  ;;  %v1833_v56 = vrot.slane %v1819_v23, %v6218_v10  ;;  %v2638_v23 = vrot.slane %v6782_v3, %v6218_v10  ;;  %v3168_v49 = vrot.slane %v6778_v15, %v6218_v10 }
 0x149   : > { %v3295_v4 = vsel %vm1467_vm6, %v3244_v13, %v3294_v26  ;;  %v977_v13 = vrot.slane %v6574_v7, 6  ;;  %v2908_v26 = vrot.slane %v2894_v2, %v6218_v10  ;;  %v3424_v15 = vcombine.high %v6856_v33, %v6856_v33 }
 0x14a   : > { %3249 = vrot.lane.b32.xlu1 %v3161_v42, %s6000_s12  ;;  %3339 = vst [vmem:[#allocation2 + $0x198] sm:$0xcc] %v3295_v4  ;;  %v2159_v42 = vrot.slane %v2152_v20, %v6218_v10  ;;  %v978_v29 = vrot.slane %v6612_v27, 6  ;;  %v2339_v20 = vld [vmem:[%s6202_s16 + $0x1a] sm:$0xff] }
 0x14b   : > { %3247 = vrot.lane.b32.xlu0 %v3153_v43, %s6000_s12  ;;  %v990_v34 = vsel %vm983_vm3, %v976_v39, %v977_v13  ;;  %v2544_v39 = vsel %vm983_vm3, %v2532_v54, %v2533_v58  ;;  %v1760_v43 = vmul.bf16 %v1740_v51, %v6860_v57  ;;  %5553 = vst.sshfl [vmem:[#allocation2 + $0x130] sm:$0xf pattern:$0x76325410] %v2339_v20 }
 0x14c   : > { %v991_v47 = vsel %vm981_vm1, %v990_v34, %v6574_v7  ;;  %v2545_v54 = vsel %vm2272_vm4, %v2544_v39, %v6591_v18  ;;  %v2397_v7 = vcombine.high %v2339_v20, %v2339_v20  ;;  %v2166_v18 = vrot.slane %v6880_v46, %v6218_v10 }
 0x14d   : > { %v1011_v59 = vmul.bf16 %v991_v47, %v6860_v57  ;;  %v6914_v25 = vmul.bf16 %v6910_v5, %v2545_v54  ;;  %v1841_v4 = vrot.slane %v1760_v43, %v6218_v10  ;;  %v1834_v22 = vcombine.high %v1760_v43, %v1760_v43 }
 0x14e   : > { %1166 = vrot.lane.b32.xlu1 %v1084_v50, %s5998_s9  ;;  %5554 = vst.sshfl [vmem:[#allocation2 + $0x138] sm:$0xf pattern:$0x76325410] %v2397_v7  ;;  %v979_v7 = vrot.slane %v6644_v52, 6 }
 0x14f   : > { %2988 = vrot.lane.b32.xlu0 %v2901_v48, %s5998_s9  ;;  %v1092_v45 = vrot.slane %v1011_v59, %v6218_v10  ;;  %v2639_v63 = vcombine.low %v6914_v25, %v6914_v25  ;;  %v3176_v48 = vrot.slane %v3169_v35, %v6218_v10  ;;  %v1085_v30 = vcombine.high %v1011_v59, %v1011_v59 }
 0x150   : > { %v1848_v39 = vrot.slane %v1834_v22, %v6218_v10  ;;  %v2534_v59 = vrot.slane %v6629_v40, 6 }
 0x151   : > { %v2646_v50 = vrot.slane %v2639_v63, %v6218_v10  ;;  %v1099_v19 = vrot.slane %v1085_v30, %v6218_v10 }
 0x152   : > { %1915 = vrot.lane.b32.xlu1 %v1833_v56, %s5997_s26  ;;  %v6938_v56 = vmul.bf16 %v6910_v5, %v991_v47  ;;  %v6963_v47 = vmul.bf16 %v6910_v5, %v1740_v51  ;;  %v1729_v51 = vrot.slane %v6632_v11, 6 }
 0x153   : > { %3516 = vrot.lane.b32.xlu0 %v3423_v55, %s5997_s26  ;;  %v2046_v55 = vrot.slane %v6618_v31, 6 }
 0x154   : > { %v2916_v34 = vrot.slane %v6938_v56, %v6218_v10  ;;  %v3446_v2 = vrot.slane %v6963_v47, %v6218_v10  ;;  %v2909_v46 = vcombine.high %v6938_v56, %v6938_v56 }
 0x156   : > { %3518 = vrot.lane.b32.xlu1 %v3431_v14, %s5997_s26  ;;  %v2059_v14 = vsel %vm983_vm3, %v2045_v44, %v2046_v55  ;;  %v3438_v44 = vrot.slane %v3424_v15, %v6218_v10 }
 0x157   : > { %1429 = vrot.lane.b32.xlu0 %v1346_v12, %s6000_s12  ;;  %v2060_v16 = vsel %vm2049_vm0, %v2059_v14, %v6618_v31 }
 0x15a   : > { %1431 = vrot.lane.b32.xlu1 %v1354_v37, %s6000_s12  ;;  %v6969_v37 = vld [vmem:[%s6202_s16 + $0x28] sm:$0xff] }
 0x15b   : > { %2234 = vrot.lane.b32.xlu0 %v2151_v24, %s5999_s10  ;;  %v1362_v54 = vcombine.low %v6969_v37, %v6969_v37  ;;  %v992_v24 = vsel %vm983_vm3, %v977_v13, %v978_v29  ;;  %v6993_v43 = vmul.bf16 %v2060_v16, %v6969_v37 }
 0x15c   : > { %v993_v13 = vsel %vm981_vm1, %v992_v24, %v6612_v27 }
 0x15d   : > { %v2167_v35 = vcombine.low %v6993_v43, %v6993_v43 }
 0x15e   : > { %2236 = vrot.lane.b32.xlu1 %v2159_v42, %s5999_s10  ;;  %v1361_v42 = vrot.slane %v6860_v57, %v6218_v10  ;;  %v2546_v57 = vsel %vm983_vm3, %v2533_v58, %v2534_v59  ;;  %v7021_v58 = vmul.bf16 %v993_v13, %v6969_v37 }
 0x15f   : > { %1168 = vrot.lane.b32.xlu0 %v1092_v45, %s5998_s9  ;;  %v2174_v22 = vrot.slane %v2167_v35, %v6218_v10 }
 0x162   : > { %2990 = vrot.lane.b32.xlu1 %v2908_v26, %s5998_s9  ;;  %v1369_v26 = vrot.slane %v1362_v54, %v6218_v10 }
 0x163   : > { %1917 = vrot.lane.b32.xlu0 %v1841_v4, %s5997_s26  ;;  %v1741_v4 = vsel %vm983_vm3, %v1728_v1, %v1729_v51 }
 0x164   : > { %v1742_v1 = vsel %vm1205_vm2, %v1741_v4, %v6632_v11 }
 0x165   : > { %v7045_v15 = vmul.bf16 %v1742_v1, %v6969_v37 }
 0x166   : > { %2723 = vrot.lane.b32.xlu1 %v2646_v50, %s5996_s24 }
 0x167   : > { %2721 = vrot.lane.b32.xlu0 %v2638_v23, %s5996_s24  ;;  %v2547_v23 = vsel %vm2272_vm4, %v2546_v57, %v6629_v40  ;;  %v1856_v16 = vrot.slane %v7045_v15, %v6218_v10  ;;  %v1849_v31 = vcombine.high %v7045_v15, %v7045_v15 }
 0x169   : > { %v6940_v61 = vpop.permute.xlu0 %2222  ;;  %v6944_v3 = vpop.permute.xlu1 %1152  ;;  %v1863_v8 = vrot.slane %v1849_v31, %v6218_v10 }
 0x16a   : > { %3253 = vrot.lane.b32.xlu1 %v3176_v48, %s6000_s12  ;;  %v7031_v48 = vld [vmem:[%s6202_s16 + $0x2a] sm:$0xff]  ;;  %v1186_v36 = vrot.slane %v6944_v3, 4 }
 0x16b   : > { %3251 = vrot.lane.b32.xlu0 %v3168_v49, %s6000_s12  ;;  %v7037_v49 = vmul.bf16 %v7031_v48, %v2547_v23  ;;  %v3184_v24 = vcombine.low %v7031_v48, %v7031_v48  ;;  %v7072_v35 = vmul.bf16 %v7031_v48, %v993_v13 }
 0x16d   : > { %v6952_v12 = vpop.permute.xlu0 %2976  ;;  %v2654_v56 = vcombine.low %v7037_v49, %v7037_v49 }
 0x16e   : > { %1170 = vrot.lane.b32.xlu1 %v1099_v19, %s5998_s9  ;;  %v1107_v19 = vrot.slane %v7021_v58, %v6218_v10 }
 0x16f   : > { %2992 = vrot.lane.b32.xlu0 %v2916_v34, %s5998_s9  ;;  %v2661_v4 = vrot.slane %v2654_v56, %v6218_v10  ;;  %v3439_v56 = vcombine.high %v6963_v47, %v6963_v47  ;;  %v994_v47 = vsel %vm983_vm3, %v978_v29, %v979_v7  ;;  %v2931_v29 = vrot.slane %v7072_v35, %v6218_v10 }
 0x170   : > { %v6965_v33 = vpop.permute.xlu1 %1901 }
 0x171   : > { %v6973_v38 = vpop.permute.xlu0 %3506 }
 0x172   : > { %1919 = vrot.lane.b32.xlu1 %v1848_v39, %s5997_s26  ;;  %v2923_v39 = vrot.slane %v2909_v46, %v6218_v10 }
 0x173   : > { %3520 = vrot.lane.b32.xlu0 %v3438_v44, %s5997_s26  ;;  %v2255_v44 = vrot.slane %v6940_v61, 4 }
 0x174   : > { %v6995_v45 = vpop.permute.xlu1 %2709 }
 0x175   : > { %v6997_v63 = vpop.permute.xlu0 %1156 }
 0x176   : > { %3522 = vrot.lane.b32.xlu1 %v3446_v2, %s5997_s26  ;;  %v2653_v2 = vrot.slane %v6914_v25, %v6218_v10  ;;  %v2047_v25 = vrot.slane %v6647_v53, 6 }
 0x177   : > { %1433 = vrot.lane.b32.xlu0 %v1361_v42, %s6000_s12 }
 0x178   : > { %v7016_v50 = vpop.permute.xlu1 %2226 }
 0x179   : > { %v7025_v21 = vpop.permute.xlu0 %1905 }
 0x17a   : > { %1435 = vrot.lane.b32.xlu1 %v1369_v26, %s6000_s12 }
 0x17b   : > { %2238 = vrot.lane.b32.xlu0 %v2166_v18, %s5999_s10  ;;  %v3010_v18 = vrot.slane %v6952_v12, 4 }
 0x17c   : > { %v7039_v30 = vpop.permute.xlu1 %3510 }
 0x17d   : > { %v7047_v34 = vpop.permute.xlu0 %2980 }
 0x17e   : > { %2240 = vrot.lane.b32.xlu1 %v2174_v22, %s5999_s10  ;;  %v3012_v23 = vrot.slane %v7047_v34, 4 }
 0x17f   : > { %1172 = vrot.lane.b32.xlu0 %v1107_v19, %s5998_s9  ;;  %v3191_v19 = vrot.slane %v3184_v24, %v6218_v10 }
 0x180   : > { %v2221_v14 = vpop.permute.xlu1 %2220 }
 0x181   : > { %v2254_v20 = vrot.slane %v2221_v14, 4  ;;  %v7057_v54 = vpop.permute.xlu0 %1160 }
 0x182   : > { %2994 = vrot.lane.b32.xlu1 %v2923_v39, %s5998_s9  ;;  %v3183_v39 = vrot.slane %v6910_v5, %v6218_v10  ;;  %v3540_v5 = vrot.slane %v6973_v38, 4 }
 0x183   : > { %v2271_v42 = vsel %vm1203_vm5, %v2254_v20, %v2255_v44  ;;  %1921 = vrot.lane.b32.xlu0 %v1856_v16, %s5997_s26  ;;  %v1100_v16 = vcombine.high %v7021_v58, %v7021_v58  ;;  %v3542_v58 = vrot.slane %v7039_v30, 4 }
 0x184   : > { %v2273_v57 = vsel %vm2272_vm4, %v2221_v14, %v2271_v42  ;;  %v2979_v26 = vpop.permute.xlu1 %2978 }
 0x185   : > { %2320 = vst [vmem:[#allocation2 + $0x80] sm:$0xcc] %v2273_v57  ;;  %v3011_v46 = vrot.slane %v2979_v26, 4  ;;  %v7076_v22 = vpop.permute.xlu0 %1909 }
 0x186   : > { %2727 = vrot.lane.b32.xlu1 %v2661_v4, %s5996_s24  ;;  %v2061_v4 = vsel %vm983_vm3, %v2046_v55, %v2047_v25 }
 0x187   : > { %v3027_v13 = vsel %vm1203_vm5, %v3010_v18, %v3011_v46  ;;  %v3029_v14 = vsel %vm1203_vm5, %v3011_v46, %v3012_v23  ;;  %2725 = vrot.lane.b32.xlu0 %v2653_v2, %s5996_s24  ;;  %v2924_v2 = vcombine.high %v7072_v35, %v7072_v35  ;;  %v995_v18 = vsel %vm981_vm1, %v994_v47, %v6644_v52  ;;  %v7122_v46 = vld [vmem:[%s6202_s16 + $0x32] sm:$0xff] }
 0x188   : > { %v3028_v20 = vsel %vm1205_vm2, %v6952_v12, %v3027_v13  ;;  %v3030_v24 = vsel %vm1205_vm2, %v2979_v26, %v3029_v14  ;;  %v3509_v42 = vpop.permute.xlu1 %3508  ;;  %v2181_v12 = vrot.slane %v6993_v43, %v6218_v10  ;;  %v7111_v26 = vmul.bf16 %v7031_v48, %v1742_v1 }
 0x189   : > { %3075 = vst [vmem:[#allocation2 + $0x180] sm:$0x33] %v3028_v20  ;;  %3076 = vst [vmem:[#allocation2 + $0x188] sm:$0x33] %v3030_v24  ;;  %v3541_v57 = vrot.slane %v3509_v42, 4  ;;  %v7104_v27 = vpop.permute.xlu0 %2713  ;;  %v9045_v13 = vrot.slane %v6657_v0, 6  ;;  %v1114_v20 = vrot.slane %v1100_v16, %v6218_v10  ;;  %v2668_v24 = vrot.slane %v7037_v49, %v6218_v10 }
 0x18a   : > { %3257 = vrot.lane.b32.xlu1 %v3191_v19, %s6000_s12  ;;  %v7150_v16 = vmul.bf16 %v7122_v46, %v995_v18  ;;  %v3199_v35 = vcombine.low %v7122_v46, %v7122_v46 }
 0x18b   : > { %v3557_v14 = vsel %vm1203_vm5, %v3540_v5, %v3541_v57  ;;  %v3559_v1 = vsel %vm1203_vm5, %v3541_v57, %v3542_v58  ;;  %3255 = vrot.lane.b32.xlu0 %v3183_v39, %s6000_s12  ;;  %v7139_v5 = vld [vmem:[%s6202_s16 + $0x30] sm:$0xff]  ;;  %v2062_v57 = vsel %vm2049_vm0, %v2061_v4, %v6647_v53  ;;  %v2257_v39 = vrot.slane %v7016_v50, 4 }
 0x18c   : > { %v3558_v55 = vsel %vm981_vm1, %v6973_v38, %v3557_v14  ;;  %v3560_v19 = vsel %vm981_vm1, %v3509_v42, %v3559_v1  ;;  %v2225_v47 = vpop.permute.xlu1 %2224  ;;  %v7147_v38 = vmul.bf16 %v995_v18, %v7139_v5  ;;  %v3461_v14 = vrot.slane %v7111_v26, %v6218_v10 }
 0x18d   : > { %3605 = vst [vmem:[#allocation2 + $0x200] sm:$0x33] %v3558_v55  ;;  %3606 = vst [vmem:[#allocation2 + $0x208] sm:$0x33] %v3560_v19  ;;  %v2256_v15 = vrot.slane %v2225_v47, 4  ;;  %v7144_v17 = vpop.permute.xlu0 %2984  ;;  %v1743_v4 = vsel %vm983_vm3, %v1729_v51, %v9045_v13  ;;  %v9047_v1 = vrot.slane %v6666_v9, 6  ;;  %v7169_v19 = vmul.bf16 %v2062_v57, %v7139_v5 }
 0x18e   : > { %1174 = vrot.lane.b32.xlu1 %v1114_v20, %s5998_s9  ;;  %v2742_v42 = vrot.slane %v6995_v45, 4  ;;  %v2744_v13 = vrot.slane %v7104_v27, 4  ;;  %v2340_v57 = vld [vmem:[%s6202_s16 + $0x22] sm:$0xff]  ;;  %v1377_v31 = vcombine.low %v7139_v5, %v7139_v5  ;;  %v2946_v43 = vrot.slane %v7150_v16, %v6218_v10 }
 0x18f   : > { %v2274_v18 = vsel %vm1203_vm5, %v2255_v44, %v2256_v15  ;;  %v2276_v55 = vsel %vm1203_vm5, %v2256_v15, %v2257_v39  ;;  %2996 = vrot.lane.b32.xlu0 %v2931_v29, %s5998_s9  ;;  %v3453_v29 = vrot.slane %v3439_v56, %v6218_v10  ;;  %5555 = vst.sshfl [vmem:[#allocation2 + $0x140] sm:$0xf pattern:$0x76325410] %v2340_v57 }
 0x190   : > { %v2275_v20 = vsel %vm2272_vm4, %v6940_v61, %v2274_v18  ;;  %v2277_v11 = vsel %vm2272_vm4, %v2225_v47, %v2276_v55  ;;  %v2712_v51 = vpop.permute.xlu1 %2711  ;;  %v1188_v61 = vrot.slane %v6997_v63, 4  ;;  %v2548_v18 = vsel %vm983_vm3, %v2534_v59, %v9047_v1 }
 0x191   : > { %2321 = vst [vmem:[#allocation2 + $0x88] sm:$0xcc] %v2275_v20  ;;  %2322 = vst [vmem:[#allocation2 + $0x90] sm:$0xcc] %v2277_v11  ;;  %v2743_v44 = vrot.slane %v2712_v51, 4  ;;  %v1155_v15 = vpop.permute.xlu0 %1154 }
 0x192   : > { %1923 = vrot.lane.b32.xlu1 %v1863_v8, %s5997_s26  ;;  %v1187_v47 = vrot.slane %v1155_v15, 4  ;;  %v1376_v8 = vrot.slane %v6969_v37, %v6218_v10 }
 0x193   : > { %v2760_v56 = vsel %vm1203_vm5, %v2742_v42, %v2743_v44  ;;  %v2762_v55 = vsel %vm1203_vm5, %v2743_v44, %v2744_v13  ;;  %3524 = vrot.lane.b32.xlu0 %v3453_v29, %s5997_s26  ;;  %v1744_v44 = vsel %vm1205_vm2, %v1743_v4, %v6657_v0  ;;  %v1384_v4 = vrot.slane %v1377_v31, %v6218_v10 }
 0x194   : > { %v2761_v20 = vsel %vm2049_vm0, %v6995_v45, %v2760_v56  ;;  %v2763_v40 = vsel %vm2049_vm0, %v2712_v51, %v2762_v55  ;;  %v7201_v11 = vpop.permute.xlu1 %2228  ;;  %v1204_v59 = vsel %vm1203_vm5, %v1186_v36, %v1187_v47  ;;  %v1207_v1 = vsel %vm1203_vm5, %v1187_v47, %v1188_v61 }
 0x195   : > { %2807 = vst [vmem:[#allocation2 + $0x108] sm:$0xcc] %v2761_v20  ;;  %2808 = vst [vmem:[#allocation2 + $0x110] sm:$0xcc] %v2763_v40  ;;  %v2258_v37 = vrot.slane %v7201_v11, 4  ;;  %v1206_v29 = vsel %vm1205_vm2, %v6944_v3, %v1204_v59  ;;  %v1208_v51 = vsel %vm1205_vm2, %v1155_v15, %v1207_v1  ;;  %v1904_v56 = vpop.permute.xlu0 %1903  ;;  %v1935_v55 = vrot.slane %v6965_v33, 4 }
 0x196   : > { %v1937_v36 = vrot.slane %v7025_v21, 4  ;;  %1253 = vst [vmem:[#allocation2] sm:$0x33] %v1206_v29  ;;  %1254 = vst [vmem:[#allocation2 + $0x8] sm:$0x33] %v1208_v51  ;;  %3526 = vrot.lane.b32.xlu1 %v3461_v14, %s5997_s26  ;;  %v1936_v47 = vrot.slane %v1904_v56, 4  ;;  %v2182_v20 = vcombine.low %v7169_v19, %v7169_v19  ;;  %v2549_v3 = vsel %vm2272_vm4, %v2548_v18, %v6666_v9 }
 0x197   : > { %v2278_v1 = vsel %vm1203_vm5, %v2257_v39, %v2258_v37  ;;  %1437 = vrot.lane.b32.xlu0 %v1376_v8, %s6000_s12  ;;  %v2412_v15 = vcombine.high %v2340_v57, %v2340_v57  ;;  %v9048_v40 = vrot.slane %v6717_v41, 6  ;;  %v3014_v18 = vrot.slane %v7144_v17, 4 }
 0x198   : > { %v2279_v14 = vsel %vm2272_vm4, %v7016_v50, %v2278_v1  ;;  %v2983_v59 = vpop.permute.xlu1 %2982  ;;  %v1952_v31 = vsel %vm1203_vm5, %v1935_v55, %v1936_v47  ;;  %v1954_v29 = vsel %vm1203_vm5, %v1936_v47, %v1937_v36  ;;  %v1115_v50 = vcombine.high %v7147_v38, %v7147_v38 }
 0x199   : > { %2323 = vst [vmem:[#allocation2 + $0x98] sm:$0xcc] %v2279_v14  ;;  %v3013_v51 = vrot.slane %v2983_v59, 4  ;;  %v1953_v39 = vsel %vm981_vm1, %v6965_v33, %v1952_v31  ;;  %v1955_v57 = vsel %vm981_vm1, %v1904_v56, %v1954_v29  ;;  %v2708_v8 = vpop.permute.xlu0 %2707  ;;  %v1122_v55 = vrot.slane %v7147_v38, %v6218_v10 }
 0x19a   : > { %5556 = vst.sshfl [vmem:[#allocation2 + $0x148] sm:$0xf pattern:$0x76325410] %v2412_v15  ;;  %v7241_v1 = vmul.bf16 %v1744_v44, %v7139_v5  ;;  %2000 = vst [vmem:[#allocation2 + $0x80] sm:$0x33] %v1953_v39  ;;  %1439 = vrot.lane.b32.xlu1 %v1384_v4, %s6000_s12  ;;  %v7245_v33 = vmul.bf16 %v7122_v46, %v2549_v3  ;;  %v2189_v14 = vrot.slane %v2182_v20, %v6218_v10 }
 0x19b   : > { %2001 = vst [vmem:[#allocation2 + $0x88] sm:$0x33] %v1955_v57  ;;  %v2741_v47 = vrot.slane %v2708_v8, 4  ;;  %v3031_v56 = vsel %vm1203_vm5, %v3012_v23, %v3013_v51  ;;  %v3033_v15 = vsel %vm1203_vm5, %v3013_v51, %v3014_v18  ;;  %2242 = vrot.lane.b32.xlu0 %v2181_v12, %s5999_s10  ;;  %v2063_v4 = vsel %vm983_vm3, %v2047_v25, %v9048_v40 }
 0x19c   : > { %v3032_v23 = vsel %vm1205_vm2, %v7047_v34, %v3031_v56  ;;  %v3034_v3 = vsel %vm1205_vm2, %v2983_v59, %v3033_v15  ;;  %v7266_v31 = vpop.permute.xlu1 %2715  ;;  %v7274_v12 = vmul.bf16 %v7122_v46, %v1744_v44  ;;  %v1871_v45 = vrot.slane %v7241_v1, %v6218_v10 }
 0x19d   : > { %v2758_v20 = vsel %vm1203_vm5, %v2741_v47, %v2742_v42  ;;  %3077 = vst [vmem:[#allocation2 + $0x190] sm:$0x33] %v3032_v23  ;;  %3078 = vst [vmem:[#allocation2 + $0x198] sm:$0x33] %v3034_v3  ;;  %v2745_v53 = vrot.slane %v7266_v31, 4  ;;  %v1159_v25 = vpop.permute.xlu0 %1158  ;;  %v1190_v42 = vrot.slane %v7057_v54, 4  ;;  %v2669_v29 = vcombine.low %v7245_v33, %v7245_v33 }
 0x19e   : > { %v2759_v34 = vsel %vm2049_vm0, %v2708_v8, %v2758_v20  ;;  %2244 = vrot.lane.b32.xlu1 %v2189_v14, %s5999_s10  ;;  %v1189_v44 = vrot.slane %v1159_v25, 4  ;;  %v7288_v51 = vsel %vm2049_vm0, %v2063_v4, %v6717_v41  ;;  %v2938_v57 = vrot.slane %v2924_v2, %v6218_v10  ;;  %v3622_v14 = vld [vmem:[#allocation2] sm:$0xff]  ;;  %v3623_v3 = vld [vmem:[#allocation2 + $0x8] sm:$0xff] }
 0x19f   : > { %2806 = vst [vmem:[#allocation2 + $0x100] sm:$0xcc] %v2759_v34  ;;  %v2764_v39 = vsel %vm1203_vm5, %v2744_v13, %v2745_v53  ;;  %1176 = vrot.lane.b32.xlu0 %v1122_v55, %s5998_s9  ;;  %v7308_v13 = vld [vmem:[#allocation2 + $0x108] sm:$0xff]  ;;  %v1939_v2 = vrot.slane %v7076_v22, 4 }
 0x1a0   : > { %v2765_v8 = vsel %vm2049_vm0, %v7104_v27, %v2764_v39  ;;  %v7302_v47 = vpop.permute.xlu1 %1162  ;;  %v1209_v56 = vsel %vm1203_vm5, %v1188_v61, %v1189_v44  ;;  %v1211_v15 = vsel %vm1203_vm5, %v1189_v44, %v1190_v42 }
 0x1a1   : > { %2809 = vst [vmem:[#allocation2 + $0x118] sm:$0xcc] %v2765_v8  ;;  %v1191_v55 = vrot.slane %v7302_v47, 4  ;;  %v1210_v27 = vsel %vm1205_vm2, %v6997_v63, %v1209_v56  ;;  %v1212_v4 = vsel %vm1205_vm2, %v1159_v25, %v1211_v15  ;;  %v1908_v23 = vpop.permute.xlu0 %1907  ;;  %v3638_v61 = vld [vmem:[#allocation2 + $0x80] sm:$0xff]  ;;  %v3671_v8 = vld [vmem:[#allocation2 + $0x188] sm:$0xff]  ;;  %v2676_v63 = vrot.slane %v2669_v29, %v6218_v10 }
 0x1a2   : > { %v3639_v20 = vld [vmem:[#allocation2 + $0x88] sm:$0xff]  ;;  %1255 = vst [vmem:[#allocation2 + $0x10] sm:$0x33] %v1210_v27  ;;  %1256 = vst [vmem:[#allocation2 + $0x18] sm:$0x33] %v1212_v4  ;;  %2998 = vrot.lane.b32.xlu1 %v2938_v57, %s5998_s9  ;;  %v1938_v34 = vrot.slane %v1908_v23, 4  ;;  %v5564_v44 = vcombine.high %v3622_v14, %v3638_v61  ;;  %v5563_v40 = vcombine.low %v3622_v14, %v3638_v61 }
 0x1a3   : > { %v5566_v39 = vcombine.high %v3623_v3, %v3639_v20  ;;  %v1213_v59 = vsel %vm1203_vm5, %v1190_v42, %v1191_v55  ;;  %1925 = vrot.lane.b32.xlu0 %v1871_v45, %s5997_s26  ;;  %v5565_v25 = vcombine.low %v3623_v3, %v3639_v20  ;;  %v5598_v56 = vcombine.high %v7308_v13, %v3671_v8  ;;  %v3686_v42 = vld [vmem:[#allocation2 + $0x200] sm:$0x33]  ;;  %v3687_v3 = vld [vmem:[#allocation2 + $0x208] sm:$0x33] }
 0x1a4   : > { %v1214_v15 = vsel %vm1205_vm2, %v7057_v54, %v1213_v59  ;;  %v7326_v57 = vpop.permute.xlu1 %1911  ;;  %v1956_v14 = vsel %vm1203_vm5, %v1937_v36, %v1938_v34  ;;  %v1958_v27 = vsel %vm1203_vm5, %v1938_v34, %v1939_v2  ;;  %4209 = vmatprep.subr.bf16.mxu0 %v5564_v44  ;;  %v7333_v29 = vrot.slane %v6746_v62, 6  ;;  %v3670_v61 = vld [vmem:[#allocation2 + $0x180] sm:$0xff] }
 0x1a5   : > { %4250 = vmatprep.subr.bf16.mxu1 %v5566_v39  ;;  %1257 = vst [vmem:[#allocation2 + $0x20] sm:$0x33] %v1214_v15  ;;  %v1940_v45 = vrot.slane %v7326_v57, 4  ;;  %v1957_v54 = vsel %vm981_vm1, %v7025_v21, %v1956_v14  ;;  %v1959_v59 = vsel %vm981_vm1, %v1908_v23, %v1958_v27  ;;  %4210 = vmatpush1.bf16.msra.mxu0 %v5563_v40  ;;  %v3513_v4 = vpop.permute.xlu0 %3512 }
 0x1a6   : > { %4251 = vmatpush1.bf16.msra.mxu1 %v5565_v25  ;;  %v3654_v36 = vld [vmem:[#allocation2 + $0x100] sm:$0xff]  ;;  %2002 = vst [vmem:[#allocation2 + $0x90] sm:$0x33] %v1957_v54  ;;  %2003 = vst [vmem:[#allocation2 + $0x98] sm:$0x33] %v1959_v59  ;;  %2731 = vrot.lane.b32.xlu1 %v2676_v63, %s5996_s24  ;;  %v3543_v20 = vrot.slane %v3513_v4, 4  ;;  %v3206_v34 = vrot.slane %v3199_v35, %v6218_v10  ;;  %v5597_v40 = vcombine.low %v7308_v13, %v3671_v8 }
 0x1a7   : > { %4252 = vmatprep.subr.bf16.mxu1 %v5598_v56  ;;  %v5596_v44 = vcombine.high %v3654_v36, %v3670_v61  ;;  %v5595_v39 = vcombine.low %v3654_v36, %v3670_v61  ;;  %v1960_v21 = vsel %vm1203_vm5, %v1939_v2, %v1940_v45  ;;  %2729 = vrot.lane.b32.xlu0 %v2668_v24, %s5996_s24  ;;  %v7352_v25 = vld [vmem:[%s6202_s16 + $0x38] sm:$0xff] }
 0x1a8   : > { %v5628_v23 = vcombine.high %v3686_v42, %v3686_v42  ;;  %v3198_v63 = vrot.slane %v7031_v48, %v6218_v10  ;;  %v1961_v35 = vsel %vm981_vm1, %v7076_v22, %v1960_v21  ;;  %v7356_v56 = vpop.permute.xlu1 %3514  ;;  %v3561_v2 = vsel %vm1203_vm5, %v3542_v58, %v3543_v20 }
 0x1a9   : > { %4211 = vmatprep.subr.bf16.mxu0 %v5596_v44  ;;  %v5627_v49 = vcombine.low %v3686_v42, %v3686_v42  ;;  %v5629_v24 = vcombine.low %v3687_v3, %v3687_v3  ;;  %v1864_v13 = vcombine.high %v7241_v1, %v7241_v1  ;;  %2004 = vst [vmem:[#allocation2 + $0xa0] sm:$0x33] %v1961_v35  ;;  %v3544_v48 = vrot.slane %v7356_v56, 4  ;;  %v1426_v22 = vpop.permute.xlu0 %1425  ;;  %v3624_v44 = vld [vmem:[#allocation2 + $0x10] sm:$0xff] }
 0x1aa   : > { %v3562_v8 = vsel %vm981_vm1, %v7039_v30, %v3561_v2  ;;  %4212 = vmatpush1.bf16.msra.mxu0 %v5595_v39  ;;  %4253 = vmatpush1.bf16.msra.mxu1 %v5597_v40  ;;  %v5630_v15 = vcombine.high %v3687_v3, %v3687_v3  ;;  %v3476_v14 = vrot.slane %v7274_v12, %v6218_v10  ;;  %v7373_v1 = vrot.slane %v6768_v60, 6  ;;  %v3672_v2 = vld [vmem:[#allocation2 + $0x190] sm:$0xff] }
 0x1ab   : > { %v996_v58 = vsel %vm983_vm3, %v979_v7, %v7333_v29  ;;  %3607 = vst [vmem:[#allocation2 + $0x210] sm:$0x33] %v3562_v8  ;;  %3261 = vrot.lane.b32.xlu1 %v3206_v34, %s6000_s12  ;;  %v1454_v27 = vrot.slane %v1426_v22, 4  ;;  %5659 = vmatprep.subr.msk.bf16.mxu0 %vm983_vm3, %v5628_v23  ;;  %v7379_v30 = vmul.bf16 %v7288_v51, %v7352_v25  ;;  %v2536_v42 = vrot.slane %v6775_v32, 6 }
 0x1ac   : > { %v3563_v52 = vsel %vm1203_vm5, %v3543_v20, %v3544_v48  ;;  %5661 = vmatprep.subr.msk.bf16.mxu1 %vm983_vm3, %v5630_v15  ;;  %v1129_v7 = vrot.slane %v1115_v50, %v6218_v10  ;;  %3259 = vrot.lane.b32.xlu0 %v3198_v63, %s6000_s12  ;;  %v7392_v59 = vpop.permute.xlu1 %1427  ;;  %v9090_v51 = vrot.slane %v6800_v6, 4  ;;  %v4114_v61 = vsel %vm983_vm3, %v5627_v49, 0  ;;  %v7402_v20 = vld [vmem:[%s9034_s1] sm:$0xf]  ;;  %v3657_v15 = vld [vmem:[#allocation2 + $0x118] sm:$0xff] }
 0x1ad   : > { %v3564_v54 = vsel %vm981_vm1, %v3513_v4, %v3563_v52  ;;  %v4120_v3 = vsel %vm983_vm3, %v5629_v24, 0  ;;  %v7406_v38 = vsel %vm981_vm1, %v996_v58, %v6746_v62  ;;  %v1455_v50 = vrot.slane %v7392_v59, 4  ;;  %v2231_v34 = vpop.permute.xlu0 %2230  ;;  %v3640_v39 = vld [vmem:[#allocation2 + $0x90] sm:$0xff]  ;;  %v3641_v21 = vld [vmem:[#allocation2 + $0x98] sm:$0xff] }
 0x1ae   : > { %v1475_v36 = vsel %vm1203_vm5, %v9090_v51, %v1454_v27  ;;  %3608 = vst [vmem:[#allocation2 + $0x218] sm:$0x33] %v3564_v54  ;;  %4214 = vmatpush1.bf16.msra.mxu0 %v4114_v61  ;;  %4255 = vmatpush1.bf16.msra.mxu1 %v4120_v3  ;;  %v9091_v40 = vrot.slane %v6657_v0, 6  ;;  %v2259_v62 = vrot.slane %v2231_v34, 4  ;;  %v5567_v63 = vcombine.low %v3624_v44, %v3640_v39 }
 0x1af   : > { %v1476_v4 = vsel %vm1467_vm6, %v6800_v6, %v1475_v36  ;;  %1178 = vrot.lane.b32.xlu1 %v1129_v7, %s5998_s9  ;;  %v5568_v35 = vcombine.high %v3624_v44, %v3640_v39  ;;  %v3625_v6 = vld [vmem:[#allocation2 + $0x18] sm:$0xff]  ;;  %v1477_v49 = vsel %vm1203_vm5, %v1454_v27, %v1455_v50  ;;  %v1878_v24 = vrot.slane %v1864_v13, %v6218_v10 }
 0x1b0   : > { %v7415_v23 = vsel %vm983_vm3, %v9091_v40, %v7373_v1  ;;  %1519 = vst [vmem:[#allocation2 + $0x20] sm:$0xcc] %v1476_v4  ;;  %3000 = vrot.lane.b32.xlu0 %v2946_v43, %s5998_s9  ;;  %v5569_v0 = vcombine.low %v3625_v6, %v3641_v21  ;;  %v5570_v8 = vcombine.high %v3625_v6, %v3641_v21  ;;  %v9092_v58 = vrot.slane %v6666_v9, 6  ;;  %v7432_v27 = vpop.permute.xlu1 %2232  ;;  %v3656_v43 = vld [vmem:[#allocation2 + $0x110] sm:$0xff]  ;;  %v3673_v36 = vld [vmem:[#allocation2 + $0x198] sm:$0xff] }
 0x1b1   : > { %v1478_v7 = vsel %vm1467_vm6, %v1426_v22, %v1477_v49  ;;  %v2280_v13 = vsel %vm1203_vm5, %v2258_v37, %v2259_v62  ;;  %4291 = vmatprep.subr.bf16.mxu0 %v5568_v35  ;;  %5660 = vmatmul.mubr.msk.bf16.vlgmr.msra.gmra.mrb[0].mxu0 %vm4108_vm7, %v7402_v20  ;;  %v2260_v54 = vrot.slane %v7432_v27, 4  ;;  %v7444_v22 = vpop.permute.xlu0 %1164  ;;  %v5600_v51 = vcombine.high %v3656_v43, %v3672_v2  ;;  %v2341_v4 = vld [vmem:[%s6202_s16 + $0x2a] sm:$0xff] }
 0x1b2   : > { %v2550_v52 = vsel %vm983_vm3, %v9092_v58, %v2536_v42  ;;  %1520 = vst [vmem:[#allocation2 + $0x28] sm:$0xcc] %v1478_v7  ;;  %v2281_v9 = vsel %vm2272_vm4, %v7201_v11, %v2280_v13  ;;  %4332 = vmatprep.subr.bf16.mxu1 %v5570_v8  ;;  %5662 = vmatmul.mubr.msk.bf16.vlgmr.msra.gmra.mrb[0].mxu1 %vm4108_vm7, %v7402_v20  ;;  %v3688_v3 = vld [vmem:[#allocation2 + $0x210] sm:$0x33]  ;;  %v1192_v11 = vrot.slane %v7444_v22, 4 }
 0x1b3   : > { %v9093_v37 = vcombine.high %v7111_v26, %v7111_v26  ;;  %2324 = vst [vmem:[#allocation2 + $0xa0] sm:$0xcc] %v2281_v9  ;;  %1927 = vrot.lane.b32.xlu1 %v1878_v24, %s5997_s26  ;;  %4292 = vmatpush1.bf16.msra.mxu0 %v5567_v63  ;;  %v5602_v44 = vcombine.high %v3657_v15, %v3673_v36  ;;  %5557 = vst.sshfl [vmem:[#allocation2 + $0x150] sm:$0xf pattern:$0x76325410] %v2341_v4 }
 0x1b4   : > { %v1392_v39 = vcombine.low %v7352_v25, %v7352_v25  ;;  %v1391_v21 = vrot.slane %v7139_v5, %v6218_v10  ;;  %v2282_v26 = vsel %vm1203_vm5, %v2259_v62, %v2260_v54  ;;  %4333 = vmatpush1.bf16.msra.mxu1 %v5569_v0  ;;  %v5599_v40 = vcombine.low %v3656_v43, %v3672_v2  ;;  %v7461_v6 = vpop.permute.xlu1 %2986 }
 0x1b5   : > { %v3468_v61 = vrot.slane %v9093_v37, %v6218_v10  ;;  %4293 = vmatprep.subr.bf16.mxu0 %v5600_v51  ;;  %v5601_v35 = vcombine.low %v3657_v15, %v3673_v36  ;;  %v2283_v63 = vsel %vm2272_vm4, %v2231_v34, %v2282_v26  ;;  %v1215_v49 = vsel %vm1203_vm5, %v1191_v55, %v1192_v11  ;;  %v3689_v24 = vld [vmem:[#allocation2 + $0x218] sm:$0x33]  ;;  %v7472_v34 = vpop.permute.xlu0 %1913 }
 0x1b6   : > { %4334 = vmatprep.subr.bf16.mxu1 %v5602_v44  ;;  %v5632_v5 = vcombine.high %v3688_v3, %v3688_v3  ;;  %2325 = vst [vmem:[#allocation2 + $0xa8] sm:$0xcc] %v2283_v63  ;;  %v3015_v62 = vrot.slane %v7461_v6, 4  ;;  %v1216_v2 = vsel %vm1205_vm2, %v7302_v47, %v1215_v49  ;;  %v5631_v0 = vcombine.low %v3688_v3, %v3688_v3  ;;  %v7517_v44 = vld [vmem:[%s6202_s16 + $0x3a] sm:$0xff] }
 0x1b7   : > { %3528 = vrot.lane.b32.xlu0 %v3468_v61, %s5997_s26  ;;  %v5633_v8 = vcombine.low %v3689_v24, %v3689_v24  ;;  %v9094_v15 = vmov 0   ;;  %1258 = vst [vmem:[#allocation2 + $0x28] sm:$0x33] %v1216_v2  ;;  %3530 = vrot.lane.b32.xlu1 %v3476_v14, %s5997_s26  ;;  %v1941_v55 = vrot.slane %v7472_v34, 4  ;;  %v5634_v58 = vcombine.high %v3689_v24, %v3689_v24 }
 0x1b8   : > { %4323 = vmatprep.mubr.bf16.mxu0 %v9094_v15  ;;  %4364 = vmatprep.mubr.bf16.mxu1 %v9094_v15  ;;  %v1399_v47 = vrot.slane %v1392_v39, %v6218_v10  ;;  %v2427_v7 = vcombine.high %v2341_v4, %v2341_v4  ;;  %v2197_v13 = vcombine.low %v7379_v30, %v7379_v30  ;;  %v7498_v36 = vpop.permute.xlu1 %2719 }
 0x1b9   : > { %4294 = vmatpush1.bf16.msra.mxu0 %v5599_v40  ;;  %v7486_v43 = vmul.bf16 %v7352_v25, %v7406_v38  ;;  %v3035_v14 = vsel %vm1203_vm5, %v3014_v18, %v3015_v62  ;;  %4335 = vmatpush1.bf16.msra.mxu1 %v5601_v35  ;;  %v2551_v9 = vsel %vm2272_vm4, %v2550_v52, %v6775_v32  ;;  %v4126_v52 = vsel %vm983_vm3, %v5631_v0, 0  ;;  %v2718_v3 = vpop.permute.xlu0 %2717 }
 0x1ba   : > { %5663 = vmatprep.subr.msk.bf16.mxu0 %vm983_vm3, %v5632_v5  ;;  %v3036_v51 = vsel %vm1205_vm2, %v7144_v17, %v3035_v14  ;;  %v1962_v37 = vsel %vm1203_vm5, %v1940_v45, %v1941_v55  ;;  %5665 = vmatprep.subr.msk.bf16.mxu1 %vm983_vm3, %v5634_v58  ;;  %5558 = vst.sshfl [vmem:[#allocation2 + $0x158] sm:$0xf pattern:$0x76325410] %v2427_v7  ;;  %v4132_v61 = vsel %vm983_vm3, %v5633_v8, 0  ;;  %v3626_v45 = vld [vmem:[#allocation2 + $0x20] sm:$0xff] }
 0x1bb   : > { %1441 = vrot.lane.b32.xlu0 %v1391_v21, %s6000_s12  ;;  %v7510_v18 = vsel %vm1205_vm2, %v7415_v23, %v6768_v60  ;;  %3079 = vst [vmem:[#allocation2 + $0x1a0] sm:$0x33] %v3036_v51  ;;  %v1963_v17 = vsel %vm981_vm1, %v7326_v57, %v1962_v37  ;;  %v3642_v4 = vld [vmem:[#allocation2 + $0xa0] sm:$0xff]  ;;  %v2747_v39 = vrot.slane %v7498_v36, 4  ;;  %1443 = vrot.lane.b32.xlu1 %v1399_v47, %s6000_s12  ;;  %v2746_v60 = vrot.slane %v2718_v3, 4 }
 0x1bc   : > { %2005 = vst [vmem:[#allocation2 + $0xa8] sm:$0x33] %v1963_v17  ;;  %v5571_v23 = vcombine.low %v3626_v45, %v3642_v4  ;;  %v5572_v21 = vcombine.high %v3626_v45, %v3642_v4  ;;  %v2939_v57 = vcombine.high %v7150_v16, %v7150_v16  ;;  %v7524_v26 = vmul.bf16 %v7517_v44, %v2551_v9  ;;  %v7526_v40 = vpop.permute.xlu1 %3249 }
 0x1bd   : > { %4296 = vmatpush1.bf16.msra.mxu0 %v4126_v52  ;;  %4337 = vmatpush1.bf16.msra.mxu1 %v4132_v61  ;;  %v2766_v35 = vsel %vm1203_vm5, %v2745_v53, %v2746_v60  ;;  %v2768_v63 = vsel %vm1203_vm5, %v2746_v60, %v2747_v39  ;;  %v2204_v49 = vrot.slane %v2197_v13, %v6218_v10  ;;  %v3277_v24 = vrot.slane %v7526_v40, 4  ;;  %v3248_v0 = vpop.permute.xlu0 %3247 }
 0x1be   : > { %v9095_v16 = vrot.slane %v7169_v19, %v6218_v10  ;;  %4373 = vmatprep.subr.bf16.mxu0 %v5572_v21  ;;  %v7541_v5 = vmul.bf16 %v7352_v25, %v7510_v18  ;;  %v2767_v53 = vsel %vm2049_vm0, %v7266_v31, %v2766_v35  ;;  %v2769_v2 = vsel %vm2049_vm0, %v2718_v3, %v2768_v63  ;;  %v3627_v61 = vld [vmem:[#allocation2 + $0x28] sm:$0xff] }
 0x1bf   : > { %v1137_v19 = vrot.slane %v7486_v43, %v6218_v10  ;;  %2810 = vst [vmem:[#allocation2 + $0x120] sm:$0xcc] %v2767_v53  ;;  %2811 = vst [vmem:[#allocation2 + $0x128] sm:$0xcc] %v2769_v2  ;;  %2248 = vrot.lane.b32.xlu1 %v2204_v49, %s5999_s10  ;;  %v3276_v8 = vrot.slane %v3248_v0, 4  ;;  %v2684_v58 = vcombine.low %v7524_v26, %v7524_v26  ;;  %v9096_v47 = vrot.slane %v6822_v28, 4 }
 0x1c0   : > { %2246 = vrot.lane.b32.xlu0 %v9095_v16, %s5999_s10  ;;  %5664 = vmatmul.mubr.msk.bf16.vlgmr.msra.gmra.mrb[4].mxu0 %vm4108_vm7, %v7402_v20  ;;  %v7557_v31 = vpop.permute.xlu1 %1166  ;;  %v2953_v14 = vrot.slane %v2939_v57, %v6218_v10  ;;  %v1886_v9 = vrot.slane %v7541_v5, %v6218_v10  ;;  %v2683_v16 = vrot.slane %v7245_v33, %v6218_v10 }
 0x1c1   : > { %4374 = vmatpush1.bf16.msra.mxu0 %v5571_v23  ;;  %5666 = vmatmul.mubr.msk.bf16.vlgmr.msra.gmra.mrb[4].mxu1 %vm4108_vm7, %v7402_v20  ;;  %v3296_v7 = vsel %vm1203_vm5, %v9096_v47, %v3276_v8  ;;  %v3298_v13 = vsel %vm1203_vm5, %v3276_v8, %v3277_v24  ;;  %v1193_v51 = vrot.slane %v7557_v31, 4  ;;  %v7574_v52 = vpop.permute.xlu0 %2988  ;;  %v3214_v23 = vcombine.low %v7517_v44, %v7517_v44 }
 0x1c2   : > { %4405 = vmatprep.mubr.bf16.mxu0 %v9094_v15  ;;  %4446 = vmatprep.mubr.bf16.mxu1 %v9094_v15  ;;  %v3297_v37 = vsel %vm1467_vm6, %v6822_v28, %v3296_v7  ;;  %v3299_v17 = vsel %vm1467_vm6, %v3248_v0, %v3298_v13  ;;  %v3016_v45 = vrot.slane %v7574_v52, 4  ;;  %v2691_v63 = vrot.slane %v2684_v58, %v6218_v10 }
 0x1c3   : > { %v3643_v3 = vld [vmem:[#allocation2 + $0xa8] sm:$0xff]  ;;  %3340 = vst [vmem:[#allocation2 + $0x1a0] sm:$0xcc] %v3297_v37  ;;  %3341 = vst [vmem:[#allocation2 + $0x1a8] sm:$0xcc] %v3299_v17  ;;  %3002 = vrot.lane.b32.xlu1 %v2953_v14, %s5998_s9  ;;  %v1217_v28 = vsel %vm1203_vm5, %v1192_v11, %v1193_v51  ;;  %v3221_v53 = vrot.slane %v3214_v23, %v6218_v10  ;;  %v3213_v8 = vrot.slane %v7122_v46, %v6218_v10 }
 0x1c4   : > { %1180 = vrot.lane.b32.xlu0 %v1137_v19, %s5998_s9  ;;  %v5573_v4 = vcombine.low %v3627_v61, %v3643_v3  ;;  %v5574_v60 = vcombine.high %v3627_v61, %v3643_v3  ;;  %v1218_v21 = vsel %vm1205_vm2, %v7444_v22, %v1217_v28  ;;  %v7587_v57 = vpop.permute.xlu1 %1915  ;;  %v3037_v35 = vsel %vm1203_vm5, %v3015_v62, %v3016_v45 }
 0x1c5   : > { %1259 = vst [vmem:[#allocation2 + $0x30] sm:$0x33] %v1218_v21  ;;  %v1942_v49 = vrot.slane %v7587_v57, 4  ;;  %v3038_v11 = vsel %vm1205_vm2, %v7461_v6, %v3037_v35  ;;  %v3517_v22 = vpop.permute.xlu0 %3516  ;;  %v1130_v6 = vcombine.high %v7486_v43, %v7486_v43  ;;  %v7625_v7 = vmul.bf16 %v7517_v44, %v7406_v38 }
 0x1c6   : > { %4414 = vmatprep.subr.bf16.mxu1 %v5574_v60  ;;  %3080 = vst [vmem:[#allocation2 + $0x1a8] sm:$0x33] %v3038_v11  ;;  %v3545_v62 = vrot.slane %v3517_v22, 4  ;;  %v3658_v47 = vld [vmem:[#allocation2 + $0x120] sm:$0xff]  ;;  %v1879_v46 = vcombine.high %v7541_v5, %v7541_v5  ;;  %v3469_v5 = vcombine.high %v7274_v12, %v7274_v12  ;;  %v3659_v60 = vld [vmem:[#allocation2 + $0x128] sm:$0xff]  ;;  %v7651_v35 = vmul.bf16 %v7517_v44, %v7510_v18 }
 0x1c7   : > { %4415 = vmatpush1.bf16.msra.mxu1 %v5573_v4  ;;  %2735 = vrot.lane.b32.xlu1 %v2691_v63, %s5996_s24  ;;  %v1964_v2 = vsel %vm1203_vm5, %v1941_v55, %v1942_v49  ;;  %v1144_v17 = vrot.slane %v1130_v6, %v6218_v10  ;;  %v2024_v63 = vld [vmem:[%s6202_s16 + $0x40] sm:$0x3] }
 0x1c8   : > { %1929 = vrot.lane.b32.xlu0 %v1886_v9, %s5997_s26  ;;  %v1965_v0 = vsel %vm981_vm1, %v7472_v34, %v1964_v2  ;;  %v7612_v19 = vpop.permute.xlu1 %3518  ;;  %v3565_v33 = vsel %vm1203_vm5, %v3544_v48, %v3545_v62 }
 0x1c9   : > { %2006 = vst [vmem:[#allocation2 + $0xb0] sm:$0x33] %v1965_v0  ;;  %v3546_v55 = vrot.slane %v7612_v19, 4  ;;  %v3566_v43 = vsel %vm981_vm1, %v7356_v56, %v3565_v33  ;;  %v1430_v58 = vpop.permute.xlu0 %1429  ;;  %v2342_v0 = vld [vmem:[%s6202_s16 + $0x32] sm:$0xff]  ;;  %v3483_v33 = vrot.slane %v3469_v5, %v6218_v10 }
 0x1ca   : > { %v3674_v34 = vld [vmem:[#allocation2 + $0x1a0] sm:$0xff]  ;;  %3609 = vst [vmem:[#allocation2 + $0x220] sm:$0x33] %v3566_v43  ;;  %v1456_v48 = vrot.slane %v1430_v58, 4 }
 0x1cb   : > { %3265 = vrot.lane.b32.xlu1 %v3221_v53, %s6000_s12  ;;  %v5603_v13 = vcombine.low %v3658_v47, %v3674_v34  ;;  %v5604_v14 = vcombine.high %v3658_v47, %v3674_v34  ;;  %v3567_v56 = vsel %vm1203_vm5, %v3545_v62, %v3546_v55  ;;  %v1893_v62 = vrot.slane %v1879_v46, %v6218_v10 }
 0x1cc   : > { %2733 = vrot.lane.b32.xlu0 %v2683_v16, %s5996_s24  ;;  %v3568_v9 = vsel %vm981_vm1, %v3517_v22, %v3567_v56  ;;  %v7634_v37 = vpop.permute.xlu1 %1431  ;;  %v1479_v38 = vsel %vm1203_vm5, %v1455_v50, %v1456_v48  ;;  %v2961_v50 = vrot.slane %v7625_v7, %v6218_v10  ;;  %5559 = vst.sshfl [vmem:[#allocation2 + $0x160] sm:$0xf pattern:$0x76325410] %v2342_v0  ;;  %v9097_v47 = vrot.slane %v6717_v41, 6 }
 0x1cd   : > { %4375 = vmatprep.subr.bf16.mxu0 %v5604_v14  ;;  %3610 = vst [vmem:[#allocation2 + $0x228] sm:$0x33] %v3568_v9  ;;  %v1457_v61 = vrot.slane %v7634_v37, 4  ;;  %v1480_v3 = vsel %vm1467_vm6, %v7392_v59, %v1479_v38  ;;  %v2235_v4 = vpop.permute.xlu0 %2234  ;;  %v3675_v23 = vld [vmem:[#allocation2 + $0x1a8] sm:$0xff]  ;;  %v1406_v9 = vrot.slane %v7352_v25, %v6218_v10 }
 0x1ce   : > { %4376 = vmatpush1.bf16.msra.mxu0 %v5603_v13  ;;  %1521 = vst [vmem:[#allocation2 + $0x30] sm:$0xcc] %v1480_v3  ;;  %v2261_v28 = vrot.slane %v2235_v4, 4  ;;  %v5605_v21 = vcombine.low %v3659_v60, %v3675_v23  ;;  %v5606_v12 = vcombine.high %v3659_v60, %v3675_v23  ;;  %v2082_v34 = vmul.bf16 %v9097_v47, %v2024_v63 }
 0x1cf   : > { %1182 = vrot.lane.b32.xlu1 %v1144_v17, %s5998_s9  ;;  %v1481_v59 = vsel %vm1203_vm5, %v1456_v48, %v1457_v61  ;;  %v2442_v23 = vcombine.high %v2342_v0, %v2342_v0 }
 0x1d0   : > { %3263 = vrot.lane.b32.xlu0 %v3213_v8, %s6000_s12  ;;  %v1482_v11 = vsel %vm1467_vm6, %v1430_v58, %v1481_v59  ;;  %v7658_v22 = vpop.permute.xlu1 %2236  ;;  %v2284_v16 = vsel %vm1203_vm5, %v2260_v54, %v2261_v28  ;;  %4416 = vmatprep.subr.bf16.mxu1 %v5606_v12  ;;  %v5808_v58 = vld [vmem:[%s6202_s16 + $0x40] ss:$0 sps:$4 sm:$0x33]  }
 0x1d1   : > { %1522 = vst [vmem:[#allocation2 + $0x38] sm:$0xcc] %v1482_v11  ;;  %v2262_v18 = vrot.slane %v7658_v22, 4  ;;  %v2285_v53 = vsel %vm2272_vm4, %v7432_v27, %v2284_v16  ;;  %4417 = vmatpush1.bf16.msra.mxu1 %v5605_v21  ;;  %v7668_v2 = vpop.permute.xlu0 %1168  ;;  %v3690_v6 = vld [vmem:[#allocation2 + $0x220] sm:$0x33]  ;;  %v3491_v27 = vrot.slane %v7651_v35, %v6218_v10  ;;  %v1414_v25 = vrot.slane %v5808_v58, %v6218_v10 }
 0x1d2   : > { %2326 = vst [vmem:[#allocation2 + $0xb0] sm:$0xcc] %v2285_v53  ;;  %v1194_v54 = vrot.slane %v7668_v2, 4  ;;  %v5636_v8 = vcombine.high %v3690_v6, %v3690_v6  ;;  %v5635_v43 = vcombine.low %v3690_v6, %v3690_v6  ;;  %v2512_v21 = vld [vmem:[%s6202_s16 + $0x42] sm:$0x3] }
 0x1d3   : > { %1931 = vrot.lane.b32.xlu1 %v1893_v62, %s5997_s26  ;;  %v2286_v48 = vsel %vm1203_vm5, %v2261_v28, %v2262_v18  ;;  %v2212_v28 = vcombine.low %v2082_v34, %v2082_v34  ;;  %5560 = vst.sshfl [vmem:[#allocation2 + $0x168] sm:$0xf pattern:$0x76325410] %v2442_v23 }
 0x1d4   : > { %3004 = vrot.lane.b32.xlu0 %v2961_v50, %s5998_s9  ;;  %v2287_v13 = vsel %vm2272_vm4, %v2235_v4, %v2286_v48  ;;  %v7683_v14 = vpop.permute.xlu1 %2990  ;;  %v1219_v46 = vsel %vm1203_vm5, %v1193_v51, %v1194_v54  ;;  %5667 = vmatprep.subr.msk.bf16.mxu0 %vm983_vm3, %v5636_v8  ;;  %v3691_v41 = vld [vmem:[#allocation2 + $0x228] sm:$0x33]  ;;  %v4138_v56 = vsel %vm983_vm3, %v5635_v43, 0  ;;  %v788_v4 = vld [vmem:[%s6202_s16 + $0x40] sm:$0x3]  ;;  %v2569_v8 = vmul.bf16 %v2536_v42, %v2512_v21 }
 0x1d5   : > { %2327 = vst [vmem:[#allocation2 + $0xb8] sm:$0xcc] %v2287_v13  ;;  %v3017_v38 = vrot.slane %v7683_v14, 4  ;;  %v1220_v17 = vsel %vm1205_vm2, %v7557_v31, %v1219_v46  ;;  %v5638_v5 = vcombine.high %v3691_v41, %v3691_v41  ;;  %4378 = vmatpush1.bf16.msra.mxu0 %v4138_v56  ;;  %v5637_v51 = vcombine.low %v3691_v41, %v3691_v41  ;;  %v7698_v3 = vpop.permute.xlu0 %1917  ;;  %v3628_v62 = vld [vmem:[#allocation2 + $0x30] sm:$0xff] }
 0x1d6   : > { %1260 = vst [vmem:[#allocation2 + $0x38] sm:$0x33] %v1220_v17  ;;  %v1943_v60 = vrot.slane %v7698_v3, 4  ;;  %v1015_v11 = vmul.bf16 %v7333_v29, %v788_v4  ;;  %v2219_v34 = vrot.slane %v2212_v28, %v6218_v10  ;;  %v2699_v46 = vcombine.low %v2569_v8, %v2569_v8  ;;  %v5809_v21 = vld [vmem:[%s6202_s16 + $0x42] ss:$0 sps:$4 sm:$0x33]  }
 0x1d7   : > { %3534 = vrot.lane.b32.xlu1 %v3491_v27, %s5997_s26  ;;  %v3039_v31 = vsel %vm1203_vm5, %v3016_v45, %v3017_v38  ;;  %5669 = vmatprep.subr.msk.bf16.mxu1 %vm983_vm3, %v5638_v5  ;;  %v4144_v50 = vsel %vm983_vm3, %v5637_v51, 0  ;;  %v2211_v45 = vrot.slane %v7379_v30, %v6218_v10 }
 0x1d8   : > { %3532 = vrot.lane.b32.xlu0 %v3483_v33, %s5997_s26  ;;  %v3040_v12 = vsel %vm1205_vm2, %v7574_v52, %v3039_v31  ;;  %v7714_v59 = vpop.permute.xlu1 %2723  ;;  %4419 = vmatpush1.bf16.msra.mxu1 %v4144_v50  ;;  %v1966_v63 = vsel %vm1203_vm5, %v1942_v49, %v1943_v60  ;;  %v2954_v33 = vcombine.high %v7625_v7, %v7625_v7 }
 0x1d9   : > { %3081 = vst [vmem:[#allocation2 + $0x1b0] sm:$0x33] %v3040_v12  ;;  %v1967_v52 = vsel %vm981_vm1, %v7587_v57, %v1966_v63  ;;  %v2722_v16 = vpop.permute.xlu0 %2721  ;;  %v3644_v53 = vld [vmem:[#allocation2 + $0xb0] sm:$0xff]  ;;  %5668 = vmatmul.mubr.msk.bf16.vlgmr.msra.gmra.mrb[8].mxu0 %vm4108_vm7, %v7402_v20  ;;  %v2749_v49 = vrot.slane %v7714_v59, 4  ;;  %v1539_v57 = vld [vmem:[%s6202_s16 + $0x40] sm:$0x3]  ;;  %v1151_v13 = vrot.slane %v1015_v11, %v6218_v10  ;;  %v2706_v11 = vrot.slane %v2699_v46, %v6218_v10 }
 0x1da   : > { %2007 = vst [vmem:[#allocation2 + $0xb8] sm:$0x33] %v1967_v52  ;;  %v2748_v6 = vrot.slane %v2722_v16, 4  ;;  %v5575_v30 = vcombine.low %v3628_v62, %v3644_v53  ;;  %v5576_v0 = vcombine.high %v3628_v62, %v3644_v53  ;;  %4487 = vmatprep.mubr.bf16.mxu0 %v9094_v15  ;;  %v3360_v52 = vld [vmem:[%s6202_s16 + $0x42] sm:$0x3]  ;;  %v2698_v53 = vrot.slane %v7524_v26, %v6218_v10 }
 0x1db   : > { %1447 = vrot.lane.b32.xlu1 %v1414_v25, %s6000_s12  ;;  %5670 = vmatmul.mubr.msk.bf16.vlgmr.msra.gmra.mrb[8].mxu1 %vm4108_vm7, %v7402_v20  ;;  %v2830_v62 = vld [vmem:[%s6202_s16 + $0x42] sm:$0x3] }
 0x1dc   : > { %1445 = vrot.lane.b32.xlu0 %v1406_v9, %s6000_s12  ;;  %v7739_v43 = vpop.permute.xlu1 %3253  ;;  %v2770_v58 = vsel %vm1203_vm5, %v2747_v39, %v2748_v6  ;;  %v2772_v47 = vsel %vm1203_vm5, %v2748_v6, %v2749_v49  ;;  %4455 = vmatprep.subr.bf16.mxu0 %v5576_v0  ;;  %v1764_v39 = vmul.bf16 %v7373_v1, %v1539_v57 }
 0x1dd   : > { %v3279_v32 = vrot.slane %v7739_v43, 4  ;;  %v2771_v42 = vsel %vm2049_vm0, %v7498_v36, %v2770_v58  ;;  %v2773_v7 = vsel %vm2049_vm0, %v2722_v16, %v2772_v47  ;;  %4456 = vmatpush1.bf16.msra.mxu0 %v5575_v30  ;;  %v3252_v27 = vpop.permute.xlu0 %3251  ;;  %4528 = vmatprep.mubr.bf16.mxu1 %v9094_v15  ;;  %v2968_v9 = vrot.slane %v2954_v33, %v6218_v10  ;;  %v3629_v25 = vld [vmem:[#allocation2 + $0x38] sm:$0xff] }
 0x1de   : > { %2812 = vst [vmem:[#allocation2 + $0x130] sm:$0xcc] %v2771_v42  ;;  %2813 = vst [vmem:[#allocation2 + $0x138] sm:$0xcc] %v2773_v7  ;;  %v3278_v48 = vrot.slane %v3252_v27, 4  ;;  %v1900_v31 = vrot.slane %v1764_v39, %v6218_v10  ;;  %v3236_v6 = vrot.slane %v5809_v21, %v6218_v10  ;;  %v3228_v57 = vrot.slane %v7517_v44, %v6218_v10 }
 0x1df   : > { %2252 = vrot.lane.b32.xlu1 %v2219_v34, %s5999_s10  ;;  %v2839_v8 = vmul.bf16 %v2830_v62, %v7333_v29  ;;  %v2343_v29 = vld [vmem:[%s6202_s16 + $0x3a] sm:$0xff] }
 0x1e0   : > { %2250 = vrot.lane.b32.xlu0 %v2211_v45, %s5999_s10  ;;  %v7757_v41 = vpop.permute.xlu1 %1170  ;;  %v3300_v36 = vsel %vm1203_vm5, %v3277_v24, %v3278_v48  ;;  %v3302_v56 = vsel %vm1203_vm5, %v3278_v48, %v3279_v32  ;;  %5561 = vst.sshfl [vmem:[#allocation2 + $0x170] sm:$0xf pattern:$0x76325410] %v2343_v29  ;;  %v3484_v48 = vcombine.high %v7651_v35, %v7651_v35 }
 0x1e1   : > { %v1195_v17 = vrot.slane %v7757_v41, 4  ;;  %v3301_v5 = vsel %vm1467_vm6, %v7526_v40, %v3300_v36  ;;  %v3303_v51 = vsel %vm1467_vm6, %v3252_v27, %v3302_v56  ;;  %v7771_v4 = vpop.permute.xlu0 %2992  ;;  %v3645_v24 = vld [vmem:[#allocation2 + $0xb8] sm:$0xff]  ;;  %v2975_v56 = vrot.slane %v2839_v8, %v6218_v10 }
 0x1e2   : > { %3342 = vst [vmem:[#allocation2 + $0x1b0] sm:$0xcc] %v3301_v5  ;;  %3343 = vst [vmem:[#allocation2 + $0x1b8] sm:$0xcc] %v3303_v51  ;;  %v3018_v23 = vrot.slane %v7771_v4, 4  ;;  %v5577_v50 = vcombine.low %v3629_v25, %v3645_v24  ;;  %v5578_v28 = vcombine.high %v3629_v25, %v3645_v24  ;;  %v2457_v24 = vcombine.high %v2343_v29, %v2343_v29 }
 0x1e3   : > { %3006 = vrot.lane.b32.xlu1 %v2968_v9, %s5998_s9  ;;  %v1221_v40 = vsel %vm1203_vm5, %v1194_v54, %v1195_v17 }
 0x1e4   : > { %1184 = vrot.lane.b32.xlu0 %v1151_v13, %s5998_s9  ;;  %v1222_v12 = vsel %vm1205_vm2, %v7668_v2, %v1221_v40  ;;  %v7784_v63 = vpop.permute.xlu1 %1919  ;;  %v3041_v45 = vsel %vm1203_vm5, %v3017_v38, %v3018_v23  ;;  %4496 = vmatprep.subr.bf16.mxu1 %v5578_v28  ;;  %5562 = vst.sshfl [vmem:[#allocation2 + $0x178] sm:$0xf pattern:$0x76325410] %v2457_v24 }
 0x1e5   : > { %1261 = vst [vmem:[#allocation2 + $0x40] sm:$0x33] %v1222_v12  ;;  %v1944_v54 = vrot.slane %v7784_v63, 4  ;;  %v3042_v2 = vsel %vm1205_vm2, %v7683_v14, %v3041_v45  ;;  %4497 = vmatpush1.bf16.msra.mxu1 %v5577_v50  ;;  %v3521_v16 = vpop.permute.xlu0 %3520  ;;  %v3369_v14 = vmul.bf16 %v3360_v52, %v7373_v1  ;;  %v3660_v58 = vld [vmem:[#allocation2 + $0x130] sm:$0xff] }
 0x1e6   : > { %3082 = vst [vmem:[#allocation2 + $0x1b8] sm:$0x33] %v3042_v2  ;;  %v3547_v38 = vrot.slane %v3521_v16, 4 }
 0x1e7   : > { %2739 = vrot.lane.b32.xlu1 %v2706_v11, %s5996_s24  ;;  %v1968_v30 = vsel %vm1203_vm5, %v1943_v60, %v1944_v54  ;;  %v3505_v39 = vrot.slane %v3369_v14, %v6218_v10  ;;  %v3498_v11 = vrot.slane %v3484_v48, %v6218_v10 }
 0x1e8   : > { %1933 = vrot.lane.b32.xlu0 %v1900_v31, %s5997_s26  ;;  %v1969_v0 = vsel %vm981_vm1, %v7698_v3, %v1968_v30  ;;  %v7810_v33 = vpop.permute.xlu1 %3522  ;;  %v3569_v26 = vsel %vm1203_vm5, %v3546_v55, %v3547_v38 }
 0x1e9   : > { %2008 = vst [vmem:[#allocation2 + $0xc0] sm:$0x33] %v1969_v0  ;;  %v3548_v1 = vrot.slane %v7810_v33, 4  ;;  %v3570_v3 = vsel %vm981_vm1, %v7612_v19, %v3569_v26  ;;  %v1434_v60 = vpop.permute.xlu0 %1433  ;;  %v3676_v47 = vld [vmem:[#allocation2 + $0x1b0] sm:$0xff]  ;;  %v3702_v26 = vld [vmem:[%s9035_s2] sm:$0xff] }
 0x1ea   : > { %3611 = vst [vmem:[#allocation2 + $0x230] sm:$0x33] %v3570_v3  ;;  %v1458_v55 = vrot.slane %v1434_v60, 4  ;;  %v5607_v34 = vcombine.low %v3660_v58, %v3676_v47  ;;  %v5608_v42 = vcombine.high %v3660_v58, %v3676_v47 }
 0x1eb   : > { %3269 = vrot.lane.b32.xlu1 %v3236_v6, %s6000_s12  ;;  %v3571_v44 = vsel %vm1203_vm5, %v3547_v38, %v3548_v1 }
 0x1ec   : > { %2737 = vrot.lane.b32.xlu0 %v2698_v53, %s5996_s24  ;;  %v3572_v7 = vsel %vm981_vm1, %v3521_v16, %v3571_v44  ;;  %v7828_v27 = vpop.permute.xlu1 %1435  ;;  %v1483_v19 = vsel %vm1203_vm5, %v1457_v61, %v1458_v55  ;;  %4457 = vmatprep.subr.bf16.mxu0 %v5608_v42  ;;  %v3661_v61 = vld [vmem:[#allocation2 + $0x138] sm:$0xff] }
 0x1ed   : > { %3612 = vst [vmem:[#allocation2 + $0x238] sm:$0x33] %v3572_v7  ;;  %v1459_v13 = vrot.slane %v7828_v27, 4  ;;  %v1484_v46 = vsel %vm1467_vm6, %v7634_v37, %v1483_v19  ;;  %4458 = vmatpush1.bf16.msra.mxu0 %v5607_v34  ;;  %v2239_v36 = vpop.permute.xlu0 %2238  ;;  %v3677_v9 = vld [vmem:[#allocation2 + $0x1b8] sm:$0xff] }
 0x1ee   : > { %1523 = vst [vmem:[#allocation2 + $0x40] sm:$0xcc] %v1484_v46  ;;  %v2263_v5 = vrot.slane %v2239_v36, 4  ;;  %v5609_v51 = vcombine.low %v3661_v61, %v3677_v9  ;;  %v5610_v25 = vcombine.high %v3661_v61, %v3677_v9 }
 0x1ef   : > { %3538 = vrot.lane.b32.xlu1 %v3505_v39, %s5997_s26  ;;  %v1485_v35 = vsel %vm1203_vm5, %v1458_v55, %v1459_v13 }
 0x1f0   : > { %3267 = vrot.lane.b32.xlu0 %v3228_v57, %s6000_s12  ;;  %v1486_v31 = vsel %vm1467_vm6, %v1434_v60, %v1485_v35  ;;  %v7846_v37 = vpop.permute.xlu1 %2240  ;;  %v2288_v50 = vsel %vm1203_vm5, %v2262_v18, %v2263_v5  ;;  %4498 = vmatprep.subr.bf16.mxu1 %v5610_v25  ;;  %s5696_s12 = sshll.u32 %s6054_s22, 12 }
 0x1f1   : > { %1524 = vst [vmem:[#allocation2 + $0x48] sm:$0xcc] %v1486_v31  ;;  %v2264_v28 = vrot.slane %v7846_v37, 4  ;;  %v2289_v21 = vsel %vm2272_vm4, %v7658_v22, %v2288_v50  ;;  %4499 = vmatpush1.bf16.msra.mxu1 %v5609_v51  ;;  %v7855_v40 = vpop.permute.xlu0 %1172  ;;  %v3692_v12 = vld [vmem:[#allocation2 + $0x230] sm:$0x33]  ;;  %s8981_s30 = scalar_lea.hbm %s9038_s5, %s5696_s12 }
 0x1f2   : > { %2328 = vst [vmem:[#allocation2 + $0xc0] sm:$0xcc] %v2289_v21  ;;  %v1196_v45 = vrot.slane %v7855_v40, 4  ;;  %v5640_v18 = vcombine.high %v3692_v12, %v3692_v12  ;;  %v5639_v52 = vcombine.low %v3692_v12, %v3692_v12 }
 0x1f3   : > { %v2290_v2 = vsel %vm1203_vm5, %v2263_v5, %v2264_v28 }
 0x1f4   : > { %3008 = vrot.lane.b32.xlu0 %v2975_v56, %s5998_s9  ;;  %v2291_v16 = vsel %vm2272_vm4, %v2239_v36, %v2290_v2  ;;  %v7863_v62 = vpop.permute.xlu1 %2994  ;;  %v1223_v22 = vsel %vm1203_vm5, %v1195_v17, %v1196_v45  ;;  %5671 = vmatprep.subr.msk.bf16.mxu0 %vm983_vm3, %v5640_v18  ;;  %v3693_v10 = vld [vmem:[#allocation2 + $0x238] sm:$0x33]  ;;  %v4150_v53 = vsel %vm983_vm3, %v5639_v52, 0  ;;  %s5450_s9 = sshll.u32 %s6198_s28, 8 }
 0x1f5   : > { %2329 = vst [vmem:[#allocation2 + $0xc8] sm:$0xcc] %v2291_v16  ;;  %v3019_v38 = vrot.slane %v7863_v62, 4  ;;  %v1224_v6 = vsel %vm1205_vm2, %v7757_v41, %v1223_v22  ;;  %v5642_v30 = vcombine.high %v3693_v10, %v3693_v10  ;;  %4460 = vmatpush1.bf16.msra.mxu0 %v4150_v53  ;;  %v5641_v14 = vcombine.low %v3693_v10, %v3693_v10  ;;  %v7876_v0 = vpop.permute.xlu0 %1921  ;;  %v3630_v47 = vld [vmem:[#allocation2 + $0x40] sm:$0xff]  ;;  %s8934_s10 = scalar_lea.vmem [#allocation9], %s5450_s9 }
 0x1f6   : > { %1262 = vst [vmem:[#allocation2 + $0x48] sm:$0x33] %v1224_v6  ;;  %v1945_v17 = vrot.slane %v7876_v0, 4  ;;  %s5352_s13 = sshll.u32 %s8934_s10, 4  ;;  %s8983_s13 = int_to_ptr.vmem [resolvable:$true] %s5352_s13 }
 0x1f7   : > { %v3043_v57 = vsel %vm1203_vm5, %v3018_v23, %v3019_v38  ;;  %5673 = vmatprep.subr.msk.bf16.mxu1 %vm983_vm3, %v5642_v30  ;;  %v4156_v41 = vsel %vm983_vm3, %v5641_v14, 0  ;;  %s5919_s27 = scalar_lea.vmem %s8983_s13, 4096 }
 0x1f8   : > { %3536 = vrot.lane.b32.xlu0 %v3498_v11, %s5997_s26  ;;  %v3044_v8 = vsel %vm1205_vm2, %v7771_v4, %v3043_v57  ;;  %v7889_v3 = vpop.permute.xlu1 %2727  ;;  %4501 = vmatpush1.bf16.msra.mxu1 %v4156_v41  ;;  %v1970_v60 = vsel %vm1203_vm5, %v1944_v54, %v1945_v17  ;;  %p5920_p2 = scmp.ne.s32.totalorder %s8983_s13, %s5919_s27 }
 0x1f9   : > { %5672 = vmatmul.mubr.msk.bf16.vlgmr.msra.gmra.mrb[12].mxu0 %vm4108_vm7, %v7402_v20  ;;  %3083 = vst [vmem:[#allocation2 + $0x1c0] sm:$0x33] %v3044_v8  ;;  %v1971_v23 = vsel %vm981_vm1, %v7784_v63, %v1970_v60  ;;  %v2726_v58 = vpop.permute.xlu0 %2725  ;;  %v3646_v55 = vld [vmem:[#allocation2 + $0xc0] sm:$0xff]  ;;  %v2751_v4 = vrot.slane %v7889_v3, 4 }
 0x1fa   : > { %4569 = vmatprep.mubr.bf16.mxu0 %v9094_v15  ;;  %2009 = vst [vmem:[#allocation2 + $0xc8] sm:$0x33] %v1971_v23  ;;  %v2750_v34 = vrot.slane %v2726_v58, 4  ;;  %v5579_v42 = vcombine.low %v3630_v47, %v3646_v55  ;;  %v5580_v44 = vcombine.high %v3630_v47, %v3646_v55  ;;  %p5921_p1 = pnand %p5920_p2, %p6152_p6 }
 0x1fb   : > { %5674 = vmatmul.mubr.msk.bf16.vlgmr.msra.gmra.mrb[12].mxu1 %vm4108_vm7, %v7402_v20 }
 0x1fc   : > { %3705 = vperm.xlu0 %5781, %v3702_v26   ;;  %v7904_v54 = vpop.permute.xlu1 %3257  ;;  %v2774_v63 = vsel %vm1203_vm5, %v2749_v49, %v2750_v34  ;;  %v2776_v29 = vsel %vm1203_vm5, %v2750_v34, %v2751_v4  ;;  %4537 = vmatprep.subr.bf16.mxu0 %v5580_v44  ;;  %p5922_p4 = pneg %p5921_p1 }
 0x1fd   : > { %4610 = vmatprep.mubr.bf16.mxu1 %v9094_v15  ;;  %v3281_v7 = vrot.slane %v7904_v54, 4  ;;  %v2775_v19 = vsel %vm2049_vm0, %v7714_v59, %v2774_v63  ;;  %v2777_v20 = vsel %vm2049_vm0, %v2726_v58, %v2776_v29  ;;  %4538 = vmatpush1.bf16.msra.mxu0 %v5579_v42  ;;  %v3256_v39 = vpop.permute.xlu0 %3255  ;;  %v3631_v5 = vld [vmem:[#allocation2 + $0x48] sm:$0xff] }
 0x1fe   : > { %2814 = vst [vmem:[#allocation2 + $0x140] sm:$0xcc] %v2775_v19  ;;  %2815 = vst [vmem:[#allocation2 + $0x148] sm:$0xcc] %v2777_v20  ;;  %v3280_v48 = vrot.slane %v3256_v39, 4 }
 0x200   : > { %v7917_v49 = vpop.permute.xlu1 %1174  ;;  %v3304_v46 = vsel %vm1203_vm5, %v3279_v32, %v3280_v48  ;;  %v3306_v36 = vsel %vm1203_vm5, %v3280_v48, %v3281_v7 }
 0x201   : > { %v1197_v56 = vrot.slane %v7917_v49, 4  ;;  %v3305_v59 = vsel %vm1467_vm6, %v7739_v43, %v3304_v46  ;;  %v3307_v61 = vsel %vm1467_vm6, %v3256_v39, %v3306_v36  ;;  %v7929_v9 = vpop.permute.xlu0 %2996  ;;  %v3647_v51 = vld [vmem:[#allocation2 + $0xc8] sm:$0xff] }
 0x202   : > { %3344 = vst [vmem:[#allocation2 + $0x1c0] sm:$0xcc] %v3305_v59  ;;  %3345 = vst [vmem:[#allocation2 + $0x1c8] sm:$0xcc] %v3307_v61  ;;  %v3020_v25 = vrot.slane %v7929_v9, 4  ;;  %v5581_v32 = vcombine.low %v3631_v5, %v3647_v51  ;;  %v5582_v24 = vcombine.high %v3631_v5, %v3647_v51 }
 0x203   : > { %v1225_v35 = vsel %vm1203_vm5, %v1196_v45, %v1197_v56 }
 0x204   : > { %v1226_v43 = vsel %vm1205_vm2, %v7855_v40, %v1225_v35  ;;  %v7939_v31 = vpop.permute.xlu1 %1923  ;;  %v3045_v50 = vsel %vm1203_vm5, %v3019_v38, %v3020_v25  ;;  %4578 = vmatprep.subr.bf16.mxu1 %v5582_v24 }
 0x205   : > { %1263 = vst [vmem:[#allocation2 + $0x50] sm:$0x33] %v1226_v43  ;;  %v1946_v21 = vrot.slane %v7939_v31, 4  ;;  %v3046_v12 = vsel %vm1205_vm2, %v7863_v62, %v3045_v50  ;;  %4579 = vmatpush1.bf16.msra.mxu1 %v5581_v32  ;;  %v3525_v11 = vpop.permute.xlu0 %3524  ;;  %v3662_v10 = vld [vmem:[#allocation2 + $0x140] sm:$0xff]  ;;  %v3663_v41 = vld [vmem:[#allocation2 + $0x148] sm:$0xff] }
 0x206   : > { %3084 = vst [vmem:[#allocation2 + $0x1c8] sm:$0x33] %v3046_v12  ;;  %v3549_v45 = vrot.slane %v3525_v11, 4  ;;  %v8023_v12 = vld [vmem:[%s9034_s1] sm:$0xf] }
 0x207   : > { %v1972_v40 = vsel %vm1203_vm5, %v1945_v17, %v1946_v21 }
 0x208   : > { %v1973_v18 = vsel %vm981_vm1, %v7876_v0, %v1972_v40  ;;  %v7954_v52 = vpop.permute.xlu1 %3526  ;;  %v3573_v2 = vsel %vm1203_vm5, %v3548_v1, %v3549_v45 }
 0x209   : > { %2010 = vst [vmem:[#allocation2 + $0xd0] sm:$0x33] %v1973_v18  ;;  %v3550_v16 = vrot.slane %v7954_v52, 4  ;;  %v3574_v62 = vsel %vm981_vm1, %v7810_v33, %v3573_v2  ;;  %v1438_v22 = vpop.permute.xlu0 %1437  ;;  %v3678_v53 = vld [vmem:[#allocation2 + $0x1c0] sm:$0xff] }
 0x20a   : > { %3613 = vst [vmem:[#allocation2 + $0x240] sm:$0x33] %v3574_v62  ;;  %v1460_v38 = vrot.slane %v1438_v22, 4  ;;  %v5611_v6 = vcombine.low %v3662_v10, %v3678_v53  ;;  %v5612_v30 = vcombine.high %v3662_v10, %v3678_v53 }
 0x20b   : > { %v3575_v14 = vsel %vm1203_vm5, %v3549_v45, %v3550_v16 }
 0x20c   : > { %v3576_v0 = vsel %vm981_vm1, %v3525_v11, %v3575_v14  ;;  %v7966_v1 = vpop.permute.xlu1 %1439  ;;  %v1487_v17 = vsel %vm1203_vm5, %v1459_v13, %v1460_v38  ;;  %4539 = vmatprep.subr.bf16.mxu0 %v5612_v30 }
 0x20d   : > { %3614 = vst [vmem:[#allocation2 + $0x248] sm:$0x33] %v3576_v0  ;;  %v1461_v33 = vrot.slane %v7966_v1, 4  ;;  %v1488_v26 = vsel %vm1467_vm6, %v7828_v27, %v1487_v17  ;;  %4540 = vmatpush1.bf16.msra.mxu0 %v5611_v6  ;;  %v2243_v57 = vpop.permute.xlu0 %2242  ;;  %v3679_v8 = vld [vmem:[#allocation2 + $0x1c8] sm:$0xff] }
 0x20e   : > { %1525 = vst [vmem:[#allocation2 + $0x50] sm:$0xcc] %v1488_v26  ;;  %v2265_v60 = vrot.slane %v2243_v57, 4  ;;  %v5613_v23 = vcombine.low %v3663_v41, %v3679_v8  ;;  %v5614_v58 = vcombine.high %v3663_v41, %v3679_v8 }
 0x20f   : > { %v1489_v47 = vsel %vm1203_vm5, %v1460_v38, %v1461_v33 }
 0x210   : > { %v1490_v13 = vsel %vm1467_vm6, %v1438_v22, %v1489_v47  ;;  %v7978_v55 = vpop.permute.xlu1 %2244  ;;  %v2292_v27 = vsel %vm1203_vm5, %v2264_v28, %v2265_v60  ;;  %4580 = vmatprep.subr.bf16.mxu1 %v5614_v58 }
 0x211   : > { %1526 = vst [vmem:[#allocation2 + $0x58] sm:$0xcc] %v1490_v13  ;;  %v2266_v34 = vrot.slane %v7978_v55, 4  ;;  %v2293_v42 = vsel %vm2272_vm4, %v7846_v37, %v2292_v27  ;;  %4581 = vmatpush1.bf16.msra.mxu1 %v5613_v23  ;;  %v7986_v44 = vpop.permute.xlu0 %1176  ;;  %v3694_v63 = vld [vmem:[#allocation2 + $0x240] sm:$0x33] }
 0x212   : > { %2330 = vst [vmem:[#allocation2 + $0xd0] sm:$0xcc] %v2293_v42  ;;  %v1198_v29 = vrot.slane %v7986_v44, 4  ;;  %v5644_v19 = vcombine.high %v3694_v63, %v3694_v63  ;;  %v5643_v20 = vcombine.low %v3694_v63, %v3694_v63 }
 0x213   : > { %v2294_v28 = vsel %vm1203_vm5, %v2265_v60, %v2266_v34 }
 0x214   : > { %v2295_v39 = vsel %vm2272_vm4, %v2243_v57, %v2294_v28  ;;  %v7993_v48 = vpop.permute.xlu1 %2998  ;;  %v1227_v37 = vsel %vm1203_vm5, %v1197_v56, %v1198_v29  ;;  %5675 = vmatprep.subr.msk.bf16.mxu0 %vm983_vm3, %v5644_v19  ;;  %v3695_v46 = vld [vmem:[#allocation2 + $0x248] sm:$0x33]  ;;  %v4162_v36 = vsel %vm983_vm3, %v5643_v20, 0 }
 0x215   : > { %2331 = vst [vmem:[#allocation2 + $0xd8] sm:$0xcc] %v2295_v39  ;;  %v3021_v59 = vrot.slane %v7993_v48, 4  ;;  %v1228_v61 = vsel %vm1205_vm2, %v7917_v49, %v1227_v37  ;;  %v5646_v5 = vcombine.high %v3695_v46, %v3695_v46  ;;  %4542 = vmatpush1.bf16.msra.mxu0 %v4162_v36  ;;  %v5645_v51 = vcombine.low %v3695_v46, %v3695_v46  ;;  %v8005_v32 = vpop.permute.xlu0 %1925  ;;  %v3632_v11 = vld [vmem:[#allocation2 + $0x50] sm:$0xff] }
 0x216   : > { %1264 = vst [vmem:[#allocation2 + $0x58] sm:$0x33] %v1228_v61  ;;  %v1947_v24 = vrot.slane %v8005_v32, 4 }
 0x217   : > { %v3047_v56 = vsel %vm1203_vm5, %v3020_v25, %v3021_v59  ;;  %5677 = vmatprep.subr.msk.bf16.mxu1 %vm983_vm3, %v5646_v5  ;;  %v4168_v35 = vsel %vm983_vm3, %v5645_v51, 0 }
 0x218   : > { %v3048_v43 = vsel %vm1205_vm2, %v7929_v9, %v3047_v56  ;;  %v8015_v49 = vpop.permute.xlu1 %2731  ;;  %4583 = vmatpush1.bf16.msra.mxu1 %v4168_v35  ;;  %v1974_v50 = vsel %vm1203_vm5, %v1946_v21, %v1947_v24  ;;  %5676 = vmatmul.mubr.msk.bf16.vlgmr.msra.gmra.mrb[16].mxu0 %vm4108_vm7, %v8023_v12 }
 0x219   : > { %3085 = vst [vmem:[#allocation2 + $0x1d0] sm:$0x33] %v3048_v43  ;;  %v1975_v25 = vsel %vm981_vm1, %v7939_v31, %v1974_v50  ;;  %v2730_v9 = vpop.permute.xlu0 %2729  ;;  %v3648_v45 = vld [vmem:[#allocation2 + $0xd0] sm:$0xff]  ;;  %4651 = vmatprep.mubr.bf16.mxu0 %v9094_v15  ;;  %v2753_v40 = vrot.slane %v8015_v49, 4 }
 0x21a   : > { %2011 = vst [vmem:[#allocation2 + $0xd8] sm:$0x33] %v1975_v25  ;;  %v2752_v21 = vrot.slane %v2730_v9, 4  ;;  %v5583_v18 = vcombine.low %v3632_v11, %v3648_v45  ;;  %v5584_v2 = vcombine.high %v3632_v11, %v3648_v45 }
 0x21b   : > { %5678 = vmatmul.mubr.msk.bf16.vlgmr.msra.gmra.mrb[16].mxu1 %vm4108_vm7, %v8023_v12 }
 0x21c   : > { %v2778_v31 = vsel %vm1203_vm5, %v2751_v4, %v2752_v21  ;;  %v2780_v22 = vsel %vm1203_vm5, %v2752_v21, %v2753_v40  ;;  %4619 = vmatprep.subr.bf16.mxu0 %v5584_v2  ;;  %4692 = vmatprep.mubr.bf16.mxu1 %v9094_v15 }
 0x21d   : > { %v8033_v62 = vpop.permute.xlu1 %3261  ;;  %v2779_v53 = vsel %vm2049_vm0, %v7889_v3, %v2778_v31  ;;  %v2781_v38 = vsel %vm2049_vm0, %v2730_v9, %v2780_v22  ;;  %4620 = vmatpush1.bf16.msra.mxu0 %v5583_v18  ;;  %v3633_v41 = vld [vmem:[#allocation2 + $0x58] sm:$0xff] }
 0x21e   : > { %v3283_v10 = vrot.slane %v8033_v62, 4  ;;  %v3260_v6 = vpop.permute.xlu0 %3259  ;;  %2816 = vst [vmem:[#allocation2 + $0x150] sm:$0xcc] %v2779_v53  ;;  %2817 = vst [vmem:[#allocation2 + $0x158] sm:$0xcc] %v2781_v38 }
 0x21f   : > { %v3282_v30 = vrot.slane %v3260_v6, 4 }
 0x221   : > { %v8046_v4 = vpop.permute.xlu1 %1178  ;;  %v3308_v14 = vsel %vm1203_vm5, %v3281_v7, %v3282_v30  ;;  %v3310_v0 = vsel %vm1203_vm5, %v3282_v30, %v3283_v10  ;;  %v3649_v8 = vld [vmem:[#allocation2 + $0xd8] sm:$0xff] }
 0x222   : > { %v1199_v17 = vrot.slane %v8046_v4, 4  ;;  %v3309_v3 = vsel %vm1467_vm6, %v7904_v54, %v3308_v14  ;;  %v3311_v26 = vsel %vm1467_vm6, %v3260_v6, %v3310_v0  ;;  %v8058_v57 = vpop.permute.xlu0 %3000  ;;  %v5585_v7 = vcombine.low %v3633_v41, %v3649_v8 }
 0x223   : > { %3346 = vst [vmem:[#allocation2 + $0x1d0] sm:$0xcc] %v3309_v3  ;;  %3347 = vst [vmem:[#allocation2 + $0x1d8] sm:$0xcc] %v3311_v26  ;;  %v3022_v60 = vrot.slane %v8058_v57, 4  ;;  %v5586_v23 = vcombine.high %v3633_v41, %v3649_v8 }
 0x224   : > { %v1229_v58 = vsel %vm1203_vm5, %v1198_v29, %v1199_v17 }
 0x225   : > { %v1230_v54 = vsel %vm1205_vm2, %v7986_v44, %v1229_v58  ;;  %v8068_v47 = vpop.permute.xlu1 %1927  ;;  %v3049_v13 = vsel %vm1203_vm5, %v3021_v59, %v3022_v60  ;;  %4660 = vmatprep.subr.bf16.mxu1 %v5586_v23  ;;  %v3665_v56 = vld [vmem:[#allocation2 + $0x158] sm:$0xff] }
 0x226   : > { %1265 = vst [vmem:[#allocation2 + $0x60] sm:$0x33] %v1230_v54  ;;  %v1948_v27 = vrot.slane %v8068_v47, 4  ;;  %v3050_v42 = vsel %vm1205_vm2, %v7993_v48, %v3049_v13  ;;  %4661 = vmatpush1.bf16.msra.mxu1 %v5585_v7  ;;  %v3664_v48 = vld [vmem:[#allocation2 + $0x150] sm:$0xff] }
 0x227   : > { %3086 = vst [vmem:[#allocation2 + $0x1d8] sm:$0x33] %v3050_v42 }
 0x228   : > { %v1976_v44 = vsel %vm1203_vm5, %v1947_v24, %v1948_v27 }
 0x229   : > { %v3529_v63 = vpop.permute.xlu0 %3528  ;;  %v1977_v19 = vsel %vm981_vm1, %v8005_v32, %v1976_v44  ;;  %v8081_v20 = vpop.permute.xlu1 %3530 }
 0x22a   : > { %v3551_v29 = vrot.slane %v3529_v63, 4  ;;  %2012 = vst [vmem:[#allocation2 + $0xe0] sm:$0x33] %v1977_v19  ;;  %v3552_v28 = vrot.slane %v8081_v20, 4  ;;  %v3680_v37 = vld [vmem:[#allocation2 + $0x1d0] sm:$0xff] }
 0x22b   : > { %v5615_v59 = vcombine.low %v3664_v48, %v3680_v37  ;;  %v5616_v61 = vcombine.high %v3664_v48, %v3680_v37 }
 0x22c   : > { %v3577_v39 = vsel %vm1203_vm5, %v3550_v16, %v3551_v29  ;;  %v3579_v5 = vsel %vm1203_vm5, %v3551_v29, %v3552_v28 }
 0x22d   : > { %v3578_v46 = vsel %vm981_vm1, %v7954_v52, %v3577_v39  ;;  %v1442_v36 = vpop.permute.xlu0 %1441  ;;  %v3580_v32 = vsel %vm981_vm1, %v3529_v63, %v3579_v5  ;;  %v8093_v24 = vpop.permute.xlu1 %1443  ;;  %4621 = vmatprep.subr.bf16.mxu0 %v5616_v61 }
 0x22e   : > { %3615 = vst [vmem:[#allocation2 + $0x250] sm:$0x33] %v3578_v46  ;;  %v1462_v51 = vrot.slane %v1442_v36, 4  ;;  %3616 = vst [vmem:[#allocation2 + $0x258] sm:$0x33] %v3580_v32  ;;  %v1463_v16 = vrot.slane %v8093_v24, 4  ;;  %4622 = vmatpush1.bf16.msra.mxu0 %v5615_v59 }
 0x22f   : > { %v3681_v35 = vld [vmem:[#allocation2 + $0x1d8] sm:$0xff] }
 0x230   : > { %v1491_v52 = vsel %vm1203_vm5, %v1461_v33, %v1462_v51  ;;  %v5617_v25 = vcombine.low %v3665_v56, %v3681_v35  ;;  %v5618_v9 = vcombine.high %v3665_v56, %v3681_v35  ;;  %v1493_v11 = vsel %vm1203_vm5, %v1462_v51, %v1463_v16 }
 0x231   : > { %v1492_v43 = vsel %vm1467_vm6, %v7966_v1, %v1491_v52  ;;  %v1494_v21 = vsel %vm1467_vm6, %v1442_v36, %v1493_v11  ;;  %v8105_v18 = vpop.permute.xlu1 %2248 }
 0x232   : > { %v2247_v50 = vpop.permute.xlu0 %2246  ;;  %1527 = vst [vmem:[#allocation2 + $0x60] sm:$0xcc] %v1492_v43  ;;  %4662 = vmatprep.subr.bf16.mxu1 %v5618_v9  ;;  %1528 = vst [vmem:[#allocation2 + $0x68] sm:$0xcc] %v1494_v21  ;;  %v2268_v33 = vrot.slane %v8105_v18, 4 }
 0x233   : > { %v2267_v45 = vrot.slane %v2247_v50, 4  ;;  %4663 = vmatpush1.bf16.msra.mxu1 %v5617_v25 }
 0x235   : > { %v2296_v1 = vsel %vm1203_vm5, %v2266_v34, %v2267_v45  ;;  %v3696_v22 = vld [vmem:[#allocation2 + $0x250] sm:$0x33]  ;;  %v2298_v53 = vsel %vm1203_vm5, %v2267_v45, %v2268_v33  ;;  %v8120_v0 = vpop.permute.xlu1 %3002  ;;  %v3697_v34 = vld [vmem:[#allocation2 + $0x258] sm:$0x33] }
 0x236   : > { %v2297_v2 = vsel %vm2272_vm4, %v7978_v55, %v2296_v1  ;;  %v8113_v31 = vpop.permute.xlu0 %1180  ;;  %v5648_v6 = vcombine.high %v3696_v22, %v3696_v22  ;;  %v5647_v30 = vcombine.low %v3696_v22, %v3696_v22  ;;  %v2299_v14 = vsel %vm2272_vm4, %v2247_v50, %v2298_v53 }
 0x237   : > { %2332 = vst [vmem:[#allocation2 + $0xe0] sm:$0xcc] %v2297_v2  ;;  %v1200_v38 = vrot.slane %v8113_v31, 4  ;;  %2333 = vst [vmem:[#allocation2 + $0xe8] sm:$0xcc] %v2299_v14  ;;  %v3023_v55 = vrot.slane %v8120_v0, 4  ;;  %v5650_v26 = vcombine.high %v3697_v34, %v3697_v34  ;;  %v5649_v7 = vcombine.low %v3697_v34, %v3697_v34 }
 0x238   : > { %5679 = vmatprep.subr.msk.bf16.mxu0 %vm983_vm3, %v5648_v6  ;;  %v4174_v41 = vsel %vm983_vm3, %v5647_v30, 0 }
 0x239   : > { %v1231_v3 = vsel %vm1203_vm5, %v1199_v17, %v1200_v38  ;;  %4624 = vmatpush1.bf16.msra.mxu0 %v4174_v41  ;;  %v3051_v58 = vsel %vm1203_vm5, %v3022_v60, %v3023_v55  ;;  %5681 = vmatprep.subr.msk.bf16.mxu1 %vm983_vm3, %v5650_v26  ;;  %v8141_v13 = vpop.permute.xlu1 %2735  ;;  %v3634_v44 = vld [vmem:[#allocation2 + $0x60] sm:$0xff] }
 0x23a   : > { %v1232_v8 = vsel %vm1205_vm2, %v8046_v4, %v1231_v3  ;;  %v8130_v23 = vpop.permute.xlu0 %1929  ;;  %v3052_v54 = vsel %vm1205_vm2, %v8058_v57, %v3051_v58  ;;  %v4180_v4 = vsel %vm983_vm3, %v5649_v7, 0  ;;  %v2755_v57 = vrot.slane %v8141_v13, 4 }
 0x23b   : > { %1266 = vst [vmem:[#allocation2 + $0x68] sm:$0x33] %v1232_v8  ;;  %v1949_v17 = vrot.slane %v8130_v23, 4  ;;  %3087 = vst [vmem:[#allocation2 + $0x1e0] sm:$0x33] %v3052_v54  ;;  %4665 = vmatpush1.bf16.msra.mxu1 %v4180_v4 }
 0x23c   : > { %5680 = vmatmul.mubr.msk.bf16.vlgmr.msra.gmra.mrb[20].mxu0 %vm4108_vm7, %v8023_v12 }
 0x23d   : > { %v1978_v42 = vsel %vm1203_vm5, %v1948_v27, %v1949_v17  ;;  %4733 = vmatprep.mubr.bf16.mxu0 %v9094_v15  ;;  %v8153_v37 = vpop.permute.xlu1 %3265 }
 0x23e   : > { %v1979_v60 = vsel %vm981_vm1, %v8068_v47, %v1978_v42  ;;  %v2734_v63 = vpop.permute.xlu0 %2733  ;;  %v3650_v29 = vld [vmem:[#allocation2 + $0xe0] sm:$0xff]  ;;  %5682 = vmatmul.mubr.msk.bf16.vlgmr.msra.gmra.mrb[20].mxu1 %vm4108_vm7, %v8023_v12  ;;  %v3285_v27 = vrot.slane %v8153_v37, 4 }
 0x23f   : > { %2013 = vst [vmem:[#allocation2 + $0xe8] sm:$0x33] %v1979_v60  ;;  %v2754_v19 = vrot.slane %v2734_v63, 4  ;;  %v5587_v39 = vcombine.low %v3634_v44, %v3650_v29  ;;  %v5588_v48 = vcombine.high %v3634_v44, %v3650_v29  ;;  %4774 = vmatprep.mubr.bf16.mxu1 %v9094_v15 }
 0x241   : > { %v2782_v47 = vsel %vm1203_vm5, %v2753_v40, %v2754_v19  ;;  %v2784_v46 = vsel %vm1203_vm5, %v2754_v19, %v2755_v57  ;;  %4701 = vmatprep.subr.bf16.mxu0 %v5588_v48  ;;  %v8168_v51 = vpop.permute.xlu1 %1182 }
 0x242   : > { %v2783_v36 = vsel %vm2049_vm0, %v8015_v49, %v2782_v47  ;;  %v2785_v59 = vsel %vm2049_vm0, %v2734_v63, %v2784_v46  ;;  %4702 = vmatpush1.bf16.msra.mxu0 %v5587_v39  ;;  %v3264_v61 = vpop.permute.xlu0 %3263  ;;  %v1201_v40 = vrot.slane %v8168_v51, 4  ;;  %v3635_v43 = vld [vmem:[#allocation2 + $0x68] sm:$0xff] }
 0x243   : > { %2818 = vst [vmem:[#allocation2 + $0x160] sm:$0xcc] %v2783_v36  ;;  %2819 = vst [vmem:[#allocation2 + $0x168] sm:$0xcc] %v2785_v59  ;;  %v3284_v5 = vrot.slane %v3264_v61, 4 }
 0x244   : > { %v1233_v25 = vsel %vm1203_vm5, %v1200_v38, %v1201_v40 }
 0x245   : > { %v3312_v32 = vsel %vm1203_vm5, %v3283_v10, %v3284_v5  ;;  %v3314_v52 = vsel %vm1203_vm5, %v3284_v5, %v3285_v27  ;;  %v1234_v45 = vsel %vm1205_vm2, %v8113_v31, %v1233_v25 }
 0x246   : > { %v3313_v49 = vsel %vm1467_vm6, %v8033_v62, %v3312_v32  ;;  %v3315_v56 = vsel %vm1467_vm6, %v3264_v61, %v3314_v52  ;;  %v8180_v35 = vpop.permute.xlu0 %3004  ;;  %v3651_v50 = vld [vmem:[#allocation2 + $0xe8] sm:$0xff]  ;;  %v8188_v62 = vpop.permute.xlu1 %1931  ;;  %1267 = vst [vmem:[#allocation2 + $0x70] sm:$0x33] %v1234_v45 }
 0x247   : > { %3348 = vst [vmem:[#allocation2 + $0x1e0] sm:$0xcc] %v3313_v49  ;;  %3349 = vst [vmem:[#allocation2 + $0x1e8] sm:$0xcc] %v3315_v56  ;;  %v3024_v10 = vrot.slane %v8180_v35, 4  ;;  %v5589_v9 = vcombine.low %v3635_v43, %v3651_v50  ;;  %v5590_v11 = vcombine.high %v3635_v43, %v3651_v50  ;;  %v1950_v21 = vrot.slane %v8188_v62, 4 }
 0x249   : > { %v3053_v1 = vsel %vm1203_vm5, %v3023_v55, %v3024_v10  ;;  %4742 = vmatprep.subr.bf16.mxu1 %v5590_v11  ;;  %v1980_v31 = vsel %vm1203_vm5, %v1949_v17, %v1950_v21 }
 0x24a   : > { %v3054_v2 = vsel %vm1205_vm2, %v8120_v0, %v3053_v1  ;;  %4743 = vmatpush1.bf16.msra.mxu1 %v5589_v9  ;;  %v3533_v22 = vpop.permute.xlu0 %3532  ;;  %v1981_v38 = vsel %vm981_vm1, %v8130_v23, %v1980_v31  ;;  %v8203_v6 = vpop.permute.xlu1 %3534  ;;  %v3666_v55 = vld [vmem:[#allocation2 + $0x160] sm:$0xff]  ;;  %v3667_v4 = vld [vmem:[#allocation2 + $0x168] sm:$0xff] }
 0x24b   : > { %3088 = vst [vmem:[#allocation2 + $0x1e8] sm:$0x33] %v3054_v2  ;;  %v3553_v53 = vrot.slane %v3533_v22, 4  ;;  %2014 = vst [vmem:[#allocation2 + $0xf0] sm:$0x33] %v1981_v38  ;;  %v3554_v30 = vrot.slane %v8203_v6, 4 }
 0x24d   : > { %v3581_v14 = vsel %vm1203_vm5, %v3552_v28, %v3553_v53  ;;  %v3583_v26 = vsel %vm1203_vm5, %v3553_v53, %v3554_v30 }
 0x24e   : > { %v3582_v0 = vsel %vm981_vm1, %v8081_v20, %v3581_v14  ;;  %v1446_v34 = vpop.permute.xlu0 %1445  ;;  %v3682_v3 = vld [vmem:[#allocation2 + $0x1e0] sm:$0xff]  ;;  %v3584_v23 = vsel %vm981_vm1, %v3533_v22, %v3583_v26  ;;  %v1448_v58 = vpop.permute.xlu1 %1447 }
 0x24f   : > { %3617 = vst [vmem:[#allocation2 + $0x260] sm:$0x33] %v3582_v0  ;;  %v1464_v41 = vrot.slane %v1446_v34, 4  ;;  %v5619_v8 = vcombine.low %v3666_v55, %v3682_v3  ;;  %v5620_v7 = vcombine.high %v3666_v55, %v3682_v3  ;;  %3618 = vst [vmem:[#allocation2 + $0x268] sm:$0x33] %v3584_v23  ;;  %v1465_v17 = vrot.slane %v1448_v58, 4 }
 0x251   : > { %v1495_v20 = vsel %vm1203_vm5, %v1463_v16, %v1464_v41  ;;  %4703 = vmatprep.subr.bf16.mxu0 %v5620_v7  ;;  %v1497_v60 = vsel %vm1203_vm5, %v1464_v41, %v1465_v17 }
 0x252   : > { %v1496_v28 = vsel %vm1467_vm6, %v8093_v24, %v1495_v20  ;;  %4704 = vmatpush1.bf16.msra.mxu0 %v5619_v8  ;;  %v2251_v54 = vpop.permute.xlu0 %2250  ;;  %v3683_v42 = vld [vmem:[#allocation2 + $0x1e8] sm:$0xff]  ;;  %v1498_v19 = vsel %vm1467_vm6, %v1446_v34, %v1497_v60  ;;  %v2253_v39 = vpop.permute.xlu1 %2252 }
 0x253   : > { %1529 = vst [vmem:[#allocation2 + $0x70] sm:$0xcc] %v1496_v28  ;;  %v2269_v63 = vrot.slane %v2251_v54, 4  ;;  %v5621_v44 = vcombine.low %v3667_v4, %v3683_v42  ;;  %v5622_v29 = vcombine.high %v3667_v4, %v3683_v42  ;;  %1530 = vst [vmem:[#allocation2 + $0x78] sm:$0xcc] %v1498_v19  ;;  %v2270_v48 = vrot.slane %v2253_v39, 4 }
 0x255   : > { %v2300_v16 = vsel %vm1203_vm5, %v2268_v33, %v2269_v63  ;;  %4744 = vmatprep.subr.bf16.mxu1 %v5622_v29  ;;  %v2302_v36 = vsel %vm1203_vm5, %v2269_v63, %v2270_v48 }
 0x256   : > { %v2301_v24 = vsel %vm2272_vm4, %v8105_v18, %v2300_v16  ;;  %4745 = vmatpush1.bf16.msra.mxu1 %v5621_v44  ;;  %v1185_v47 = vpop.permute.xlu0 %1184  ;;  %v3698_v46 = vld [vmem:[#allocation2 + $0x260] sm:$0x33]  ;;  %v2303_v32 = vsel %vm2272_vm4, %v2251_v54, %v2302_v36  ;;  %v8229_v52 = vpop.permute.xlu1 %3006  ;;  %v3699_v49 = vld [vmem:[#allocation2 + $0x268] sm:$0x33] }
 0x257   : > { %2334 = vst [vmem:[#allocation2 + $0xf0] sm:$0xcc] %v2301_v24  ;;  %v1202_v59 = vrot.slane %v1185_v47, 4  ;;  %v5652_v61 = vcombine.high %v3698_v46, %v3698_v46  ;;  %v5651_v5 = vcombine.low %v3698_v46, %v3698_v46  ;;  %2335 = vst [vmem:[#allocation2 + $0xf8] sm:$0xcc] %v2303_v32  ;;  %v3025_v33 = vrot.slane %v8229_v52, 4 }
 0x258   : > { %v5654_v56 = vcombine.high %v3699_v49, %v3699_v49  ;;  %v5653_v25 = vcombine.low %v3699_v49, %v3699_v49 }
 0x259   : > { %v1235_v18 = vsel %vm1203_vm5, %v1201_v40, %v1202_v59  ;;  %5683 = vmatprep.subr.msk.bf16.mxu0 %vm983_vm3, %v5652_v61  ;;  %v4186_v43 = vsel %vm983_vm3, %v5651_v5, 0  ;;  %v3055_v11 = vsel %vm1203_vm5, %v3024_v10, %v3025_v33 }
 0x25a   : > { %v1236_v50 = vsel %vm1205_vm2, %v8168_v51, %v1235_v18  ;;  %4706 = vmatpush1.bf16.msra.mxu0 %v4186_v43  ;;  %v1934_v9 = vpop.permute.xlu0 %1933  ;;  %5685 = vmatprep.subr.msk.bf16.mxu1 %vm983_vm3, %v5654_v56  ;;  %v3056_v40 = vsel %vm1205_vm2, %v8180_v35, %v3055_v11  ;;  %v2740_v1 = vpop.permute.xlu1 %2739  ;;  %v4192_v2 = vsel %vm983_vm3, %v5653_v25, 0  ;;  %v3636_v31 = vld [vmem:[#allocation2 + $0x70] sm:$0xff] }
 0x25b   : > { %1268 = vst [vmem:[#allocation2 + $0x78] sm:$0x33] %v1236_v50  ;;  %v1951_v45 = vrot.slane %v1934_v9, 4  ;;  %3089 = vst [vmem:[#allocation2 + $0x1f0] sm:$0x33] %v3056_v40  ;;  %4747 = vmatpush1.bf16.msra.mxu1 %v4192_v2  ;;  %v2757_v35 = vrot.slane %v2740_v1, 4 }
 0x25d   : > { %v1982_v51 = vsel %vm1203_vm5, %v1950_v21, %v1951_v45  ;;  %5684 = vmatmul.mubr.msk.bf16.vlgmr.msra.gmra.mrb[24].mxu0 %vm4108_vm7, %v8023_v12 }
 0x25e   : > { %v1983_v10 = vsel %vm981_vm1, %v8188_v62, %v1982_v51  ;;  %v2738_v22 = vpop.permute.xlu0 %2737  ;;  %v3652_v53 = vld [vmem:[#allocation2 + $0xf0] sm:$0xff]  ;;  %4815 = vmatprep.mubr.bf16.mxu0 %v9094_v15  ;;  %5686 = vmatmul.mubr.msk.bf16.vlgmr.msra.gmra.mrb[24].mxu1 %vm4108_vm7, %v8023_v12  ;;  %v3270_v21 = vpop.permute.xlu1 %3269 }
 0x25f   : > { %2015 = vst [vmem:[#allocation2 + $0xf8] sm:$0x33] %v1983_v10  ;;  %v2756_v38 = vrot.slane %v2738_v22, 4  ;;  %v5591_v14 = vcombine.low %v3636_v31, %v3652_v53  ;;  %v5592_v0 = vcombine.high %v3636_v31, %v3652_v53  ;;  %v3287_v34 = vrot.slane %v3270_v21, 4  ;;  %4856 = vmatprep.mubr.bf16.mxu1 %v9094_v15 }
 0x261   : > { %v2786_v55 = vsel %vm1203_vm5, %v2755_v57, %v2756_v38  ;;  %v2788_v62 = vsel %vm1203_vm5, %v2756_v38, %v2757_v35  ;;  %4783 = vmatprep.subr.bf16.mxu0 %v5592_v0 }
 0x262   : > { %v2787_v3 = vsel %vm2049_vm0, %v8141_v13, %v2786_v55  ;;  %v2789_v26 = vsel %vm2049_vm0, %v2738_v22, %v2788_v62  ;;  %4784 = vmatpush1.bf16.msra.mxu0 %v5591_v14  ;;  %v3268_v41 = vpop.permute.xlu0 %3267  ;;  %v3637_v13 = vld [vmem:[#allocation2 + $0x78] sm:$0xff]  ;;  %v3539_v4 = vpop.permute.xlu1 %3538 }
 0x263   : > { %2820 = vst [vmem:[#allocation2 + $0x170] sm:$0xcc] %v2787_v3  ;;  %2821 = vst [vmem:[#allocation2 + $0x178] sm:$0xcc] %v2789_v26  ;;  %v3286_v8 = vrot.slane %v3268_v41, 4 }
 0x265   : > { %v3316_v7 = vsel %vm1203_vm5, %v3285_v27, %v3286_v8  ;;  %v3318_v57 = vsel %vm1203_vm5, %v3286_v8, %v3287_v34 }
 0x266   : > { %v3317_v23 = vsel %vm1467_vm6, %v8153_v37, %v3316_v7  ;;  %v3319_v15 = vsel %vm1467_vm6, %v3268_v41, %v3318_v57  ;;  %v3009_v58 = vpop.permute.xlu0 %3008  ;;  %v3653_v17 = vld [vmem:[#allocation2 + $0xf8] sm:$0xff]  ;;  %v3556_v37 = vrot.slane %v3539_v4, 4 }
 0x267   : > { %3350 = vst [vmem:[#allocation2 + $0x1f0] sm:$0xcc] %v3317_v23  ;;  %3351 = vst [vmem:[#allocation2 + $0x1f8] sm:$0xcc] %v3319_v15  ;;  %v3026_v20 = vrot.slane %v3009_v58, 4  ;;  %v5593_v28 = vcombine.low %v3637_v13, %v3653_v17  ;;  %v5594_v54 = vcombine.high %v3637_v13, %v3653_v17 }
 0x269   : > { %v3057_v42 = vsel %vm1203_vm5, %v3025_v33, %v3026_v20  ;;  %4824 = vmatprep.subr.bf16.mxu1 %v5594_v54 }
 0x26a   : > { %v3058_v27 = vsel %vm1205_vm2, %v8229_v52, %v3057_v42  ;;  %4825 = vmatpush1.bf16.msra.mxu1 %v5593_v28  ;;  %v3537_v60 = vpop.permute.xlu0 %3536  ;;  %v3668_v48 = vld [vmem:[#allocation2 + $0x170] sm:$0xff]  ;;  %v3669_v46 = vld [vmem:[#allocation2 + $0x178] sm:$0xff] }
 0x26b   : > { %3090 = vst [vmem:[#allocation2 + $0x1f8] sm:$0x33] %v3058_v27  ;;  %v3555_v63 = vrot.slane %v3537_v60, 4 }
 0x26d   : > { %v3585_v44 = vsel %vm1203_vm5, %v3554_v30, %v3555_v63  ;;  %v3587_v29 = vsel %vm1203_vm5, %v3555_v63, %v3556_v37 }
 0x26e   : > { %v3586_v19 = vsel %vm981_vm1, %v8203_v6, %v3585_v44  ;;  %v3588_v39 = vsel %vm981_vm1, %v3537_v60, %v3587_v29  ;;  %v3684_v16 = vld [vmem:[#allocation2 + $0x1f0] sm:$0xff] }
 0x26f   : > { %3619 = vst [vmem:[#allocation2 + $0x270] sm:$0x33] %v3586_v19  ;;  %3620 = vst [vmem:[#allocation2 + $0x278] sm:$0x33] %v3588_v39  ;;  %v5623_v24 = vcombine.low %v3668_v48, %v3684_v16  ;;  %v5624_v47 = vcombine.high %v3668_v48, %v3684_v16 }
 0x271   : > { %4785 = vmatprep.subr.bf16.mxu0 %v5624_v47 }
 0x272   : > { %4786 = vmatpush1.bf16.msra.mxu0 %v5623_v24  ;;  %v3685_v36 = vld [vmem:[#allocation2 + $0x1f8] sm:$0xff] }
 0x273   : > { %v5625_v59 = vcombine.low %v3669_v46, %v3685_v36  ;;  %v5626_v61 = vcombine.high %v3669_v46, %v3685_v36 }
 0x275   : > { %4826 = vmatprep.subr.bf16.mxu1 %v5626_v61 }
 0x276   : > { %4827 = vmatpush1.bf16.msra.mxu1 %v5625_v59  ;;  %v3700_v30 = vld [vmem:[#allocation2 + $0x270] sm:$0x33]  ;;  %v3701_v5 = vld [vmem:[#allocation2 + $0x278] sm:$0x33] }
 0x277   : > { %v5656_v32 = vcombine.high %v3700_v30, %v3700_v30  ;;  %v5658_v6 = vcombine.high %v3701_v5, %v3701_v5  ;;  %v5655_v52 = vcombine.low %v3700_v30, %v3700_v30  ;;  %v5657_v49 = vcombine.low %v3701_v5, %v3701_v5 }
 0x279   : > { %5687 = vmatprep.subr.msk.bf16.mxu0 %vm983_vm3, %v5656_v32  ;;  %5689 = vmatprep.subr.msk.bf16.mxu1 %vm983_vm3, %v5658_v6  ;;  %v4198_v33 = vsel %vm983_vm3, %v5655_v52, 0  ;;  %v4204_v18 = vsel %vm983_vm3, %v5657_v49, 0 }
 0x27a   : > { %4788 = vmatpush1.bf16.msra.mxu0 %v4198_v33  ;;  %4829 = vmatpush1.bf16.msra.mxu1 %v4204_v18 }
 0x27b   : > { %v8289_v58 = vpop.permute.xlu0 %3705 }
 0x27d   : > { %5688 = vmatmul.mubr.msk.bf16.vlgmr.msra.gmra.mrb[28].mxu0 %vm4108_vm7, %v8023_v12  ;;  %5690 = vmatmul.mubr.msk.bf16.vlgmr.msra.gmra.mrb[28].mxu1 %vm4108_vm7, %v8023_v12 }
 0x284   : > { %v4243_v56 = vpop.f32.mrb[0].mxu0 }
 0x285   : > { %v4245_v43 = vpop.f32.mrb[1].mxu0  ;;  %v4284_v50 = vpop.f32.mrb[0].mxu1  ;;  %v8292_v13 = vadd.f32 %v4243_v56, %v8289_v58 }
 0x286   : > { %v4247_v25 = vpop.f32.mrb[2].mxu0  ;;  %v4286_v9 = vpop.f32.mrb[1].mxu1  ;;  %v8295_v17 = vadd.f32 %v4245_v43, %v8289_v58  ;;  %v8298_v20 = vadd.f32 %v4284_v50, %v8289_v58 }
 0x287   : > { %v4248_v11 = vpop.f32.mrb[3].mxu0  ;;  %v4288_v45 = vpop.f32.mrb[2].mxu1  ;;  %v8304_v4 = vadd.f32 %v4286_v9, %v8289_v58 }
 0x288   : > { %v4289_v40 = vpop.f32.mrb[3].mxu1  ;;  %v4929_v28 = vadd.f32 %v8295_v17, %v8292_v13 }
 0x28a   : > { %v4930_v54 = vadd.f32 %v4929_v28, %v8298_v20 }
 0x28c   : > { %v4931_v44 = vadd.f32 %v4930_v54, %v8304_v4 }
 0x293   : > { %v4325_v1 = vpop.f32.mrb[4].mxu0 }
 0x294   : > { %v4327_v2 = vpop.f32.mrb[5].mxu0  ;;  %v4366_v51 = vpop.f32.mrb[4].mxu1  ;;  %v8308_v29 = vadd.f32 %v4325_v1, %v8289_v58 }
 0x295   : > { %v4329_v10 = vpop.f32.mrb[6].mxu0  ;;  %v4368_v22 = vpop.f32.mrb[5].mxu1  ;;  %v8312_v24 = vadd.f32 %v4327_v2, %v8289_v58  ;;  %v8316_v46 = vadd.f32 %v4366_v51, %v8289_v58 }
 0x296   : > { %v4330_v31 = vpop.f32.mrb[7].mxu0  ;;  %v4370_v53 = vpop.f32.mrb[6].mxu1  ;;  %v4932_v16 = vadd.f32 %v4931_v44, %v8308_v29  ;;  %v8320_v59 = vadd.f32 %v4368_v22, %v8289_v58 }
 0x297   : > { %v4371_v35 = vpop.f32.mrb[7].mxu1 }
 0x298   : > { %v4933_v47 = vadd.f32 %v4932_v16, %v8312_v24 }
 0x29a   : > { %v4934_v36 = vadd.f32 %v4933_v47, %v8316_v46 }
 0x29c   : > { %v4935_v61 = vadd.f32 %v4934_v36, %v8320_v59 }
 0x2ac   : > { %v4407_v38 = vpop.f32.mrb[8].mxu0 }
 0x2ad   : > { %v4409_v14 = vpop.f32.mrb[9].mxu0  ;;  %v8324_v30 = vadd.f32 %v4407_v38, %v8289_v58 }
 0x2ae   : > { %v4448_v0 = vpop.f32.mrb[8].mxu1  ;;  %v4411_v12 = vpop.f32.mrb[10].mxu0  ;;  %v8328_v32 = vadd.f32 %v4409_v14, %v8289_v58 }
 0x2af   : > { %v4450_v21 = vpop.f32.mrb[9].mxu1  ;;  %v4412_v34 = vpop.f32.mrb[11].mxu0  ;;  %v4936_v5 = vadd.f32 %v4935_v61, %v8324_v30  ;;  %v8332_v52 = vadd.f32 %v4448_v0, %v8289_v58 }
 0x2b0   : > { %v4452_v55 = vpop.f32.mrb[10].mxu1  ;;  %v8336_v33 = vadd.f32 %v4450_v21, %v8289_v58 }
 0x2b1   : > { %v4453_v62 = vpop.f32.mrb[11].mxu1  ;;  %v4937_v6 = vadd.f32 %v4936_v5, %v8328_v32 }
 0x2b3   : > { %v4938_v49 = vadd.f32 %v4937_v6, %v8332_v52 }
 0x2b5   : > { %v4939_v50 = vadd.f32 %v4938_v49, %v8336_v33 }
 0x2cc   : > { %v4489_v3 = vpop.f32.mrb[12].mxu0 }
 0x2cd   : > { %v4491_v26 = vpop.f32.mrb[13].mxu0  ;;  %v8340_v25 = vadd.f32 %v4489_v3, %v8289_v58 }
 0x2ce   : > { %v4493_v41 = vpop.f32.mrb[14].mxu0  ;;  %v4530_v8 = vpop.f32.mrb[12].mxu1  ;;  %v8344_v51 = vadd.f32 %v4491_v26, %v8289_v58 }
 0x2cf   : > { %v4494_v7 = vpop.f32.mrb[15].mxu0  ;;  %v4532_v57 = vpop.f32.mrb[13].mxu1  ;;  %v4940_v2 = vadd.f32 %v4939_v50, %v8340_v25  ;;  %v8348_v22 = vadd.f32 %v4530_v8, %v8289_v58 }
 0x2d0   : > { %v4534_v23 = vpop.f32.mrb[14].mxu1  ;;  %v8352_v53 = vadd.f32 %v4532_v57, %v8289_v58 }
 0x2d1   : > { %v4535_v15 = vpop.f32.mrb[15].mxu1  ;;  %v4941_v10 = vadd.f32 %v4940_v2, %v8344_v51 }
 0x2d3   : > { %v4942_v31 = vadd.f32 %v4941_v10, %v8348_v22 }
 0x2d5   : > { %v4943_v35 = vadd.f32 %v4942_v31, %v8352_v53 }
 0x2eb   : > { %v4571_v42 = vpop.f32.mrb[16].mxu0 }
 0x2ec   : > { %v4573_v27 = vpop.f32.mrb[17].mxu0  ;;  %v8356_v38 = vadd.f32 %v4571_v42, %v8289_v58 }
 0x2ed   : > { %v4575_v60 = vpop.f32.mrb[18].mxu0  ;;  %v8360_v0 = vadd.f32 %v4573_v27, %v8289_v58 }
 0x2ee   : > { %v4612_v37 = vpop.f32.mrb[16].mxu1  ;;  %v4576_v63 = vpop.f32.mrb[19].mxu0  ;;  %v4944_v14 = vadd.f32 %v4943_v35, %v8356_v38 }
 0x2ef   : > { %v4614_v19 = vpop.f32.mrb[17].mxu1  ;;  %v8364_v21 = vadd.f32 %v4612_v37, %v8289_v58 }
 0x2f0   : > { %v4616_v39 = vpop.f32.mrb[18].mxu1  ;;  %v4945_v12 = vadd.f32 %v4944_v14, %v8360_v0  ;;  %v8368_v55 = vadd.f32 %v4614_v19, %v8289_v58 }
 0x2f1   : > { %v4617_v48 = vpop.f32.mrb[19].mxu1 }
 0x2f2   : > { %v4946_v34 = vadd.f32 %v4945_v12, %v8364_v21 }
 0x2f4   : > { %v4947_v41 = vadd.f32 %v4946_v34, %v8368_v55 }
 0x30f   : > { %v4653_v18 = vpop.f32.mrb[20].mxu0 }
 0x310   : > { %v4655_v56 = vpop.f32.mrb[21].mxu0  ;;  %v8372_v8 = vadd.f32 %v4653_v18, %v8289_v58 }
 0x311   : > { %v4657_v43 = vpop.f32.mrb[22].mxu0  ;;  %v4694_v9 = vpop.f32.mrb[20].mxu1  ;;  %v8376_v42 = vadd.f32 %v4655_v56, %v8289_v58 }
 0x312   : > { %v4658_v11 = vpop.f32.mrb[23].mxu0  ;;  %v4696_v45 = vpop.f32.mrb[21].mxu1  ;;  %v4948_v54 = vadd.f32 %v4947_v41, %v8372_v8  ;;  %v8380_v60 = vadd.f32 %v4694_v9, %v8289_v58 }
 0x313   : > { %v4698_v40 = vpop.f32.mrb[22].mxu1  ;;  %v8384_v63 = vadd.f32 %v4696_v45, %v8289_v58 }
 0x314   : > { %v4699_v1 = vpop.f32.mrb[23].mxu1  ;;  %v4949_v27 = vadd.f32 %v4948_v54, %v8376_v42 }
 0x316   : > { %v4950_v37 = vadd.f32 %v4949_v27, %v8380_v60 }
 0x318   : > { %v4951_v19 = vadd.f32 %v4950_v37, %v8384_v63 }
 0x330   : > { %v4735_v62 = vpop.f32.mrb[24].mxu0 }
 0x331   : > { %v4737_v3 = vpop.f32.mrb[25].mxu0  ;;  %v4776_v7 = vpop.f32.mrb[24].mxu1  ;;  %v8387_v44 = vadd.f32 %v4735_v62, %v8289_v58 }
 0x332   : > { %v4739_v26 = vpop.f32.mrb[26].mxu0  ;;  %v4778_v23 = vpop.f32.mrb[25].mxu1  ;;  %v8391_v39 = vadd.f32 %v4737_v3, %v8289_v58  ;;  %v8396_v47 = vadd.f32 %v4776_v7, %v8289_v58 }
 0x333   : > { %v4740_v57 = vpop.f32.mrb[27].mxu0  ;;  %v4780_v15 = vpop.f32.mrb[26].mxu1  ;;  %v4952_v48 = vadd.f32 %v4951_v19, %v8387_v44  ;;  %v8400_v61 = vadd.f32 %v4778_v23, %v8289_v58 }
 0x334   : > { %v4781_v28 = vpop.f32.mrb[27].mxu1 }
 0x335   : > { %v4953_v16 = vadd.f32 %v4952_v48, %v8391_v39 }
 0x337   : > { %v4954_v36 = vadd.f32 %v4953_v16, %v8396_v47 }
 0x339   : > { %v4955_v43 = vadd.f32 %v4954_v36, %v8400_v61 }
 0x350   : > { %v4817_v5 = vpop.f32.mrb[28].mxu0  ;;  %v4858_v6 = vpop.f32.mrb[28].mxu1 }
 0x351   : > { %v8403_v49 = vadd.f32 %v4817_v5, %v8289_v58  ;;  %v4819_v18 = vpop.f32.mrb[29].mxu0  ;;  %v4860_v56 = vpop.f32.mrb[29].mxu1  ;;  %v8411_v2 = vadd.f32 %v4858_v6, %v8289_v58 }
 0x352   : > { %v8407_v50 = vadd.f32 %v4819_v18, %v8289_v58  ;;  %v4821_v9 = vpop.f32.mrb[30].mxu0  ;;  %v4862_v11 = vpop.f32.mrb[30].mxu1  ;;  %v8415_v31 = vadd.f32 %v4860_v56, %v8289_v58 }
 0x353   : > { %v4822_v45 = vpop.f32.mrb[31].mxu0  ;;  %v4863_v40 = vpop.f32.mrb[31].mxu1  ;;  %v4956_v1 = vadd.f32 %v4955_v43, %v8403_v49 }
 0x355   : > { %v4957_v10 = vadd.f32 %v4956_v1, %v8407_v50 }
 0x357   : > { %v4958_v35 = vadd.f32 %v4957_v10, %v8411_v2 }
 0x359   : > { %v4959_v14 = vadd.f32 %v4958_v35, %v8415_v31 }
 0x35b   : > { %4960 = vadd.xlane.f32.xlu1 %v4959_v14 }
 0x3e8   : > { %v4961_v12 = vpop.xlane.xlu1 %4960 }
 0x3e9   : > { %v4962_v34 = vrot.slane %v4961_v12, 4 }
 0x3eb   : > { %v4963_v62 = vadd.f32 %v4962_v34, %v4961_v12 }
 0x3ed   : > { %v4964_v3 = vrot.slane %v4963_v62, 2 }
 0x3ef   : > { %v4965_v26 = vadd.f32 %v4964_v3, %v4963_v62 }
 0x3f1   : > { %v4966_v41 = vrot.slane %v4965_v26, 1 }
 0x3f3   : > { %v4967_v7 = vadd.f32 %v4966_v41, %v4965_v26 }
 0x3f5   : > { %5700 = vpush %v4967_v7 }
 0x426   : > { %s5701_s11 = spop %5700 }
 0x427   : > { %s4969_s14 = smul.f32 3.0517578e-05, %s5701_s11  ;;  %s5923_s11 = sshll.u32 %s6002_s8, 4  ;;  %s5924_s11 = int_to_ptr.vmem [resolvable:$false] %s5923_s11 }
 0x428   : > { %p5926_p8 = scmp.lt.s32.totalorder %s8983_s13, %s5924_s11 }
 0x429   : > { %v8419_v57 = vstv %s4969_s14  ;;  %s5925_s14 = scalar_lea.vmem %s5924_s11, 8192 }
 0x42a   : > { %v8423_v58 = vsub.f32 %v8292_v13, %v8419_v57  ;;  %v8427_v23 = vsub.f32 %v8295_v17, %v8419_v57  ;;  %v8431_v15 = vsub.f32 %v8298_v20, %v8419_v57  ;;  %v8439_v27 = vsub.f32 %v8304_v4, %v8419_v57  ;;  %p5927_p11 = scmp.lt.s32.totalorder %s5925_s14, %s5919_s27 }
 0x42b   : > { %v8443_v13 = vsub.f32 %v8308_v29, %v8419_v57  ;;  %v8449_v20 = vsub.f32 %v8312_v24, %v8419_v57  ;;  %v8455_v4 = vsub.f32 %v8316_v46, %v8419_v57  ;;  %v8461_v36 = vsub.f32 %v8320_v59, %v8419_v57 }
 0x42c   : > { %v5003_v28 = vmul.f32 %v8423_v58, %v8423_v58  ;;  %v5004_v54 = vmul.f32 %v8427_v23, %v8427_v23  ;;  %v5005_v17 = vmul.f32 %v8431_v15, %v8431_v15  ;;  %v5006_v19 = vmul.f32 %v8439_v27, %v8439_v27  ;;  %p5928_p3 = por %p5927_p11, %p5926_p8 }
 0x42d   : > { %v5007_v29 = vmul.f32 %v8443_v13, %v8443_v13  ;;  %v5008_v24 = vmul.f32 %v8449_v20, %v8449_v20  ;;  %v8467_v6 = vsub.f32 %v8324_v30, %v8419_v57  ;;  %v5009_v46 = vmul.f32 %v8455_v4, %v8455_v4 }
 0x42e   : > { %v5035_v37 = vadd.f32 %v5004_v54, %v5003_v28  ;;  %v8473_v56 = vsub.f32 %v8328_v32, %v8419_v57  ;;  %v5010_v59 = vmul.f32 %v8461_v36, %v8461_v36  ;;  %v8479_v9 = vsub.f32 %v8332_v52, %v8419_v57  ;;  %p5929_p7 = pnand %p5928_p3, %p5922_p4 }
 0x42f   : > { %v5011_v30 = vmul.f32 %v8467_v6, %v8467_v6  ;;  %v8485_v45 = vsub.f32 %v8336_v33, %v8419_v57  ;;  %v8491_v1 = vsub.f32 %v8340_v25, %v8419_v57  ;;  %v8497_v35 = vsub.f32 %v8344_v51, %v8419_v57 }
 0x430   : > { %v5036_v48 = vadd.f32 %v5035_v37, %v5005_v17  ;;  %v5012_v32 = vmul.f32 %v8473_v56, %v8473_v56  ;;  %v5013_v52 = vmul.f32 %v8479_v9, %v8479_v9  ;;  %v8503_v12 = vsub.f32 %v8348_v22, %v8419_v57 }
 0x431   : > { %v5014_v33 = vmul.f32 %v8485_v45, %v8485_v45  ;;  %v5015_v25 = vmul.f32 %v8491_v1, %v8491_v1  ;;  %v8509_v62 = vsub.f32 %v8352_v53, %v8419_v57  ;;  %v5016_v51 = vmul.f32 %v8497_v35, %v8497_v35 }
 0x432   : > { %v5037_v16 = vadd.f32 %v5036_v48, %v5006_v19  ;;  %v8515_v26 = vsub.f32 %v8356_v38, %v8419_v57  ;;  %v5017_v22 = vmul.f32 %v8503_v12, %v8503_v12  ;;  %v8521_v7 = vsub.f32 %v8360_v0, %v8419_v57 }
 0x433   : > { %v5018_v53 = vmul.f32 %v8509_v62, %v8509_v62  ;;  %v8527_v54 = vsub.f32 %v8364_v21, %v8419_v57  ;;  %v8533_v37 = vsub.f32 %v8368_v55, %v8419_v57  ;;  %v8539_v48 = vsub.f32 %v8372_v8, %v8419_v57 }
 0x434   : > { %v5038_v5 = vadd.f32 %v5037_v16, %v5007_v29  ;;  %v5019_v38 = vmul.f32 %v8515_v26, %v8515_v26  ;;  %v5020_v0 = vmul.f32 %v8521_v7, %v8521_v7  ;;  %v8545_v16 = vsub.f32 %v8376_v42, %v8419_v57 }
 0x435   : > { %v5021_v21 = vmul.f32 %v8527_v54, %v8527_v54  ;;  %v5022_v55 = vmul.f32 %v8533_v37, %v8533_v37  ;;  %v5023_v8 = vmul.f32 %v8539_v48, %v8539_v48 }
 0x436   : > { %v5039_v18 = vadd.f32 %v5038_v5, %v5008_v24  ;;  %v8551_v5 = vsub.f32 %v8380_v60, %v8419_v57  ;;  %v5024_v42 = vmul.f32 %v8545_v16, %v8545_v16 }
 0x438   : > { %v5040_v43 = vadd.f32 %v5039_v18, %v5009_v46  ;;  %v8557_v18 = vsub.f32 %v8384_v63, %v8419_v57  ;;  %v5025_v60 = vmul.f32 %v8551_v5, %v8551_v5 }
 0x43a   : > { %v5041_v11 = vadd.f32 %v5040_v43, %v5010_v59  ;;  %v8563_v43 = vsub.f32 %v8387_v44, %v8419_v57  ;;  %v5026_v63 = vmul.f32 %v8557_v18, %v8557_v18 }
 0x43c   : > { %v5042_v40 = vadd.f32 %v5041_v11, %v5011_v30  ;;  %v8569_v11 = vsub.f32 %v8391_v39, %v8419_v57  ;;  %v5027_v44 = vmul.f32 %v8563_v43, %v8563_v43 }
 0x43e   : > { %v5043_v10 = vadd.f32 %v5042_v40, %v5012_v32  ;;  %v8575_v40 = vsub.f32 %v8396_v47, %v8419_v57  ;;  %v5028_v39 = vmul.f32 %v8569_v11, %v8569_v11 }
 0x440   : > { %v5044_v14 = vadd.f32 %v5043_v10, %v5013_v52  ;;  %v8581_v10 = vsub.f32 %v8400_v61, %v8419_v57  ;;  %v5029_v47 = vmul.f32 %v8575_v40, %v8575_v40 }
 0x442   : > { %v5045_v34 = vadd.f32 %v5044_v14, %v5014_v33  ;;  %v8587_v14 = vsub.f32 %v8403_v49, %v8419_v57  ;;  %v5030_v61 = vmul.f32 %v8581_v10, %v8581_v10 }
 0x444   : > { %v5046_v3 = vadd.f32 %v5045_v34, %v5015_v25  ;;  %v8593_v34 = vsub.f32 %v8407_v50, %v8419_v57  ;;  %v5031_v49 = vmul.f32 %v8587_v14, %v8587_v14 }
 0x446   : > { %v5047_v41 = vadd.f32 %v5046_v3, %v5016_v51  ;;  %v8599_v3 = vsub.f32 %v8411_v2, %v8419_v57  ;;  %v5032_v50 = vmul.f32 %v8593_v34, %v8593_v34 }
 0x448   : > { %v5048_v28 = vadd.f32 %v5047_v41, %v5017_v22  ;;  %v8605_v41 = vsub.f32 %v8415_v31, %v8419_v57 }
 0x44a   : > { %v5049_v17 = vadd.f32 %v5048_v28, %v5018_v53  ;;  %v5033_v28 = vmul.f32 %v8599_v3, %v8599_v3  ;;  %v5034_v2 = vmul.f32 %v8605_v41, %v8605_v41 }
 0x44c   : > { %v5050_v19 = vadd.f32 %v5049_v17, %v5019_v38 }
 0x44e   : > { %v5051_v29 = vadd.f32 %v5050_v19, %v5020_v0 }
 0x450   : > { %v5052_v24 = vadd.f32 %v5051_v29, %v5021_v21 }
 0x452   : > { %v5053_v46 = vadd.f32 %v5052_v24, %v5022_v55 }
 0x454   : > { %v5054_v59 = vadd.f32 %v5053_v46, %v5023_v8 }
 0x456   : > { %v5055_v30 = vadd.f32 %v5054_v59, %v5024_v42  ;;  %v8613_v42 = vld [vmem:[#allocation6] sm:$0xff]  ;;  %v8615_v59 = vld [vmem:[#allocation6 + $0x8] sm:$0xff] }
 0x458   : > { %v5056_v32 = vadd.f32 %v5055_v30, %v5025_v60  ;;  %v8617_v60 = vld [vmem:[#allocation8] sm:$0xff]  ;;  %v8619_v30 = vld [vmem:[#allocation8 + $0x8] sm:$0xff] }
 0x45a   : > { %v5057_v52 = vadd.f32 %v5056_v32, %v5026_v63  ;;  %v8621_v63 = vld [vmem:[#allocation6 + $0x10] sm:$0xff]  ;;  %v8696_v32 = vld [vmem:[#allocation8 + $0x58] sm:$0xff] }
 0x45b   : > { %9107 = vst [vmem:[#allocation22_spill] sm:$0xff] %v8696_v32 }
 0x45c   : > { %v5058_v33 = vadd.f32 %v5057_v52, %v5027_v44  ;;  %v8624_v44 = vld [vmem:[#allocation8 + $0x10] sm:$0xff]  ;;  %v8626_v52 = vld [vmem:[#allocation6 + $0x18] sm:$0xff] }
 0x45d   : > { %9098 = vst [vmem:[#allocation13_spill] sm:$0xff] %v8624_v44 }
 0x45e   : > { %v5059_v25 = vadd.f32 %v5058_v33, %v5028_v39  ;;  %v8688_v33 = vld [vmem:[#allocation8 + $0x50] sm:$0xff] }
 0x45f   : > { %9106 = vst [vmem:[#allocation21_spill] sm:$0xff] %v8688_v33 }
 0x460   : > { %v5060_v51 = vadd.f32 %v5059_v25, %v5029_v47  ;;  %v8664_v25 = vld [vmem:[#allocation8 + $0x38] sm:$0xff]  ;;  %v8714_v47 = vld [vmem:[#allocation6 + $0x70] sm:$0xff] }
 0x461   : > { %9103 = vst [vmem:[#allocation18_spill] sm:$0xff] %v8664_v25 }
 0x462   : > { %v5061_v22 = vadd.f32 %v5060_v51, %v5030_v61  ;;  %v8632_v61 = vld [vmem:[#allocation8 + $0x18] sm:$0xff]  ;;  %v8634_v51 = vld [vmem:[#allocation6 + $0x20] sm:$0xff] }
 0x463   : > { %9099 = vst [vmem:[#allocation14_spill] sm:$0xff] %v8632_v61  ;;  %v8728_v61 = vld [vmem:[#allocation8 + $0x78] sm:$0xff] }
 0x464   : > { %v5062_v53 = vadd.f32 %v5061_v22, %v5031_v49  ;;  %v8722_v49 = vld [vmem:[#allocation6 + $0x78] sm:$0xff]  ;;  %9111 = vst [vmem:[#allocation26_spill] sm:$0xff] %v8728_v61 }
 0x466   : > { %v5063_v38 = vadd.f32 %v5062_v53, %v5032_v50  ;;  %v8680_v53 = vld [vmem:[#allocation8 + $0x48] sm:$0xff]  ;;  %v8690_v50 = vld [vmem:[#allocation6 + $0x58] sm:$0xff] }
 0x467   : > { %9105 = vst [vmem:[#allocation20_spill] sm:$0xff] %v8680_v53 }
 0x468   : > { %v5064_v17 = vadd.f32 %v5063_v38, %v5033_v28  ;;  %v8640_v28 = vld [vmem:[#allocation8 + $0x20] sm:$0xff]  ;;  %v8642_v38 = vld [vmem:[#allocation6 + $0x28] sm:$0xff] }
 0x469   : > { %9100 = vst [vmem:[#allocation15_spill] sm:$0xff] %v8640_v28  ;;  %v8720_v28 = vld [vmem:[#allocation8 + $0x70] sm:$0xff] }
 0x46a   : > { %v5065_v0 = vadd.f32 %v5064_v17, %v5034_v2  ;;  %v8706_v2 = vld [vmem:[#allocation6 + $0x68] sm:$0xff]  ;;  %9110 = vst [vmem:[#allocation25_spill] sm:$0xff] %v8720_v28 }
 0x46c   : > { %5066 = vadd.xlane.f32.xlu0 %v5065_v0  ;;  %v8674_v0 = vld [vmem:[#allocation6 + $0x48] sm:$0xff] }
 0x4f9   : > { %v5067_v19 = vpop.xlane.xlu0 %5066 }
 0x4fa   : > { %v5068_v21 = vrot.slane %v5067_v19, 4 }
 0x4fc   : > { %v5069_v29 = vadd.f32 %v5068_v21, %v5067_v19  ;;  %v8648_v21 = vld [vmem:[#allocation8 + $0x28] sm:$0xff]  ;;  %v8672_v19 = vld [vmem:[#allocation8 + $0x40] sm:$0xff] }
 0x4fd   : > { %9101 = vst [vmem:[#allocation16_spill] sm:$0xff] %v8648_v21  ;;  %9104 = vst [vmem:[#allocation19_spill] sm:$0xff] %v8672_v19  ;;  %v8712_v21 = vld [vmem:[#allocation8 + $0x68] sm:$0xff] }
 0x4fe   : > { %v5070_v55 = vrot.slane %v5069_v29, 2  ;;  %9109 = vst [vmem:[#allocation24_spill] sm:$0xff] %v8712_v21 }
 0x500   : > { %v5071_v31 = vadd.f32 %v5070_v55, %v5069_v29  ;;  %v8650_v29 = vld [vmem:[#allocation6 + $0x30] sm:$0xff]  ;;  %v8666_v55 = vld [vmem:[#allocation6 + $0x40] sm:$0xff] }
 0x502   : > { %v5072_v57 = vrot.slane %v5071_v31, 1 }
 0x504   : > { %v5073_v24 = vadd.f32 %v5072_v57, %v5071_v31  ;;  %v8682_v57 = vld [vmem:[#allocation6 + $0x50] sm:$0xff] }
 0x506   : > { %5702 = vpush %v5073_v24  ;;  %v8698_v24 = vld [vmem:[#allocation6 + $0x60] sm:$0xff] }
 0x537   : > { %s5703_s15 = spop %5702 }
 0x538   : > { %s5075_s16 = smul.f32 3.0517578e-05, %s5703_s15 }
 0x53a   : > { %s5076_s24 = sadd.f32 1e-05, %s5075_s16 }
 0x53c   : > { %v5077_v8 = vstv %s5076_s24 }
 0x53d   : > { %5830 = vrsqrt.f32 %v5077_v8  ;;  %v8656_v8 = vld [vmem:[#allocation8 + $0x30] sm:$0xff] }
 0x53e   : > { %9102 = vst [vmem:[#allocation17_spill] sm:$0xff] %v8656_v8  ;;  %v8704_v8 = vld [vmem:[#allocation8 + $0x60] sm:$0xff] }
 0x53f   : > { %9108 = vst [vmem:[#allocation23_spill] sm:$0xff] %v8704_v8 }
 0x547   : > { %v5831_v46 = vpop.eup %5830 }
 0x548   : > { %5704 = vpush %v5831_v46  ;;  %v8658_v46 = vld [vmem:[#allocation6 + $0x38] sm:$0xff] }
 0x579   : > { %s5705_s26 = spop %5704 }
 0x57a   : > { %v5080_v22 = vstv %s5705_s26 }
 0x57b   : > { %v5081_v53 = vmul.f32 %v5080_v22, %v8423_v58  ;;  %v5082_v25 = vmul.f32 %v5080_v22, %v8427_v23  ;;  %v5083_v32 = vmul.f32 %v5080_v22, %v8431_v15  ;;  %v5084_v17 = vmul.f32 %v5080_v22, %v8439_v27 }
 0x57c   : > { %v5085_v19 = vmul.f32 %v5080_v22, %v8443_v13  ;;  %v5086_v39 = vmul.f32 %v5080_v22, %v8449_v20  ;;  %v5087_v28 = vmul.f32 %v5080_v22, %v8455_v4  ;;  %v5088_v33 = vmul.f32 %v5080_v22, %v8461_v36 }
 0x57d   : > { %v5089_v8 = vmul.f32 %v5080_v22, %v8467_v6  ;;  %v5090_v31 = vmul.f32 %v5080_v22, %v8473_v56  ;;  %v5091_v58 = vmul.f32 %v5080_v22, %v8479_v9  ;;  %v5092_v23 = vmul.f32 %v5080_v22, %v8485_v45 }
 0x57e   : > { %v5093_v15 = vmul.f32 %v5080_v22, %v8491_v1  ;;  %v5094_v27 = vmul.f32 %v5080_v22, %v8497_v35  ;;  %v5095_v13 = vmul.f32 %v5080_v22, %v8503_v12  ;;  %v5096_v20 = vmul.f32 %v5080_v22, %v8509_v62 }
 0x57f   : > { %v5097_v4 = vmul.f32 %v5080_v22, %v8515_v26  ;;  %v5098_v36 = vmul.f32 %v5080_v22, %v8521_v7  ;;  %v5099_v6 = vmul.f32 %v5080_v22, %v8527_v54  ;;  %v5100_v56 = vmul.f32 %v5080_v22, %v8533_v37 }
 0x580   : > { %v5101_v9 = vmul.f32 %v5080_v22, %v8539_v48  ;;  %v5102_v45 = vmul.f32 %v5080_v22, %v8545_v16  ;;  %v5103_v1 = vmul.f32 %v5080_v22, %v8551_v5  ;;  %v5104_v35 = vmul.f32 %v5080_v22, %v8557_v18 }
 0x581   : > { %v5105_v12 = vmul.f32 %v5080_v22, %v8563_v43  ;;  %v5106_v62 = vmul.f32 %v5080_v22, %v8569_v11  ;;  %v5107_v26 = vmul.f32 %v5080_v22, %v8575_v40  ;;  %v5108_v7 = vmul.f32 %v5080_v22, %v8581_v10 }
 0x582   : > { %v5109_v54 = vmul.f32 %v5080_v22, %v8587_v14  ;;  %v5110_v37 = vmul.f32 %v5080_v22, %v8593_v34  ;;  %v5111_v48 = vmul.f32 %v5080_v22, %v8599_v3  ;;  %v5112_v16 = vmul.f32 %v5080_v22, %v8605_v41 }
 0x583   : > { %v9112_v5 = vunpack.c.l.bf16 %v8613_v42  ;;  %v9113_v18 = vunpack.c.h.bf16 %v8613_v42  ;;  %v9114_v11 = vunpack.c.l.bf16 %v8615_v59  ;;  %v9115_v40 = vunpack.c.h.bf16 %v8615_v59 }
 0x584   : > { %v9116_v14 = vunpack.c.l.bf16 %v8621_v63  ;;  %v9117_v34 = vunpack.c.h.bf16 %v8621_v63  ;;  %v9118_v41 = vunpack.c.l.bf16 %v8626_v52  ;;  %v9120_v42 = vunpack.c.l.bf16 %v8634_v51 }
 0x585   : > { %v5161_v61 = vmul.f32 %v9112_v5, %v5081_v53  ;;  %v5162_v43 = vmul.f32 %v9113_v18, %v5082_v25  ;;  %v5163_v21 = vmul.f32 %v9114_v11, %v5083_v32  ;;  %v5164_v10 = vmul.f32 %v9115_v40, %v5084_v17 }
 0x586   : > { %v5165_v44 = vmul.f32 %v9116_v14, %v5085_v19  ;;  %v5166_v3 = vmul.f32 %v9117_v34, %v5086_v39  ;;  %v5167_v22 = vmul.f32 %v9118_v41, %v5087_v28  ;;  %v9119_v53 = vunpack.c.h.bf16 %v8626_v52 }
 0x587   : > { %v5169_v25 = vmul.f32 %v9120_v42, %v5089_v8  ;;  %v9121_v32 = vunpack.c.h.bf16 %v8634_v51  ;;  %v9122_v59 = vunpack.c.l.bf16 %v8642_v38  ;;  %v9123_v19 = vunpack.c.h.bf16 %v8642_v38 }
 0x588   : > { %v5168_v5 = vmul.f32 %v9119_v53, %v5088_v33  ;;  %v9124_v63 = vunpack.c.l.bf16 %v8650_v29  ;;  %v9125_v28 = vunpack.c.h.bf16 %v8650_v29  ;;  %v9126_v52 = vunpack.c.l.bf16 %v8658_v46 }
 0x589   : > { %v5170_v18 = vmul.f32 %v9121_v32, %v5090_v31  ;;  %v5171_v17 = vmul.f32 %v9122_v59, %v5091_v58  ;;  %v5172_v11 = vmul.f32 %v9123_v19, %v5092_v23  ;;  %v9127_v8 = vunpack.c.h.bf16 %v8658_v46 }
 0x58a   : > { %v5173_v39 = vmul.f32 %v9124_v63, %v5093_v15  ;;  %v5174_v40 = vmul.f32 %v9125_v28, %v5094_v27  ;;  %v5175_v33 = vmul.f32 %v9126_v52, %v5095_v13  ;;  %v9128_v51 = vunpack.c.l.bf16 %v8666_v55 }
 0x58b   : > { %v5176_v14 = vmul.f32 %v9127_v8, %v5096_v20  ;;  %v9129_v58 = vunpack.c.h.bf16 %v8666_v55  ;;  %v9130_v38 = vunpack.c.l.bf16 %v8674_v0  ;;  %v9131_v15 = vunpack.c.h.bf16 %v8674_v0 }
 0x58c   : > { %v5177_v31 = vmul.f32 %v9128_v51, %v5097_v4  ;;  %v9132_v29 = vunpack.c.l.bf16 %v8682_v57  ;;  %v9133_v13 = vunpack.c.h.bf16 %v8682_v57  ;;  %v9134_v46 = vunpack.c.l.bf16 %v8690_v50 }
 0x58d   : > { %v5178_v34 = vmul.f32 %v9129_v58, %v5098_v36  ;;  %v5179_v23 = vmul.f32 %v9130_v38, %v5099_v6  ;;  %v5180_v41 = vmul.f32 %v9131_v15, %v5100_v56  ;;  %v9135_v4 = vunpack.c.h.bf16 %v8690_v50  ;;  %v9154_v38 = vld [vmem:[#allocation15_spill] sm:$0xff] }
 0x58e   : > { %v5181_v27 = vmul.f32 %v9132_v29, %v5101_v9  ;;  %v5182_v53 = vmul.f32 %v9133_v13, %v5102_v45  ;;  %v5183_v20 = vmul.f32 %v9134_v46, %v5103_v1  ;;  %v9136_v55 = vunpack.c.l.bf16 %v8698_v24 }
 0x58f   : > { %v5184_v42 = vmul.f32 %v9135_v4, %v5104_v35  ;;  %v9137_v6 = vunpack.c.h.bf16 %v8698_v24  ;;  %v9138_v0 = vunpack.c.l.bf16 %v8706_v2  ;;  %v9139_v9 = vunpack.c.h.bf16 %v8706_v2  ;;  %v9160_v4 = vld [vmem:[#allocation17_spill] sm:$0xff] }
 0x590   : > { %v5185_v36 = vmul.f32 %v9136_v55, %v5105_v12  ;;  %v9140_v57 = vunpack.c.l.bf16 %v8714_v47  ;;  %v9141_v1 = vunpack.c.h.bf16 %v8714_v47  ;;  %v9142_v50 = vunpack.c.l.bf16 %v8722_v49 }
 0x591   : > { %v5186_v32 = vmul.f32 %v9137_v6, %v5106_v62  ;;  %v5187_v56 = vmul.f32 %v9138_v0, %v5107_v26  ;;  %v5188_v59 = vmul.f32 %v9139_v9, %v5108_v7  ;;  %v9143_v12 = vunpack.c.h.bf16 %v8722_v49  ;;  %v9163_v0 = vld [vmem:[#allocation18_spill] sm:$0xff] }
 0x592   : > { %v5189_v45 = vmul.f32 %v9140_v57, %v5109_v54  ;;  %v5190_v19 = vmul.f32 %v9141_v1, %v5110_v37  ;;  %v5191_v35 = vmul.f32 %v9142_v50, %v5111_v48  ;;  %v9144_v24 = vunpack.c.l.bf16 %v8617_v60  ;;  %v9148_v37 = vld [vmem:[#allocation13_spill] sm:$0xff] }
 0x593   : > { %v5192_v63 = vmul.f32 %v9143_v12, %v5112_v16  ;;  %v9145_v26 = vunpack.c.h.bf16 %v8617_v60  ;;  %v9146_v7 = vunpack.c.l.bf16 %v8619_v30  ;;  %v9147_v54 = vunpack.c.h.bf16 %v8619_v30  ;;  %v9151_v16 = vld [vmem:[#allocation14_spill] sm:$0xff]  ;;  %v9157_v30 = vld [vmem:[#allocation16_spill] sm:$0xff] }
 0x594   : > { %v5241_v62 = vadd.f32 %v9144_v24, %v5161_v61  ;;  %v9149_v52 = vunpack.c.l.bf16 %v9148_v37  ;;  %v9150_v48 = vunpack.c.h.bf16 %v9148_v37  ;;  %v9152_v51 = vunpack.c.l.bf16 %v9151_v16  ;;  %v9169_v12 = vld [vmem:[#allocation20_spill] sm:$0xff]  ;;  %v9175_v37 = vld [vmem:[#allocation22_spill] sm:$0xff] }
 0x595   : > { %v5242_v2 = vadd.f32 %v9145_v26, %v5162_v43  ;;  %v5243_v28 = vadd.f32 %v9146_v7, %v5163_v21  ;;  %v5244_v47 = vadd.f32 %v9147_v54, %v5164_v10  ;;  %v9153_v61 = vunpack.c.h.bf16 %v9151_v16  ;;  %v9178_v16 = vld [vmem:[#allocation23_spill] sm:$0xff] }
 0x596   : > { %v5245_v8 = vadd.f32 %v9149_v52, %v5165_v44  ;;  %v5246_v49 = vadd.f32 %v9150_v48, %v5166_v3  ;;  %v5247_v58 = vadd.f32 %v9152_v51, %v5167_v22  ;;  %v9155_v43 = vunpack.c.l.bf16 %v9154_v38 }
 0x597   : > { %v5248_v60 = vadd.f32 %v9153_v61, %v5168_v5  ;;  %v9156_v21 = vunpack.c.h.bf16 %v9154_v38  ;;  %v9158_v10 = vunpack.c.l.bf16 %v9157_v30  ;;  %v9159_v44 = vunpack.c.h.bf16 %v9157_v30  ;;  %v9181_v38 = vld [vmem:[#allocation24_spill] sm:$0xff]  ;;  %v9184_v30 = vld [vmem:[#allocation25_spill] sm:$0xff] }
 0x598   : > { %v5249_v15 = vadd.f32 %v9155_v43, %v5169_v25  ;;  %v9161_v3 = vunpack.c.l.bf16 %v9160_v4  ;;  %v9162_v22 = vunpack.c.h.bf16 %v9160_v4  ;;  %v9164_v5 = vunpack.c.l.bf16 %v9163_v0  ;;  %v9187_v4 = vld [vmem:[#allocation26_spill] sm:$0xff] }
 0x599   : > { %v5250_v29 = vadd.f32 %v9156_v21, %v5170_v18  ;;  %v5251_v13 = vadd.f32 %v9158_v10, %v5171_v17  ;;  %v5252_v46 = vadd.f32 %v9159_v44, %v5172_v11  ;;  %v9165_v25 = vunpack.c.h.bf16 %v9163_v0  ;;  %v9166_v18 = vld [vmem:[#allocation19_spill] sm:$0xff] }
 0x59a   : > { %v5253_v55 = vadd.f32 %v9161_v3, %v5173_v39  ;;  %v5254_v6 = vadd.f32 %v9162_v22, %v5174_v40  ;;  %v5255_v9 = vadd.f32 %v9164_v5, %v5175_v33  ;;  %v9167_v1 = vunpack.c.l.bf16 %v9166_v18  ;;  %v9172_v33 = vld [vmem:[#allocation21_spill] sm:$0xff] }
 0x59b   : > { %v5256_v57 = vadd.f32 %v9165_v25, %v5176_v14  ;;  %v9168_v17 = vunpack.c.h.bf16 %v9166_v18  ;;  %v9170_v39 = vunpack.c.l.bf16 %v9169_v12  ;;  %v9171_v40 = vunpack.c.h.bf16 %v9169_v12 }
 0x59c   : > { %v8872_v50 = vadd.f32 %v9167_v1, %v5177_v31  ;;  %v9173_v7 = vunpack.c.l.bf16 %v9172_v33  ;;  %v9174_v54 = vunpack.c.h.bf16 %v9172_v33  ;;  %v9176_v52 = vunpack.c.l.bf16 %v9175_v37 }
 0x59d   : > { %v8876_v11 = vadd.f32 %v9168_v17, %v5178_v34  ;;  %v8880_v24 = vadd.f32 %v9170_v39, %v5179_v23  ;;  %v8884_v26 = vadd.f32 %v9171_v40, %v5180_v41  ;;  %v9177_v48 = vunpack.c.h.bf16 %v9175_v37 }
 0x59e   : > { %v8888_v14 = vadd.f32 %v9173_v7, %v5181_v27  ;;  %v8892_v31 = vadd.f32 %v9174_v54, %v5182_v53  ;;  %v8896_v34 = vadd.f32 %v9176_v52, %v5183_v20  ;;  %v9179_v51 = vunpack.c.l.bf16 %v9178_v16 }
 0x59f   : > { %v8900_v23 = vadd.f32 %v9177_v48, %v5184_v42  ;;  %v9180_v61 = vunpack.c.h.bf16 %v9178_v16  ;;  %v9182_v43 = vunpack.c.l.bf16 %v9181_v38  ;;  %v9183_v21 = vunpack.c.h.bf16 %v9181_v38 }
 0x5a0   : > { %v8904_v41 = vadd.f32 %v9179_v51, %v5185_v36  ;;  %v9185_v10 = vunpack.c.l.bf16 %v9184_v30  ;;  %v9186_v44 = vunpack.c.h.bf16 %v9184_v30  ;;  %v9188_v3 = vunpack.c.l.bf16 %v9187_v4 }
 0x5a1   : > { %v8908_v27 = vadd.f32 %v9180_v61, %v5186_v32  ;;  %v8912_v53 = vadd.f32 %v9182_v43, %v5187_v56  ;;  %v8916_v20 = vadd.f32 %v9183_v21, %v5188_v59  ;;  %v9189_v22 = vunpack.c.h.bf16 %v9187_v4 }
 0x5a2   : > { %v8920_v42 = vadd.f32 %v9185_v10, %v5189_v45  ;;  %v8924_v36 = vadd.f32 %v9186_v44, %v5190_v19  ;;  %v8928_v32 = vadd.f32 %v9188_v3, %v5191_v35  ;;  %v5273_v0 = vmax.f32 %v5241_v62, 0.0 }
 0x5a3   : > { %v8932_v56 = vadd.f32 %v9189_v22, %v5192_v63  ;;  %v5274_v5 = vmax.f32 %v5242_v2, 0.0  ;;  %v5275_v59 = vmax.f32 %v5243_v28, 0.0  ;;  %v5276_v25 = vmax.f32 %v5244_v47, 0.0 }
 0x5a4   : > { %v5277_v18 = vmax.f32 %v5245_v8, 0.0  ;;  %v5278_v1 = vmax.f32 %v5246_v49, 0.0  ;;  %v5279_v45 = vmax.f32 %v5247_v58, 0.0  ;;  %v5280_v17 = vmax.f32 %v5248_v60, 0.0  ;;  %5305 = vst [vmem:[%s8934_s10] sm:$0xff] %v5273_v0 }
 0x5a5   : > { %v5281_v12 = vmax.f32 %v5249_v15, 0.0  ;;  %v5282_v39 = vmax.f32 %v5250_v29, 0.0  ;;  %v5283_v19 = vmax.f32 %v5251_v13, 0.0  ;;  %v5284_v40 = vmax.f32 %v5252_v46, 0.0  ;;  %5306 = vst [vmem:[%s8934_s10 + $0x8] sm:$0xff] %v5274_v5  ;;  %5307 = vst [vmem:[%s8934_s10 + $0x10] sm:$0xff] %v5275_v59 }
 0x5a6   : > { %5308 = vst [vmem:[%s8934_s10 + $0x18] sm:$0xff] %v5276_v25  ;;  %v5285_v35 = vmax.f32 %v5253_v55, 0.0  ;;  %v5286_v63 = vmax.f32 %v5254_v6, 0.0  ;;  %v5287_v62 = vmax.f32 %v5255_v9, 0.0  ;;  %v5288_v2 = vmax.f32 %v5256_v57, 0.0  ;;  %5309 = vst [vmem:[%s8934_s10 + $0x20] sm:$0xff] %v5277_v18 }
 0x5a7   : > { %5310 = vst [vmem:[%s8934_s10 + $0x28] sm:$0xff] %v5278_v1  ;;  %5311 = vst [vmem:[%s8934_s10 + $0x30] sm:$0xff] %v5279_v45  ;;  %v5289_v28 = vmax.f32 %v8872_v50, 0.0  ;;  %v5290_v47 = vmax.f32 %v8876_v11, 0.0  ;;  %v5291_v8 = vmax.f32 %v8880_v24, 0.0  ;;  %v5292_v49 = vmax.f32 %v8884_v26, 0.0 }
 0x5a8   : > { %5312 = vst [vmem:[%s8934_s10 + $0x38] sm:$0xff] %v5280_v17  ;;  %5313 = vst [vmem:[%s8934_s10 + $0x40] sm:$0xff] %v5281_v12  ;;  %v5293_v58 = vmax.f32 %v8888_v14, 0.0  ;;  %v5294_v60 = vmax.f32 %v8892_v31, 0.0  ;;  %v5295_v15 = vmax.f32 %v8896_v34, 0.0  ;;  %v5296_v29 = vmax.f32 %v8900_v23, 0.0 }
 0x5a9   : > { %5314 = vst [vmem:[%s8934_s10 + $0x48] sm:$0xff] %v5282_v39  ;;  %5315 = vst [vmem:[%s8934_s10 + $0x50] sm:$0xff] %v5283_v19  ;;  %v5297_v13 = vmax.f32 %v8904_v41, 0.0  ;;  %v5298_v46 = vmax.f32 %v8908_v27, 0.0  ;;  %v5299_v55 = vmax.f32 %v8912_v53, 0.0  ;;  %v5300_v6 = vmax.f32 %v8916_v20, 0.0 }
 0x5aa   : > { %5316 = vst [vmem:[%s8934_s10 + $0x58] sm:$0xff] %v5284_v40  ;;  %5317 = vst [vmem:[%s8934_s10 + $0x60] sm:$0xff] %v5285_v35  ;;  %v5301_v9 = vmax.f32 %v8920_v42, 0.0  ;;  %v5302_v57 = vmax.f32 %v8924_v36, 0.0  ;;  %v5303_v50 = vmax.f32 %v8928_v32, 0.0  ;;  %v5304_v11 = vmax.f32 %v8932_v56, 0.0 }
 0x5ab   : > { %5318 = vst [vmem:[%s8934_s10 + $0x68] sm:$0xff] %v5286_v63  ;;  %5319 = vst [vmem:[%s8934_s10 + $0x70] sm:$0xff] %v5287_v62 }
 0x5ac   : > { %5320 = vst [vmem:[%s8934_s10 + $0x78] sm:$0xff] %v5288_v2  ;;  %5321 = vst [vmem:[%s8934_s10 + $0x80] sm:$0xff] %v5289_v28 }
 0x5ad   : > { %5322 = vst [vmem:[%s8934_s10 + $0x88] sm:$0xff] %v5290_v47  ;;  %5323 = vst [vmem:[%s8934_s10 + $0x90] sm:$0xff] %v5291_v8 }
 0x5ae   : > { %5324 = vst [vmem:[%s8934_s10 + $0x98] sm:$0xff] %v5292_v49  ;;  %5325 = vst [vmem:[%s8934_s10 + $0xa0] sm:$0xff] %v5293_v58 }
 0x5af   : > { %5326 = vst [vmem:[%s8934_s10 + $0xa8] sm:$0xff] %v5294_v60  ;;  %5327 = vst [vmem:[%s8934_s10 + $0xb0] sm:$0xff] %v5295_v15 }
 0x5b0   : > { %5328 = vst [vmem:[%s8934_s10 + $0xb8] sm:$0xff] %v5296_v29  ;;  %5329 = vst [vmem:[%s8934_s10 + $0xc0] sm:$0xff] %v5297_v13 }
 0x5b1   : > { %5330 = vst [vmem:[%s8934_s10 + $0xc8] sm:$0xff] %v5298_v46  ;;  %5331 = vst [vmem:[%s8934_s10 + $0xd0] sm:$0xff] %v5299_v55 }
 0x5b2   : > { %5332 = vst [vmem:[%s8934_s10 + $0xd8] sm:$0xff] %v5300_v6  ;;  %5333 = vst [vmem:[%s8934_s10 + $0xe0] sm:$0xff] %v5301_v9 }
 0x5b3   : > { %5334 = vst [vmem:[%s8934_s10 + $0xe8] sm:$0xff] %v5302_v57  ;;  %5335 = vst [vmem:[%s8934_s10 + $0xf0] sm:$0xff] %v5303_v50 }
 0x5b4   : > { %5336 = vst [vmem:[%s8934_s10 + $0xf8] sm:$0xff] %v5304_v11 }
 0x5b5   : > { %5932 = shalt.err (!%p5929_p7)
}
 0x5b6   : > { %s5933_s28 = scalar_lea.hbm %s8981_s30, 4096  ;;  %s5937_s24 = scalar_lea.hbm %s9038_s5, 8192 }
 0x5b7   : > { %p5934_p10 = scmp.ne.s32.totalorder %s8981_s30, %s5933_s28  ;;  %p5938_p0 = scmp.lt.u32.totalorder %s8981_s30, %s9038_s5 }
 0x5b8   : > { %p5939_p12 = scmp.lt.u32.totalorder %s5937_s24, %s5933_s28  ;;  %p5941_p2 = scmp.lt.u32.totalorder %s5933_s28, %s8981_s30 }
 0x5b9   : > { %p5935_p13 = pnand %p5934_p10, %p6152_p6 }
 0x5ba   : > { %p5940_p9 = por %p5939_p12, %p5938_p0 }
 0x5bb   : > { %p5936_p5 = pneg %p5935_p13 }
 0x5bc   : > { %p5942_p1 = por %p5941_p2, %p5940_p9 }
 0x5be   : > { %p5943_p4 = pnand %p5942_p1, %p5936_p5 }
 0x5c0   : > { %5946 = shalt.err (!%p5943_p4)
}
 0x5c1   : > { %5716 = dma.vmem_to_hbm [thread:$0]  (%p6152_p6), %s8983_s13, 4096, %s8981_s30, %s5338_s23  }
 0x5c2 PF: > { %s5364_s10 = sand.u32 1, %s5977_s18   ;;  %p9190_p8 = scmp.ne.s32.totalorder %s9078_s25, 0 }
 0x5c3   : > { %p9191_p11 = scmp.ge.s32.totalorder %s5989_s21, 2  ;;  %s5365_s12 = scalar_lea.sflag [#allocation5], %s5364_s10 }
 0x5c5   : > { %p5730_p3 = pnand %p9191_p11, %p9190_p8 }
 0x5c7   : > { %5972 = dma.done.wait (!%p5730_p3), %s5365_s12, 4096  }
 0x5c8   : > { %5974 = vsyncadd (!%p5730_p3), %s5365_s12, 4294963200  ;;  %p19_p7 = scmp.ge.s32.totalorder %s6089_s7, 4   ;;  %s9192_s18 = smov %s5981_s19 }
 0x5c9   : > { %s9193_s19 = smov %s5985_s20  ;;  %s9194_s20 = smov %s6148_s6 }
 0x5ca   : > { %s9195_s21 = smov %s6089_s7  ;;  %21 = sbr.rel (!%p19_p7) target bundleno = 6 (0x6), region = 93 }
 0x5d1   :  { %5370 = vsyncpa [#allocation4], 1 }
 0x5d2   :  { %5372 = vsyncpa [#allocation4 + $0x1], 1 }
 0x5d3   :  { %5373 = vsyncpa [#allocation7], 1 }
 0x5d4   :  { %5374 = vsyncpa [#allocation5], 1 }
 0x5d5   :  { %5376 = vsyncpa [#allocation5 + $0x1], 1 }

</bundles_post_ra>
